<compile_context>
chip_gen: v6e
topology: v6e:2x2x1
jax: 0.10.0
libtpu: 0.0.40
codegen_flags: <defaults>
</compile_context>

<pallas_src>
import functools

import jax
import jax.numpy as jnp
from jax.experimental import pallas as pl
from jax.experimental.pallas import tpu as pltpu


def _round_up(x, m):
    return (x + m - 1) // m * m


# Safe on every generation: v5e/v6e have 128 MiB physical VMEM, v7x has 64 MiB.
_VMEM_LIMIT = 32 * 1024 * 1024


# ---------------------------------------------------------------------------
# Pallas kernels
# ---------------------------------------------------------------------------
def _mm_bias_relu_kernel(x_ref, w_ref, b_ref, o_ref):
    """o = relu(x @ w + b); bf16 operands, f32 MXU accumulation, bf16 store."""
    acc = jnp.dot(x_ref[...], w_ref[...], preferred_element_type=jnp.float32)
    acc = acc + b_ref[...]                      # (1, Np) broadcasts over rows
    o_ref[...] = jnp.maximum(acc, 0.0).astype(o_ref.dtype)


def _fc_head_softmax_kernel(x_ref, w1_ref, b1_ref, w2_ref, b2_ref, o_ref, *, action_size):
    """Fused FC + heads + softmax.

    feats = relu(x @ w1 + b1)
    acc   = feats @ w2 + b2       # cols [0, A): actor logits, col A: critic value
    out   = softmax(logits) on cols [0, A); raw value kept in col A.
    """
    h = jnp.dot(x_ref[...], w1_ref[...], preferred_element_type=jnp.float32)
    h = jnp.maximum(h + b1_ref[...], 0.0)
    acc = jnp.dot(h.astype(w2_ref.dtype), w2_ref[...], preferred_element_type=jnp.float32)
    acc = acc + b2_ref[...]

    col = jax.lax.broadcasted_iota(jnp.int32, acc.shape, 1)
    is_logit = col < action_size
    logits = jnp.where(is_logit, acc, -1e30)
    m = jnp.max(logits, axis=-1, keepdims=True)
    e = jnp.exp(logits - m)
    probs = e / jnp.sum(e, axis=-1, keepdims=True)
    o_ref[...] = jnp.where(is_logit, probs, acc)


# ---------------------------------------------------------------------------
# Pallas wrappers
# ---------------------------------------------------------------------------
def _matmul_bias_relu(x, wp, bp, tm_max=512):
    """x: (M, K) bf16 (unpadded); wp: (Kp, Np) bf16 pre-padded; bp: (1, Np) f32.

    Returns (Mp, Np) bf16 (caller slices off the padding). Grid is tiled over M
    only (N/K are small), marked parallel so v7x can shard it across its 2 TCs.
    """
    M, K = x.shape
    Kp, Np = wp.shape
    tm = min(tm_max, _round_up(M, 8))
    Mp = _round_up(M, tm)
    if (Mp, Kp) == (M, K):
        xp = x
    else:
        xp = jnp.zeros((Mp, Kp), jnp.bfloat16).at[:M, :K].set(x)
    return pl.pallas_call(
        _mm_bias_relu_kernel,
        out_shape=jax.ShapeDtypeStruct((Mp, Np), jnp.bfloat16),
        grid=(Mp // tm,),
        in_specs=[
            pl.BlockSpec((tm, Kp), lambda i: (i, 0)),
            pl.BlockSpec((Kp, Np), lambda i: (0, 0)),   # weight block stays resident
            pl.BlockSpec((1, Np), lambda i: (0, 0)),
        ],
        out_specs=pl.BlockSpec((tm, Np), lambda i: (i, 0)),
        compiler_params=pltpu.CompilerParams(
            dimension_semantics=("parallel",),
            vmem_limit_bytes=_VMEM_LIMIT,
        ),
    )(xp, wp, bp)


def _im2col_nhwc(x, kh, kw, stride):
    """x: (B, H, W, C) -> patches (B*OH*OW, KH*KW*C), K ordered (ki, kj, c)."""
    B, H, W, C = x.shape
    oh = (H - kh) // stride + 1
    ow = (W - kw) // stride + 1
    taps = []
    for ki in range(kh):
        for kj in range(kw):
            taps.append(x[:, ki:ki + stride * oh:stride, kj:kj + stride * ow:stride, :])
    patches = jnp.stack(taps, axis=3)           # (B, oh, ow, kh*kw, C)
    return patches.reshape(B * oh * ow, kh * kw * C), oh, ow


def conv2d_relu_nhwc(x, wp, bp, oc, kh, kw, stride):
    """x: (B, H, W, IC) bf16; wp/bp pre-padded by prepare_params -> (B, OH, OW, OC) bf16."""
    # TODO(synk): im2col is still XLA-side strided slicing; a fully fused single-pallas_call
    # network with in-VMEM im2col would remove this remaining HBM patch traffic.
    B = x.shape[0]
    patches, oh, ow = _im2col_nhwc(x, kh, kw, stride)
    out = _matmul_bias_relu(patches, wp, bp)
    M = B * oh * ow
    return out[:M, :oc].reshape(B, oh, ow, oc)


def fc_heads_softmax(flat, fc_w, fc_b, head_w, head_b, action_size):
    """flat: (B, 3136) bf16 -> (mass (B, A) f32, value (B, 1) f32) in a single fused kernel."""
    B, K = flat.shape
    Kp, Hp = fc_w.shape
    _, Np = head_w.shape
    tb = min(256, _round_up(B, 8))
    Bp = _round_up(B, tb)
    xp = jnp.zeros((Bp, Kp), jnp.bfloat16).at[:B, :K].set(flat)
    out = pl.pallas_call(
        functools.partial(_fc_head_softmax_kernel, action_size=action_size),
        out_shape=jax.ShapeDtypeStruct((Bp, Np), jnp.float32),
        grid=(Bp // tb,),
        in_specs=[
            pl.BlockSpec((tb, Kp), lambda i: (i, 0)),
            pl.BlockSpec((Kp, Hp), lambda i: (0, 0)),
            pl.BlockSpec((1, Hp), lambda i: (0, 0)),
            pl.BlockSpec((Hp, Np), lambda i: (0, 0)),
            pl.BlockSpec((1, Np), lambda i: (0, 0)),
        ],
        out_specs=pl.BlockSpec((tb, Np), lambda i: (i, 0)),
        compiler_params=pltpu.CompilerParams(
            dimension_semantics=("parallel",),
            vmem_limit_bytes=_VMEM_LIMIT,
        ),
    )(xp, fc_w, fc_b, head_w, head_b)
    mass = out[:B, :action_size]
    value = out[:B, action_size:action_size + 1]
    return mass, value


# ---------------------------------------------------------------------------
# Parameters: synthetic torch-layout init + one-time kernel-layout preparation
# ---------------------------------------------------------------------------
def init_params(key, input_size=4, hidden=128, action_size=6):
    """Deterministic synthetic init in PyTorch weight layouts (float32)."""
    ks = jax.random.split(key, 6)

    def w_init(k, fan_in, shape):
        return jax.random.normal(k, shape, jnp.float32) / jnp.sqrt(float(fan_in))

    return {
        "c1_w": w_init(ks[0], input_size * 8 * 8, (32, input_size, 8, 8)),
        "c1_b": jnp.zeros((32,), jnp.float32),
        "c2_w": w_init(ks[1], 32 * 4 * 4, (64, 32, 4, 4)),
        "c2_b": jnp.zeros((64,), jnp.float32),
        "c3_w": w_init(ks[2], 64 * 3 * 3, (64, 64, 3, 3)),
        "c3_b": jnp.zeros((64,), jnp.float32),
        "fc_w": w_init(ks[3], 64 * 7 * 7, (hidden, 64 * 7 * 7)),   # torch Linear (out, in)
        "fc_b": jnp.zeros((hidden,), jnp.float32),
        "critic_w": w_init(ks[4], hidden, (1, hidden)),
        "critic_b": jnp.zeros((1,), jnp.float32),
        "actor_w": w_init(ks[5], hidden, (action_size, hidden)),
        "actor_b": jnp.zeros((action_size,), jnp.float32),
    }


def prepare_params(p):
    """One-time prep: fold 1/255 into conv1 weights, transpose to matmul layout,
    permute fc input ordering to NHWC flatten, pad to TPU tiles, cast weights to bf16."""
    hidden = p["fc_w"].shape[0]
    action_size = p["actor_w"].shape[0]

    def prep_conv(w, b, scale=1.0):
        oc, ic, kh, kw = w.shape
        k = kh * kw * ic
        kp, np_ = _round_up(k, 128), _round_up(oc, 128)
        w2 = (w * scale).transpose(2, 3, 1, 0).reshape(k, oc)       # K ordered (ki, kj, c)
        wp = jnp.zeros((kp, np_), jnp.bfloat16).at[:k, :oc].set(w2.astype(jnp.bfloat16))
        bp = jnp.zeros((1, np_), jnp.float32).at[0, :oc].set(b.astype(jnp.float32))
        return wp, bp

    c1_w, c1_b = prep_conv(p["c1_w"], p["c1_b"], scale=1.0 / 255.0)  # 1/255 folded into weights
    c2_w, c2_b = prep_conv(p["c2_w"], p["c2_b"])
    c3_w, c3_b = prep_conv(p["c3_w"], p["c3_b"])

    # FC: torch flatten order is NCHW (c, h, w); ours is NHWC (h, w, c) -> permute once here.
    k = 64 * 7 * 7
    kp, hp = _round_up(k, 128), _round_up(hidden, 128)
    fcw = p["fc_w"].reshape(hidden, 64, 7, 7).transpose(0, 2, 3, 1).reshape(hidden, k).T
    fc_w = jnp.zeros((kp, hp), jnp.bfloat16).at[:k, :hidden].set(fcw.astype(jnp.bfloat16))
    fc_b = jnp.zeros((1, hp), jnp.float32).at[0, :hidden].set(p["fc_b"])

    # Heads fused into one matmul: columns [0, A) = actor logits, column A = critic value.
    hw = jnp.concatenate([p["actor_w"], p["critic_w"]], axis=0).T    # (hidden, A+1)
    hb = jnp.concatenate([p["actor_b"], p["critic_b"]], axis=0)      # (A+1,)
    np_ = _round_up(action_size + 1, 128)
    head_w = jnp.zeros((hp, np_), jnp.bfloat16).at[:hidden, :action_size + 1].set(
        hw.astype(jnp.bfloat16))
    head_b = jnp.zeros((1, np_), jnp.float32).at[0, :action_size + 1].set(hb)

    return {
        "c1_w": c1_w, "c1_b": c1_b,
        "c2_w": c2_w, "c2_b": c2_b,
        "c3_w": c3_w, "c3_b": c3_b,
        "fc_w": fc_w, "fc_b": fc_b,
        "head_w": head_w, "head_b": head_b,
    }


# ---------------------------------------------------------------------------
# Forward pass
# ---------------------------------------------------------------------------
def nature_cnn_forward(params, x, *, action_size):
    """x: uint8-valued floats, reshaped to (-1, 4, 84, 84) exactly like the torch .view."""
    x = x.reshape(-1, 4, 84, 84)                                    # NCHW, as in torch
    x = jnp.transpose(x, (0, 2, 3, 1)).astype(jnp.bfloat16)         # NHWC; 1/255 is in c1_w
    b = x.shape[0]

    h = conv2d_relu_nhwc(x, params["c1_w"], params["c1_b"], oc=32, kh=8, kw=8, stride=4)  # (B,20,20,32)
    h = conv2d_relu_nhwc(h, params["c2_w"], params["c2_b"], oc=64, kh=4, kw=4, stride=2)  # (B, 9, 9,64)
    h = conv2d_relu_nhwc(h, params["c3_w"], params["c3_b"], oc=64, kh=3, kw=3, stride=1)  # (B, 7, 7,64)
    flat = h.reshape(b, 7 * 7 * 64)           # NHWC flatten (fc_w pre-permuted to match)

    # ActionDistribution(use_probs=False) => Categorical(logits); return its pmf + value.
    # TODO(synk): the torch Distribution object itself has no array equivalent; we return softmax probs.
    mass, value = fc_heads_softmax(flat, params["fc_w"], params["fc_b"],
                                   params["head_w"], params["head_b"], action_size)
    return mass, value


if __name__ == "__main__":
    HIDDEN = 128
    ACTION_SIZE = 6
    key = jax.random.PRNGKey(0)
    k_params, k_x = jax.random.split(key)

    raw_params = init_params(k_params, input_size=4, hidden=HIDDEN, action_size=ACTION_SIZE)
    params = prepare_params(raw_params)   # one-time pad/transpose/bf16 cast, outside the forward

    # Atari frames: batch=2, 4 stacked 84x84 frames, values in [0, 255].
    x = jax.random.randint(k_x, (2, 4, 84, 84), 0, 256).astype(jnp.float32)

    fwd = jax.jit(functools.partial(nature_cnn_forward, action_size=ACTION_SIZE))
    mass, value = fwd(params, x)
    jax.block_until_ready((mass, value))

    assert mass.shape == (2, ACTION_SIZE) and value.shape == (2, 1)
    assert jnp.allclose(jnp.sum(mass, axis=-1), 1.0, atol=1e-4)
    print("KERNEL_OK")
</pallas_src>

<mosaic_0001>
module attributes {stable_mosaic.version = 11 : i64} {
  func.func @_mm_bias_relu_kernel(%arg0: i32, %arg1: memref<512x256xbf16, #tpu.memory_space<vmem>>, %arg2: memref<256x128xbf16, #tpu.memory_space<vmem>>, %arg3: memref<1x128xf32, #tpu.memory_space<vmem>>, %arg4: memref<512x128xbf16, #tpu.memory_space<vmem>>) attributes {dimension_semantics = [#tpu.dimension_semantics<parallel>], iteration_bounds = array<i64: 2>, scalar_prefetch = 0 : i64, scratch_operands = 0 : i64, tpu.core_type = #tpu.core_type<tc>, window_params = [{transform_indices = @transform_0, window_bounds = array<i64: 512, 256>}, {pipeline_mode = #tpu.pipeline_mode<synchronous>, transform_indices = @transform_1, window_bounds = array<i64: 256, 128>}, {pipeline_mode = #tpu.pipeline_mode<synchronous>, transform_indices = @transform_2, window_bounds = array<i64: 1, 128>}, {transform_indices = @transform_3, window_bounds = array<i64: 512, 128>}]} {
    %c0 = arith.constant 0 : index
    %c0_0 = arith.constant 0 : index
    %0 = vector.load %arg1[%c0, %c0_0] : memref<512x256xbf16, #tpu.memory_space<vmem>>, vector<512x256xbf16>
    %c0_1 = arith.constant 0 : index
    %c0_2 = arith.constant 0 : index
    %1 = vector.load %arg2[%c0_1, %c0_2] : memref<256x128xbf16, #tpu.memory_space<vmem>>, vector<256x128xbf16>
    %cst = arith.constant dense<0.000000e+00> : vector<512x128xf32>
    %2 = tpu.matmul %0, %1, %cst {dimension_numbers = #tpu.dot_dimension_numbers<[1], [0], [0], [1], [0, 0, 1, 1], [], []>} : vector<512x256xbf16>, vector<256x128xbf16>, vector<512x128xf32> -> vector<512x128xf32>
    %c0_3 = arith.constant 0 : index
    %c0_4 = arith.constant 0 : index
    %3 = vector.load %arg3[%c0_3, %c0_4] : memref<1x128xf32, #tpu.memory_space<vmem>>, vector<1x128xf32>
    %4 = vector.broadcast %3 : vector<1x128xf32> to vector<512x128xf32>
    %5 = arith.addf %2, %4 : vector<512x128xf32>
    %cst_5 = arith.constant 0.000000e+00 : f32
    %6 = vector.broadcast %cst_5 : f32 to vector<512x128xf32>
    %7 = arith.maximumf %5, %6 : vector<512x128xf32>
    %8 = arith.truncf %7 : vector<512x128xf32> to vector<512x128xbf16>
    %c0_6 = arith.constant 0 : index
    %c0_7 = arith.constant 0 : index
    %9 = vector.load %arg4[%c0_6, %c0_7] : memref<512x128xbf16, #tpu.memory_space<vmem>>, vector<512x128xbf16>
    tpu.vector_store %arg4[%c0_6, %c0_7], %8 {strides = array<i32>} : memref<512x128xbf16, #tpu.memory_space<vmem>>, vector<512x128xbf16>,
    return
  }
  func.func @transform_0(%arg0: i32) -> (i32, i32) {
    %c0_i32 = arith.constant 0 : i32
    %c0_i32_0 = arith.constant 0 : i32
    return %arg0, %c0_i32 : i32, i32
  }
  func.func @transform_1(%arg0: i32) -> (i32, i32) {
    %c0_i32 = arith.constant 0 : i32
    %c0_i32_0 = arith.constant 0 : i32
    %c0_i32_1 = arith.constant 0 : i32
    return %c0_i32, %c0_i32_0 : i32, i32
  }
  func.func @transform_2(%arg0: i32) -> (i32, i32) {
    %c0_i32 = arith.constant 0 : i32
    %c0_i32_0 = arith.constant 0 : i32
    %c0_i32_1 = arith.constant 0 : i32
    return %c0_i32, %c0_i32_0 : i32, i32
  }
  func.func @transform_3(%arg0: i32) -> (i32, i32) {
    %c0_i32 = arith.constant 0 : i32
    %c0_i32_0 = arith.constant 0 : i32
    return %arg0, %c0_i32 : i32, i32
  }
}

module attributes {stable_mosaic.version = 11 : i64} {
  func.func @_mm_bias_relu_kernel(%arg0: i32, %arg1: memref<168x512xbf16, #tpu.memory_space<vmem>>, %arg2: memref<512x128xbf16, #tpu.memory_space<vmem>>, %arg3: memref<1x128xf32, #tpu.memory_space<vmem>>, %arg4: memref<168x128xbf16, #tpu.memory_space<vmem>>) attributes {dimension_semantics = [#tpu.dimension_semantics<parallel>], iteration_bounds = array<i64: 1>, scalar_prefetch = 0 : i64, scratch_operands = 0 : i64, tpu.core_type = #tpu.core_type<tc>, window_params = [{transform_indices = @transform_0, window_bounds = array<i64: 168, 512>}, {pipeline_mode = #tpu.pipeline_mode<synchronous>, transform_indices = @transform_1, window_bounds = array<i64: 512, 128>}, {pipeline_mode = #tpu.pipeline_mode<synchronous>, transform_indices = @transform_2, window_bounds = array<i64: 1, 128>}, {transform_indices = @transform_3, window_bounds = array<i64: 168, 128>}]} {
    %c0 = arith.constant 0 : index
    %c0_0 = arith.constant 0 : index
    %0 = vector.load %arg1[%c0, %c0_0] : memref<168x512xbf16, #tpu.memory_space<vmem>>, vector<168x512xbf16>
    %c0_1 = arith.constant 0 : index
    %c0_2 = arith.constant 0 : index
    %1 = vector.load %arg2[%c0_1, %c0_2] : memref<512x128xbf16, #tpu.memory_space<vmem>>, vector<512x128xbf16>
    %cst = arith.constant dense<0.000000e+00> : vector<168x128xf32>
    %2 = tpu.matmul %0, %1, %cst {dimension_numbers = #tpu.dot_dimension_numbers<[1], [0], [0], [1], [0, 0, 1, 1], [], []>} : vector<168x512xbf16>, vector<512x128xbf16>, vector<168x128xf32> -> vector<168x128xf32>
    %c0_3 = arith.constant 0 : index
    %c0_4 = arith.constant 0 : index
    %3 = vector.load %arg3[%c0_3, %c0_4] : memref<1x128xf32, #tpu.memory_space<vmem>>, vector<1x128xf32>
    %4 = vector.broadcast %3 : vector<1x128xf32> to vector<168x128xf32>
    %5 = arith.addf %2, %4 : vector<168x128xf32>
    %cst_5 = arith.constant 0.000000e+00 : f32
    %6 = vector.broadcast %cst_5 : f32 to vector<168x128xf32>
    %7 = arith.maximumf %5, %6 : vector<168x128xf32>
    %8 = arith.truncf %7 : vector<168x128xf32> to vector<168x128xbf16>
    %c0_6 = arith.constant 0 : index
    %c0_7 = arith.constant 0 : index
    %9 = vector.load %arg4[%c0_6, %c0_7] : memref<168x128xbf16, #tpu.memory_space<vmem>>, vector<168x128xbf16>
    tpu.vector_store %arg4[%c0_6, %c0_7], %8 {strides = array<i32>} : memref<168x128xbf16, #tpu.memory_space<vmem>>, vector<168x128xbf16>,
    return
  }
  func.func @transform_0(%arg0: i32) -> (i32, i32) {
    %c0_i32 = arith.constant 0 : i32
    %c0_i32_0 = arith.constant 0 : i32
    return %arg0, %c0_i32 : i32, i32
  }
  func.func @transform_1(%arg0: i32) -> (i32, i32) {
    %c0_i32 = arith.constant 0 : i32
    %c0_i32_0 = arith.constant 0 : i32
    %c0_i32_1 = arith.constant 0 : i32
    return %c0_i32, %c0_i32_0 : i32, i32
  }
  func.func @transform_2(%arg0: i32) -> (i32, i32) {
    %c0_i32 = arith.constant 0 : i32
    %c0_i32_0 = arith.constant 0 : i32
    %c0_i32_1 = arith.constant 0 : i32
    return %c0_i32, %c0_i32_0 : i32, i32
  }
  func.func @transform_3(%arg0: i32) -> (i32, i32) {
    %c0_i32 = arith.constant 0 : i32
    %c0_i32_0 = arith.constant 0 : i32
    return %arg0, %c0_i32 : i32, i32
  }
}

module attributes {stable_mosaic.version = 11 : i64} {
  func.func @_mm_bias_relu_kernel(%arg0: i32, %arg1: memref<104x640xbf16, #tpu.memory_space<vmem>>, %arg2: memref<640x128xbf16, #tpu.memory_space<vmem>>, %arg3: memref<1x128xf32, #tpu.memory_space<vmem>>, %arg4: memref<104x128xbf16, #tpu.memory_space<vmem>>) attributes {dimension_semantics = [#tpu.dimension_semantics<parallel>], iteration_bounds = array<i64: 1>, scalar_prefetch = 0 : i64, scratch_operands = 0 : i64, tpu.core_type = #tpu.core_type<tc>, window_params = [{transform_indices = @transform_0, window_bounds = array<i64: 104, 640>}, {pipeline_mode = #tpu.pipeline_mode<synchronous>, transform_indices = @transform_1, window_bounds = array<i64: 640, 128>}, {pipeline_mode = #tpu.pipeline_mode<synchronous>, transform_indices = @transform_2, window_bounds = array<i64: 1, 128>}, {transform_indices = @transform_3, window_bounds = array<i64: 104, 128>}]} {
    %c0 = arith.constant 0 : index
    %c0_0 = arith.constant 0 : index
    %0 = vector.load %arg1[%c0, %c0_0] : memref<104x640xbf16, #tpu.memory_space<vmem>>, vector<104x640xbf16>
    %c0_1 = arith.constant 0 : index
    %c0_2 = arith.constant 0 : index
    %1 = vector.load %arg2[%c0_1, %c0_2] : memref<640x128xbf16, #tpu.memory_space<vmem>>, vector<640x128xbf16>
    %cst = arith.constant dense<0.000000e+00> : vector<104x128xf32>
    %2 = tpu.matmul %0, %1, %cst {dimension_numbers = #tpu.dot_dimension_numbers<[1], [0], [0], [1], [0, 0, 1, 1], [], []>} : vector<104x640xbf16>, vector<640x128xbf16>, vector<104x128xf32> -> vector<104x128xf32>
    %c0_3 = arith.constant 0 : index
    %c0_4 = arith.constant 0 : index
    %3 = vector.load %arg3[%c0_3, %c0_4] : memref<1x128xf32, #tpu.memory_space<vmem>>, vector<1x128xf32>
    %4 = vector.broadcast %3 : vector<1x128xf32> to vector<104x128xf32>
    %5 = arith.addf %2, %4 : vector<104x128xf32>
    %cst_5 = arith.constant 0.000000e+00 : f32
    %6 = vector.broadcast %cst_5 : f32 to vector<104x128xf32>
    %7 = arith.maximumf %5, %6 : vector<104x128xf32>
    %8 = arith.truncf %7 : vector<104x128xf32> to vector<104x128xbf16>
    %c0_6 = arith.constant 0 : index
    %c0_7 = arith.constant 0 : index
    %9 = vector.load %arg4[%c0_6, %c0_7] : memref<104x128xbf16, #tpu.memory_space<vmem>>, vector<104x128xbf16>
    tpu.vector_store %arg4[%c0_6, %c0_7], %8 {strides = array<i32>} : memref<104x128xbf16, #tpu.memory_space<vmem>>, vector<104x128xbf16>,
    return
  }
  func.func @transform_0(%arg0: i32) -> (i32, i32) {
    %c0_i32 = arith.constant 0 : i32
    %c0_i32_0 = arith.constant 0 : i32
    return %arg0, %c0_i32 : i32, i32
  }
  func.func @transform_1(%arg0: i32) -> (i32, i32) {
    %c0_i32 = arith.constant 0 : i32
    %c0_i32_0 = arith.constant 0 : i32
    %c0_i32_1 = arith.constant 0 : i32
    return %c0_i32, %c0_i32_0 : i32, i32
  }
  func.func @transform_2(%arg0: i32) -> (i32, i32) {
    %c0_i32 = arith.constant 0 : i32
    %c0_i32_0 = arith.constant 0 : i32
    %c0_i32_1 = arith.constant 0 : i32
    return %c0_i32, %c0_i32_0 : i32, i32
  }
  func.func @transform_3(%arg0: i32) -> (i32, i32) {
    %c0_i32 = arith.constant 0 : i32
    %c0_i32_0 = arith.constant 0 : i32
    return %arg0, %c0_i32 : i32, i32
  }
}

module attributes {stable_mosaic.version = 11 : i64} {
  func.func @_fc_head_softmax_kernel(%arg0: i32, %arg1: memref<8x3200xbf16, #tpu.memory_space<vmem>>, %arg2: memref<3200x128xbf16, #tpu.memory_space<vmem>>, %arg3: memref<1x128xf32, #tpu.memory_space<vmem>>, %arg4: memref<128x128xbf16, #tpu.memory_space<vmem>>, %arg5: memref<1x128xf32, #tpu.memory_space<vmem>>, %arg6: memref<8x128xf32, #tpu.memory_space<vmem>>) attributes {dimension_semantics = [#tpu.dimension_semantics<parallel>], iteration_bounds = array<i64: 1>, scalar_prefetch = 0 : i64, scratch_operands = 0 : i64, tpu.core_type = #tpu.core_type<tc>, window_params = [{transform_indices = @transform_0, window_bounds = array<i64: 8, 3200>}, {pipeline_mode = #tpu.pipeline_mode<synchronous>, transform_indices = @transform_1, window_bounds = array<i64: 3200, 128>}, {pipeline_mode = #tpu.pipeline_mode<synchronous>, transform_indices = @transform_2, window_bounds = array<i64: 1, 128>}, {pipeline_mode = #tpu.pipeline_mode<synchronous>, transform_indices = @transform_3, window_bounds = array<i64: 128, 128>}, {pipeline_mode = #tpu.pipeline_mode<synchronous>, transform_indices = @transform_4, window_bounds = array<i64: 1, 128>}, {transform_indices = @transform_5, window_bounds = array<i64: 8, 128>}]} {
    %c0 = arith.constant 0 : index
    %c0_0 = arith.constant 0 : index
    %0 = vector.load %arg1[%c0, %c0_0] : memref<8x3200xbf16, #tpu.memory_space<vmem>>, vector<8x3200xbf16>
    %c0_1 = arith.constant 0 : index
    %c0_2 = arith.constant 0 : index
    %1 = vector.load %arg2[%c0_1, %c0_2] : memref<3200x128xbf16, #tpu.memory_space<vmem>>, vector<3200x128xbf16>
    %cst = arith.constant dense<0.000000e+00> : vector<8x128xf32>
    %2 = tpu.matmul %0, %1, %cst {dimension_numbers = #tpu.dot_dimension_numbers<[1], [0], [0], [1], [0, 0, 1, 1], [], []>} : vector<8x3200xbf16>, vector<3200x128xbf16>, vector<8x128xf32> -> vector<8x128xf32>
    %c0_3 = arith.constant 0 : index
    %c0_4 = arith.constant 0 : index
    %3 = vector.load %arg3[%c0_3, %c0_4] : memref<1x128xf32, #tpu.memory_space<vmem>>, vector<1x128xf32>
    %4 = vector.broadcast %3 : vector<1x128xf32> to vector<8x128xf32>
    %5 = arith.addf %2, %4 : vector<8x128xf32>
    %cst_5 = arith.constant 0.000000e+00 : f32
    %6 = vector.broadcast %cst_5 : f32 to vector<8x128xf32>
    %7 = arith.maximumf %5, %6 : vector<8x128xf32>
    %8 = arith.truncf %7 : vector<8x128xf32> to vector<8x128xbf16>
    %c0_6 = arith.constant 0 : index
    %c0_7 = arith.constant 0 : index
    %9 = vector.load %arg4[%c0_6, %c0_7] : memref<128x128xbf16, #tpu.memory_space<vmem>>, vector<128x128xbf16>
    %cst_8 = arith.constant dense<0.000000e+00> : vector<8x128xf32>
    %10 = tpu.matmul %8, %9, %cst_8 {dimension_numbers = #tpu.dot_dimension_numbers<[1], [0], [0], [1], [0, 0, 1, 1], [], []>} : vector<8x128xbf16>, vector<128x128xbf16>, vector<8x128xf32> -> vector<8x128xf32>
    %c0_9 = arith.constant 0 : index
    %c0_10 = arith.constant 0 : index
    %11 = vector.load %arg5[%c0_9, %c0_10] : memref<1x128xf32, #tpu.memory_space<vmem>>, vector<1x128xf32>
    %12 = vector.broadcast %11 : vector<1x128xf32> to vector<8x128xf32>
    %13 = arith.addf %10, %12 : vector<8x128xf32>
    %14 = tpu.iota {dimensions = array<i32: 1>} : vector<8x128xi32>
    %c6_i32 = arith.constant 6 : i32
    %15 = vector.broadcast %c6_i32 : i32 to vector<8x128xi32>
    %16 = arith.cmpi slt, %14, %15 : vector<8x128xi32>
    %cst_11 = arith.constant -1.000000e+30 : f32
    %17 = vector.broadcast %cst_11 : f32 to vector<8x128xf32>
    %18 = arith.select %16, %13, %17 : vector<8x128xi1>, vector<8x128xf32>
    %cst_12 = arith.constant dense<0xFF800000> : vector<8xf32>
    %19 = vector.multi_reduction <maximumf>, %18, %cst_12 [1] : vector<8x128xf32> to vector<8xf32>
    %20 = vector.shape_cast %19 : vector<8xf32> to vector<8x1xf32>
    %21 = vector.broadcast %20 : vector<8x1xf32> to vector<8x128xf32>
    %22 = arith.subf %18, %21 : vector<8x128xf32>
    %23 = math.exp %22 : vector<8x128xf32>
    %cst_13 = arith.constant dense<0.000000e+00> : vector<8xf32>
    %24 = vector.multi_reduction <add>, %23, %cst_13 [1] : vector<8x128xf32> to vector<8xf32>
    %25 = vector.shape_cast %24 : vector<8xf32> to vector<8x1xf32>
    %26 = vector.broadcast %25 : vector<8x1xf32> to vector<8x128xf32>
    %27 = arith.divf %23, %26 : vector<8x128xf32>
    %28 = arith.select %16, %27, %13 : vector<8x128xi1>, vector<8x128xf32>
    %c0_14 = arith.constant 0 : index
    %c0_15 = arith.constant 0 : index
    %29 = vector.load %arg6[%c0_14, %c0_15] : memref<8x128xf32, #tpu.memory_space<vmem>>, vector<8x128xf32>
    tpu.vector_store %arg6[%c0_14, %c0_15], %28 {strides = array<i32>} : memref<8x128xf32, #tpu.memory_space<vmem>>, vector<8x128xf32>,
    return
  }
  func.func @transform_0(%arg0: i32) -> (i32, i32) {
    %c0_i32 = arith.constant 0 : i32
    %c0_i32_0 = arith.constant 0 : i32
    return %arg0, %c0_i32 : i32, i32
  }
  func.func @transform_1(%arg0: i32) -> (i32, i32) {
    %c0_i32 = arith.constant 0 : i32
    %c0_i32_0 = arith.constant 0 : i32
    %c0_i32_1 = arith.constant 0 : i32
    return %c0_i32, %c0_i32_0 : i32, i32
  }
  func.func @transform_2(%arg0: i32) -> (i32, i32) {
    %c0_i32 = arith.constant 0 : i32
    %c0_i32_0 = arith.constant 0 : i32
    %c0_i32_1 = arith.constant 0 : i32
    return %c0_i32, %c0_i32_0 : i32, i32
  }
  func.func @transform_3(%arg0: i32) -> (i32, i32) {
    %c0_i32 = arith.constant 0 : i32
    %c0_i32_0 = arith.constant 0 : i32
    %c0_i32_1 = arith.constant 0 : i32
    return %c0_i32, %c0_i32_0 : i32, i32
  }
  func.func @transform_4(%arg0: i32) -> (i32, i32) {
    %c0_i32 = arith.constant 0 : i32
    %c0_i32_0 = arith.constant 0 : i32
    %c0_i32_1 = arith.constant 0 : i32
    return %c0_i32, %c0_i32_0 : i32, i32
  }
  func.func @transform_5(%arg0: i32) -> (i32, i32) {
    %c0_i32 = arith.constant 0 : i32
    %c0_i32_0 = arith.constant 0 : i32
    return %arg0, %c0_i32 : i32, i32
  }
}

</mosaic_0001>

<bundles_post_ra>
// kernel: nature_cnn_forward.4
= control target key start
LH: loop header
LB: loop body
LE: loop exit
PB: predicated region body
PF: predicated region fallthrough
CT: control target
= control target key end

     0   :  { %s2021_s12 = smov 0   ;;  %s2291_s0 = inlined_call_operand.vmem [shape: bf16[1024,256], index: 0, kind: input, shape index: {}]   ;;  %s2292_s1 = inlined_call_operand.vmem [shape: bf16[256,128], index: 1, kind: input, shape index: {}]   ;;  %s2293_s2 = inlined_call_operand.vmem [shape: f32[1,128], index: 2, kind: input, shape index: {}]   ;;  %s2294_s3 = inlined_call_operand.vmem [shape: bf16[1024,128], index: 3, kind: output, shape index: {}]  }
   0x1 LB: > { %s1426_s13 = sadd.s32 4294967295, %s1998_s12   ;;  %p1430_p0 = scmp.ge.s32.totalorder %s1998_s12, 1  ;;  %s1998_s12 = sphi %s2021_s12, %s13_s12  }
   0x2   : > { %p139_p1 = scmp.lt.s32.totalorder %s1998_s12, 3 }
   0x4   : > { %p140_p2 = pnand %p1430_p0, %p139_p1 }
   0x5   : > { %s1431_s16 = sshll.u32 (!%p140_p2), %s1426_s13, 6 }
   0x6   : > { %143 = sbr.rel (%p140_p2) target bundleno = 400 (0x190), region = 32  ;;  %p165_p3 = scmp.lt.s32.totalorder (!%p140_p2), %s1431_s16, 127 }
   0xb   : > { %v1880_v0 = vld [vmem:[%s2292_s1 + $0x38] sm:$0xff]   ;;  %v2000_v1 = vmov 0   ;;  %v1881_v2 = vld [vmem:[%s2292_s1 + $0x30] sm:$0xff]   ;;  %v1882_v3 = vld [vmem:[%s2292_s1 + $0x28] sm:$0xff]   ;;  %s2296_s16 = smov (!%p165_p3, %s1431_s16), 127 }
   0xc   : > { %697 = vmatprep.subr.bf16.mxu0 %v2000_v1  ;;  %1839 = vmatprep.subr.bf16.mxu1 %v2000_v1  ;;  %v1883_v4 = vld [vmem:[%s2292_s1 + $0x20] sm:$0xff]   ;;  %s1583_s23 = sshll.u32 %s2296_s16, 3  ;;  %v1884_v5 = vld [vmem:[%s2292_s1 + $0x18] sm:$0xff]   ;;  %v1885_v7 = vld [vmem:[%s2292_s1 + $0x10] sm:$0xff]   ;;  %s1435_s29 = sshll.u32 %s2296_s16, 2 }
   0xd   : > { %698 = vmatpush1.bf16.msra.mxu0 %v1880_v0  ;;  %1855 = vmatpush1.bf16.msra.mxu1 %v1880_v0  ;;  %s2058_s28 = scalar_lea.vmem %s2291_s0, %s1583_s23  ;;  %v1886_v9 = vld [vmem:[%s2292_s1 + $0x8] sm:$0xff]   ;;  %v1887_v10 = vld [vmem:[%s2292_s1] sm:$0xff]   ;;  %v1888_v11 = vld [vmem:[%s2292_s1 + $0x78] sm:$0xff]   ;;  %s2194_s4 = scalar_lea.vmem %s2294_s3, %s1435_s29 }
   0xe   : > { %699 = vmatprep.subr.bf16.mxu0 %v2000_v1  ;;  %1840 = vmatprep.subr.bf16.mxu1 %v2000_v1  ;;  %v1898_v6 = vld [vmem:[%s2058_s28 + $0x4] ss:$8 sps:$4 sm:$0xff]   ;;  %v1889_v12 = vld [vmem:[%s2292_s1 + $0x70] sm:$0xff]   ;;  %v1892_v15 = vld [vmem:[%s2292_s1 + $0x58] sm:$0xff]  }
   0xf   : > { %v1901_v8 = vld [vmem:[%s2058_s28 + $0x104] ss:$8 sps:$4 sm:$0xff]   ;;  %729 = vmatprep.mubr.bf16.mxu0 %v1898_v6  ;;  %v1893_v16 = vld [vmem:[%s2292_s1 + $0x50] sm:$0xff]   ;;  %v1896_v19 = vld [vmem:[%s2058_s28] ss:$8 sps:$4 sm:$0xff]  }
  0x10   : > { %857 = vmatprep.mubr.bf16.mxu1 %v1901_v8  ;;  %v1890_v13 = vld [vmem:[%s2292_s1 + $0x68] sm:$0xff]   ;;  %v1891_v14 = vld [vmem:[%s2292_s1 + $0x60] sm:$0xff]   ;;  %v1902_v21 = vld [vmem:[%s2058_s28 + $0x14] ss:$8 sps:$4 sm:$0xff]  }
  0x11   : > { %700 = vmatpush1.bf16.msra.mxu0 %v1881_v2  ;;  %1856 = vmatpush1.bf16.msra.mxu1 %v1881_v2  ;;  %v1894_v17 = vld [vmem:[%s2292_s1 + $0x48] sm:$0xff]   ;;  %v1895_v18 = vld [vmem:[%s2292_s1 + $0x40] sm:$0xff]   ;;  %v1904_v22 = vld [vmem:[%s2058_s28 + $0x114] ss:$8 sps:$4 sm:$0xff]  }
  0x12   : > { %701 = vmatprep.subr.bf16.mxu0 %v2000_v1  ;;  %1841 = vmatprep.subr.bf16.mxu1 %v2000_v1  ;;  %v1899_v20 = vld [vmem:[%s2058_s28 + $0x100] ss:$8 sps:$4 sm:$0xff]   ;;  %v1906_v23 = vld [vmem:[%s2058_s28 + $0x10] ss:$8 sps:$4 sm:$0xff]   ;;  %v1908_v25 = vld [vmem:[%s2058_s28 + $0x24] ss:$8 sps:$4 sm:$0xff]  }
  0x13   : > { %v1907_v24 = vld [vmem:[%s2058_s28 + $0x110] ss:$8 sps:$4 sm:$0xff]   ;;  %v1910_v26 = vld [vmem:[%s2058_s28 + $0x124] ss:$8 sps:$4 sm:$0xff]   ;;  %v1912_v27 = vld [vmem:[%s2058_s28 + $0x20] ss:$8 sps:$4 sm:$0xff]  }
  0x14   : > { %v1913_v28 = vld [vmem:[%s2058_s28 + $0x120] ss:$8 sps:$4 sm:$0xff]   ;;  %v1914_v29 = vld [vmem:[%s2058_s28 + $0x34] ss:$8 sps:$4 sm:$0xff]   ;;  %v1918_v31 = vld [vmem:[%s2058_s28 + $0x30] ss:$8 sps:$4 sm:$0xff]  }
  0x15   : > { %702 = vmatpush1.bf16.msra.mxu0 %v1882_v3  ;;  %1857 = vmatpush1.bf16.msra.mxu1 %v1882_v3  ;;  %v1916_v30 = vld [vmem:[%s2058_s28 + $0x134] ss:$8 sps:$4 sm:$0xff]   ;;  %v1919_v32 = vld [vmem:[%s2058_s28 + $0x130] ss:$8 sps:$4 sm:$0xff]   ;;  %v1920_v33 = vld [vmem:[%s2058_s28 + $0x44] ss:$8 sps:$4 sm:$0xff]  }
  0x16   : > { %703 = vmatprep.subr.bf16.mxu0 %v2000_v1  ;;  %1842 = vmatprep.subr.bf16.mxu1 %v2000_v1  ;;  %v1922_v34 = vld [vmem:[%s2058_s28 + $0x144] ss:$8 sps:$4 sm:$0xff]   ;;  %v1924_v35 = vld [vmem:[%s2058_s28 + $0x40] ss:$8 sps:$4 sm:$0xff]   ;;  %v1926_v37 = vld [vmem:[%s2058_s28 + $0x54] ss:$8 sps:$4 sm:$0xff]  }
  0x17   : > { %v1925_v36 = vld [vmem:[%s2058_s28 + $0x140] ss:$8 sps:$4 sm:$0xff]   ;;  %v1928_v38 = vld [vmem:[%s2058_s28 + $0x154] ss:$8 sps:$4 sm:$0xff]   ;;  %v1930_v39 = vld [vmem:[%s2058_s28 + $0x50] ss:$8 sps:$4 sm:$0xff]  }
  0x18   : > { %v1931_v40 = vld [vmem:[%s2058_s28 + $0x150] ss:$8 sps:$4 sm:$0xff]   ;;  %v1932_v41 = vld [vmem:[%s2058_s28 + $0x64] ss:$8 sps:$4 sm:$0xff]   ;;  %v1936_v43 = vld [vmem:[%s2058_s28 + $0x60] ss:$8 sps:$4 sm:$0xff]  }
  0x19   : > { %704 = vmatpush1.bf16.msra.mxu0 %v1883_v4  ;;  %1858 = vmatpush1.bf16.msra.mxu1 %v1883_v4  ;;  %v1934_v42 = vld [vmem:[%s2058_s28 + $0x164] ss:$8 sps:$4 sm:$0xff]   ;;  %v1937_v44 = vld [vmem:[%s2058_s28 + $0x160] ss:$8 sps:$4 sm:$0xff]   ;;  %v1938_v45 = vld [vmem:[%s2058_s28 + $0x74] ss:$8 sps:$4 sm:$0xff]  }
  0x1a   : > { %705 = vmatprep.subr.bf16.mxu0 %v2000_v1  ;;  %1843 = vmatprep.subr.bf16.mxu1 %v2000_v1  ;;  %v1940_v46 = vld [vmem:[%s2058_s28 + $0x174] ss:$8 sps:$4 sm:$0xff]   ;;  %v1942_v47 = vld [vmem:[%s2058_s28 + $0x70] ss:$8 sps:$4 sm:$0xff]   ;;  %v1944_v49 = vld [vmem:[%s2058_s28 + $0x84] ss:$8 sps:$4 sm:$0xff]  }
  0x1b   : > { %v1943_v48 = vld [vmem:[%s2058_s28 + $0x170] ss:$8 sps:$4 sm:$0xff]   ;;  %v1946_v50 = vld [vmem:[%s2058_s28 + $0x184] ss:$8 sps:$4 sm:$0xff]   ;;  %v1948_v51 = vld [vmem:[%s2058_s28 + $0x80] ss:$8 sps:$4 sm:$0xff]  }
  0x1c   : > { %v1949_v52 = vld [vmem:[%s2058_s28 + $0x180] ss:$8 sps:$4 sm:$0xff]   ;;  %v1950_v53 = vld [vmem:[%s2058_s28 + $0x94] ss:$8 sps:$4 sm:$0xff]   ;;  %v1954_v55 = vld [vmem:[%s2058_s28 + $0x90] ss:$8 sps:$4 sm:$0xff]  }
  0x1d   : > { %706 = vmatpush1.bf16.msra.mxu0 %v1884_v5  ;;  %1859 = vmatpush1.bf16.msra.mxu1 %v1884_v5  ;;  %v1952_v54 = vld [vmem:[%s2058_s28 + $0x194] ss:$8 sps:$4 sm:$0xff]   ;;  %v1955_v56 = vld [vmem:[%s2058_s28 + $0x190] ss:$8 sps:$4 sm:$0xff]   ;;  %v1956_v57 = vld [vmem:[%s2058_s28 + $0xa4] ss:$8 sps:$4 sm:$0xff]  }
  0x1e   : > { %707 = vmatprep.subr.bf16.mxu0 %v2000_v1  ;;  %1844 = vmatprep.subr.bf16.mxu1 %v2000_v1  ;;  %v1958_v58 = vld [vmem:[%s2058_s28 + $0x1a4] ss:$8 sps:$4 sm:$0xff]   ;;  %v1960_v59 = vld [vmem:[%s2058_s28 + $0xa0] ss:$8 sps:$4 sm:$0xff]   ;;  %v1962_v61 = vld [vmem:[%s2058_s28 + $0xb4] ss:$8 sps:$4 sm:$0xff]  }
  0x1f   : > { %v1961_v60 = vld [vmem:[%s2058_s28 + $0x1a0] ss:$8 sps:$4 sm:$0xff]   ;;  %v1964_v62 = vld [vmem:[%s2058_s28 + $0x1b4] ss:$8 sps:$4 sm:$0xff]   ;;  %v1966_v63 = vld [vmem:[%s2058_s28 + $0xb0] ss:$8 sps:$4 sm:$0xff]  }
  0x20   : > { %v1967_v0 = vld [vmem:[%s2058_s28 + $0x1b0] ss:$8 sps:$4 sm:$0xff]   ;;  %v1970_v2 = vld [vmem:[%s2058_s28 + $0x1c4] ss:$8 sps:$4 sm:$0xff]   ;;  %v1972_v3 = vld [vmem:[%s2058_s28 + $0xc0] ss:$8 sps:$4 sm:$0xff]  }
  0x21   : > { %708 = vmatpush1.bf16.msra.mxu0 %v1885_v7  ;;  %1860 = vmatpush1.bf16.msra.mxu1 %v1885_v7  ;;  %v1973_v4 = vld [vmem:[%s2058_s28 + $0x1c0] ss:$8 sps:$4 sm:$0xff]   ;;  %v1974_v5 = vld [vmem:[%s2058_s28 + $0xd4] ss:$8 sps:$4 sm:$0xff]   ;;  %v1978_v7 = vld [vmem:[%s2058_s28 + $0xd0] ss:$8 sps:$4 sm:$0xff]  }
  0x22   : > { %709 = vmatprep.subr.bf16.mxu0 %v2000_v1  ;;  %1845 = vmatprep.subr.bf16.mxu1 %v2000_v1  ;;  %v1976_v6 = vld [vmem:[%s2058_s28 + $0x1d4] ss:$8 sps:$4 sm:$0xff]   ;;  %v1979_v8 = vld [vmem:[%s2058_s28 + $0x1d0] ss:$8 sps:$4 sm:$0xff]  }
  0x25   : > { %710 = vmatpush1.bf16.msra.mxu0 %v1886_v9  ;;  %1861 = vmatpush1.bf16.msra.mxu1 %v1886_v9  ;;  %v1980_v9 = vld [vmem:[%s2058_s28 + $0xe4] ss:$8 sps:$4 sm:$0xff]  }
  0x26   : > { %711 = vmatprep.subr.bf16.mxu0 %v2000_v1  ;;  %1846 = vmatprep.subr.bf16.mxu1 %v2000_v1 }
  0x29   : > { %712 = vmatpush1.bf16.msra.mxu0 %v1887_v10  ;;  %1862 = vmatpush1.bf16.msra.mxu1 %v1887_v10  ;;  %v1982_v10 = vld [vmem:[%s2058_s28 + $0x1e4] ss:$8 sps:$4 sm:$0xff]  }
  0x2a   : > { %713 = vmatprep.subr.bf16.mxu0 %v2000_v1  ;;  %1847 = vmatprep.subr.bf16.mxu1 %v2000_v1 }
  0x2d   : > { %714 = vmatpush2.bf16.msra.mxu0 %v1888_v11  ;;  %1863 = vmatpush2.bf16.msra.mxu1 %v1888_v11  ;;  %v1984_v11 = vld [vmem:[%s2058_s28 + $0xe0] ss:$8 sps:$4 sm:$0xff]  }
  0x2e   : > { %715 = vmatprep.subr.bf16.mxu0 %v2000_v1  ;;  %1848 = vmatprep.subr.bf16.mxu1 %v2000_v1 }
  0x31   : > { %716 = vmatpush2.bf16.msra.mxu0 %v1889_v12  ;;  %1864 = vmatpush2.bf16.msra.mxu1 %v1889_v12  ;;  %v1985_v12 = vld [vmem:[%s2058_s28 + $0x1e0] ss:$8 sps:$4 sm:$0xff]  }
  0x32   : > { %717 = vmatprep.subr.bf16.mxu0 %v2000_v1  ;;  %1849 = vmatprep.subr.bf16.mxu1 %v2000_v1 }
  0x35   : > { %718 = vmatpush2.bf16.msra.mxu0 %v1890_v13  ;;  %1865 = vmatpush2.bf16.msra.mxu1 %v1890_v13  ;;  %v1986_v13 = vld [vmem:[%s2058_s28 + $0xf4] ss:$8 sps:$4 sm:$0xff]  }
  0x36   : > { %719 = vmatprep.subr.bf16.mxu0 %v2000_v1  ;;  %1850 = vmatprep.subr.bf16.mxu1 %v2000_v1 }
  0x39   : > { %720 = vmatpush2.bf16.msra.mxu0 %v1891_v14  ;;  %1866 = vmatpush2.bf16.msra.mxu1 %v1891_v14  ;;  %v1988_v14 = vld [vmem:[%s2058_s28 + $0x1f4] ss:$8 sps:$4 sm:$0xff]  }
  0x3a   : > { %721 = vmatprep.subr.bf16.mxu0 %v2000_v1  ;;  %1851 = vmatprep.subr.bf16.mxu1 %v2000_v1 }
  0x3d   : > { %722 = vmatpush2.bf16.msra.mxu0 %v1892_v15  ;;  %1867 = vmatpush2.bf16.msra.mxu1 %v1892_v15  ;;  %v1990_v15 = vld [vmem:[%s2058_s28 + $0xf0] ss:$8 sps:$4 sm:$0xff]  }
  0x3e   : > { %723 = vmatprep.subr.bf16.mxu0 %v2000_v1  ;;  %1852 = vmatprep.subr.bf16.mxu1 %v2000_v1 }
  0x41   : > { %724 = vmatpush2.bf16.msra.mxu0 %v1893_v16  ;;  %1868 = vmatpush2.bf16.msra.mxu1 %v1893_v16  ;;  %v1991_v16 = vld [vmem:[%s2058_s28 + $0x1f0] ss:$8 sps:$4 sm:$0xff]  }
  0x42   : > { %725 = vmatprep.subr.bf16.mxu0 %v2000_v1  ;;  %1853 = vmatprep.subr.bf16.mxu1 %v2000_v1 }
  0x45   : > { %726 = vmatpush2.bf16.msra.mxu0 %v1894_v17  ;;  %1869 = vmatpush2.bf16.msra.mxu1 %v1894_v17  ;;  %v2184_v17 = vld [vmem:[%s2293_s2] ss:$0 sm:$0xff] }
  0x46   : > { %727 = vmatprep.subr.bf16.mxu0 %v2000_v1  ;;  %1854 = vmatprep.subr.bf16.mxu1 %v2000_v1  ;;  %v1968_v1 = vld [vmem:[%s2058_s28 + $0xc4] ss:$8 sps:$4 sm:$0xff]  }
  0x49   : > { %728 = vmatpush2.bf16.msra.mxu0 %v1895_v18  ;;  %1870 = vmatpush2.bf16.msra.mxu1 %v1895_v18 }
  0x4c   : > { %730 = vmatmul.mubr.bf16.vlgmr.msra.gmra.mxu0 %v1896_v19  ;;  %858 = vmatmul.mubr.bf16.vlgmr.msra.gmra.mxu1 %v1899_v20 }
  0x4d   : > { %737 = vmatprep.mubr.bf16.mxu0 %v1902_v21  ;;  %865 = vmatprep.mubr.bf16.mxu1 %v1904_v22 }
  0x54   : > { %738 = vmatmul.mubr.bf16.gmra.mxu0 %v1906_v23  ;;  %866 = vmatmul.mubr.bf16.gmra.mxu1 %v1907_v24 }
  0x55   : > { %745 = vmatprep.mubr.bf16.mxu0 %v1908_v25  ;;  %873 = vmatprep.mubr.bf16.mxu1 %v1910_v26 }
  0x5c   : > { %746 = vmatmul.mubr.bf16.gmra.mxu0 %v1912_v27  ;;  %874 = vmatmul.mubr.bf16.gmra.mxu1 %v1913_v28 }
  0x5d   : > { %753 = vmatprep.mubr.bf16.mxu0 %v1914_v29  ;;  %881 = vmatprep.mubr.bf16.mxu1 %v1916_v30 }
  0x64   : > { %754 = vmatmul.mubr.bf16.gmra.mxu0 %v1918_v31  ;;  %882 = vmatmul.mubr.bf16.gmra.mxu1 %v1919_v32 }
  0x65   : > { %761 = vmatprep.mubr.bf16.mxu0 %v1920_v33  ;;  %889 = vmatprep.mubr.bf16.mxu1 %v1922_v34 }
  0x6c   : > { %762 = vmatmul.mubr.bf16.gmra.mxu0 %v1924_v35  ;;  %890 = vmatmul.mubr.bf16.gmra.mxu1 %v1925_v36 }
  0x6d   : > { %769 = vmatprep.mubr.bf16.mxu0 %v1926_v37  ;;  %897 = vmatprep.mubr.bf16.mxu1 %v1928_v38 }
  0x74   : > { %770 = vmatmul.mubr.bf16.gmra.mxu0 %v1930_v39  ;;  %898 = vmatmul.mubr.bf16.gmra.mxu1 %v1931_v40 }
  0x75   : > { %777 = vmatprep.mubr.bf16.mxu0 %v1932_v41  ;;  %905 = vmatprep.mubr.bf16.mxu1 %v1934_v42 }
  0x7c   : > { %778 = vmatmul.mubr.bf16.gmra.mxu0 %v1936_v43  ;;  %906 = vmatmul.mubr.bf16.gmra.mxu1 %v1937_v44 }
  0x7d   : > { %785 = vmatprep.mubr.bf16.mxu0 %v1938_v45  ;;  %913 = vmatprep.mubr.bf16.mxu1 %v1940_v46 }
  0x84   : > { %786 = vmatmul.mubr.bf16.gmra.mxu0 %v1942_v47  ;;  %914 = vmatmul.mubr.bf16.gmra.mxu1 %v1943_v48 }
  0x85   : > { %793 = vmatprep.mubr.bf16.mxu0 %v1944_v49  ;;  %921 = vmatprep.mubr.bf16.mxu1 %v1946_v50 }
  0x8c   : > { %794 = vmatmul.mubr.bf16.gmra.mxu0 %v1948_v51  ;;  %922 = vmatmul.mubr.bf16.gmra.mxu1 %v1949_v52 }
  0x8d   : > { %801 = vmatprep.mubr.bf16.mxu0 %v1950_v53  ;;  %929 = vmatprep.mubr.bf16.mxu1 %v1952_v54 }
  0x94   : > { %802 = vmatmul.mubr.bf16.gmra.mxu0 %v1954_v55  ;;  %930 = vmatmul.mubr.bf16.gmra.mxu1 %v1955_v56 }
  0x95   : > { %809 = vmatprep.mubr.bf16.mxu0 %v1956_v57  ;;  %937 = vmatprep.mubr.bf16.mxu1 %v1958_v58 }
  0x9c   : > { %810 = vmatmul.mubr.bf16.gmra.mxu0 %v1960_v59  ;;  %938 = vmatmul.mubr.bf16.gmra.mxu1 %v1961_v60 }
  0x9d   : > { %817 = vmatprep.mubr.bf16.mxu0 %v1962_v61  ;;  %945 = vmatprep.mubr.bf16.mxu1 %v1964_v62 }
  0xa4   : > { %818 = vmatmul.mubr.bf16.gmra.mxu0 %v1966_v63  ;;  %946 = vmatmul.mubr.bf16.gmra.mxu1 %v1967_v0 }
  0xa5   : > { %825 = vmatprep.mubr.bf16.mxu0 %v1968_v1  ;;  %953 = vmatprep.mubr.bf16.mxu1 %v1970_v2 }
  0xac   : > { %826 = vmatmul.mubr.bf16.gmra.mxu0 %v1972_v3  ;;  %954 = vmatmul.mubr.bf16.gmra.mxu1 %v1973_v4 }
  0xad   : > { %833 = vmatprep.mubr.bf16.mxu0 %v1974_v5  ;;  %961 = vmatprep.mubr.bf16.mxu1 %v1976_v6 }
  0xb4   : > { %834 = vmatmul.mubr.bf16.gmra.mxu0 %v1978_v7  ;;  %962 = vmatmul.mubr.bf16.gmra.mxu1 %v1979_v8 }
  0xb5   : > { %841 = vmatprep.mubr.bf16.mxu0 %v1980_v9  ;;  %969 = vmatprep.mubr.bf16.mxu1 %v1982_v10 }
  0xbc   : > { %842 = vmatmul.mubr.bf16.gmra.mxu0 %v1984_v11  ;;  %970 = vmatmul.mubr.bf16.gmra.mxu1 %v1985_v12 }
  0xbd   : > { %849 = vmatprep.mubr.bf16.mxu0 %v1986_v13  ;;  %977 = vmatprep.mubr.bf16.mxu1 %v1988_v14 }
  0xc4   : > { %850 = vmatmul.mubr.bf16.gmra.mxu0 %v1990_v15  ;;  %978 = vmatmul.mubr.bf16.gmra.mxu1 %v1991_v16 }
 0x10c   : > { %v731_v18 = vpop.f32.mrf.mxu0  ;;  %v859_v19 = vpop.f32.mrf.mxu1 }
 0x10d   : > { %v732_v22 = vadd.f32 %v2184_v17, %v731_v18  ;;  %v860_v23 = vadd.f32 %v2184_v17, %v859_v19 }
 0x10e   : > { %v733_v20 = vpop.f32.mrf.mxu0  ;;  %v861_v21 = vpop.f32.mrf.mxu1 }
 0x10f   : > { %v986_v30 = vmax.f32 %v732_v22, 0.0  ;;  %v1018_v31 = vmax.f32 %v860_v23, 0.0 }
 0x110   : > { %v734_v24 = vpop.f32.mrf.mxu0  ;;  %v862_v25 = vpop.f32.mrf.mxu1 }
 0x111   : > { %v735_v26 = vadd.f32 %v2184_v17, %v734_v24  ;;  %v863_v27 = vadd.f32 %v2184_v17, %v862_v25 }
 0x112   : > { %v736_v28 = vpop.f32.mrf.mxu0  ;;  %v864_v29 = vpop.f32.mrf.mxu1 }
 0x113   : > { %v987_v32 = vmax.f32 %v735_v26, 0.0  ;;  %v1019_v33 = vmax.f32 %v863_v27, 0.0 }
 0x114   : > { %v739_v34 = vpop.f32.mrf.mxu0  ;;  %v867_v35 = vpop.f32.mrf.mxu1 }
 0x115   : > { %v1651_v36 = vpack.c.bf16 %v987_v32, %v986_v30  ;;  %v1731_v37 = vpack.c.bf16 %v1019_v33, %v1018_v31  ;;  %v740_v40 = vadd.f32 %v2184_v17, %v739_v34  ;;  %v868_v41 = vadd.f32 %v2184_v17, %v867_v35 }
 0x116   : > { %v741_v38 = vpop.f32.mrf.mxu0  ;;  %v869_v39 = vpop.f32.mrf.mxu1 }
 0x117   : > { %1652 = vst [vmem:[%s2194_s4] sm:$0xff] %v1651_v36   ;;  %1823 = vst [vmem:[%s2194_s4 + $0x80] sm:$0xff] %v1731_v37   ;;  %v988_v48 = vmax.f32 %v740_v40, 0.0  ;;  %v1020_v49 = vmax.f32 %v868_v41, 0.0 }
 0x118   : > { %v742_v42 = vpop.f32.mrf.mxu0  ;;  %v870_v43 = vpop.f32.mrf.mxu1 }
 0x119   : > { %v743_v44 = vadd.f32 %v2184_v17, %v742_v42  ;;  %v871_v45 = vadd.f32 %v2184_v17, %v870_v43 }
 0x11a   : > { %v744_v46 = vpop.f32.mrf.mxu0  ;;  %v872_v47 = vpop.f32.mrf.mxu1 }
 0x11b   : > { %v989_v50 = vmax.f32 %v743_v44, 0.0  ;;  %v1021_v51 = vmax.f32 %v871_v45, 0.0 }
 0x11c   : > { %v747_v52 = vpop.f32.mrf.mxu0  ;;  %v875_v53 = vpop.f32.mrf.mxu1 }
 0x11d   : > { %v1656_v54 = vpack.c.bf16 %v989_v50, %v988_v48  ;;  %v1736_v55 = vpack.c.bf16 %v1021_v51, %v1020_v49  ;;  %v748_v58 = vadd.f32 %v2184_v17, %v747_v52  ;;  %v876_v59 = vadd.f32 %v2184_v17, %v875_v53 }
 0x11e   : > { %v749_v56 = vpop.f32.mrf.mxu0  ;;  %v877_v57 = vpop.f32.mrf.mxu1 }
 0x11f   : > { %1808 = vst [vmem:[%s2194_s4 + $0x8] sm:$0xff] %v1656_v54   ;;  %1824 = vst [vmem:[%s2194_s4 + $0x88] sm:$0xff] %v1736_v55   ;;  %v990_v2 = vmax.f32 %v748_v58, 0.0  ;;  %v1022_v3 = vmax.f32 %v876_v59, 0.0 }
 0x120   : > { %v750_v60 = vpop.f32.mrf.mxu0  ;;  %v878_v61 = vpop.f32.mrf.mxu1 }
 0x121   : > { %v751_v62 = vadd.f32 %v2184_v17, %v750_v60  ;;  %v879_v63 = vadd.f32 %v2184_v17, %v878_v61 }
 0x122   : > { %v752_v0 = vpop.f32.mrf.mxu0  ;;  %v880_v1 = vpop.f32.mrf.mxu1 }
 0x123   : > { %v991_v4 = vmax.f32 %v751_v62, 0.0  ;;  %v1023_v5 = vmax.f32 %v879_v63, 0.0 }
 0x124   : > { %v755_v6 = vpop.f32.mrf.mxu0  ;;  %v883_v7 = vpop.f32.mrf.mxu1 }
 0x125   : > { %v1661_v8 = vpack.c.bf16 %v991_v4, %v990_v2  ;;  %v1741_v9 = vpack.c.bf16 %v1023_v5, %v1022_v3  ;;  %v756_v12 = vadd.f32 %v2184_v17, %v755_v6  ;;  %v884_v13 = vadd.f32 %v2184_v17, %v883_v7 }
 0x126   : > { %v757_v10 = vpop.f32.mrf.mxu0  ;;  %v885_v11 = vpop.f32.mrf.mxu1 }
 0x127   : > { %1809 = vst [vmem:[%s2194_s4 + $0x10] sm:$0xff] %v1661_v8   ;;  %1825 = vst [vmem:[%s2194_s4 + $0x90] sm:$0xff] %v1741_v9   ;;  %v992_v21 = vmax.f32 %v756_v12, 0.0  ;;  %v1024_v22 = vmax.f32 %v884_v13, 0.0 }
 0x128   : > { %v758_v14 = vpop.f32.mrf.mxu0  ;;  %v886_v15 = vpop.f32.mrf.mxu1 }
 0x129   : > { %v759_v16 = vadd.f32 %v2184_v17, %v758_v14  ;;  %v887_v18 = vadd.f32 %v2184_v17, %v886_v15 }
 0x12a   : > { %v760_v19 = vpop.f32.mrf.mxu0  ;;  %v888_v20 = vpop.f32.mrf.mxu1 }
 0x12b   : > { %v993_v23 = vmax.f32 %v759_v16, 0.0  ;;  %v1025_v24 = vmax.f32 %v887_v18, 0.0 }
 0x12c   : > { %v763_v25 = vpop.f32.mrf.mxu0  ;;  %v891_v26 = vpop.f32.mrf.mxu1 }
 0x12d   : > { %v1666_v27 = vpack.c.bf16 %v993_v23, %v992_v21  ;;  %v1746_v28 = vpack.c.bf16 %v1025_v24, %v1024_v22  ;;  %v764_v31 = vadd.f32 %v2184_v17, %v763_v25  ;;  %v892_v32 = vadd.f32 %v2184_v17, %v891_v26 }
 0x12e   : > { %v765_v29 = vpop.f32.mrf.mxu0  ;;  %v893_v30 = vpop.f32.mrf.mxu1 }
 0x12f   : > { %1810 = vst [vmem:[%s2194_s4 + $0x18] sm:$0xff] %v1666_v27   ;;  %1826 = vst [vmem:[%s2194_s4 + $0x98] sm:$0xff] %v1746_v28   ;;  %v994_v39 = vmax.f32 %v764_v31, 0.0  ;;  %v1026_v40 = vmax.f32 %v892_v32, 0.0 }
 0x130   : > { %v766_v33 = vpop.f32.mrf.mxu0  ;;  %v894_v34 = vpop.f32.mrf.mxu1 }
 0x131   : > { %v767_v35 = vadd.f32 %v2184_v17, %v766_v33  ;;  %v895_v36 = vadd.f32 %v2184_v17, %v894_v34 }
 0x132   : > { %v768_v37 = vpop.f32.mrf.mxu0  ;;  %v896_v38 = vpop.f32.mrf.mxu1 }
 0x133   : > { %v995_v41 = vmax.f32 %v767_v35, 0.0  ;;  %v1027_v42 = vmax.f32 %v895_v36, 0.0 }
 0x134   : > { %v771_v43 = vpop.f32.mrf.mxu0  ;;  %v899_v44 = vpop.f32.mrf.mxu1 }
 0x135   : > { %v1671_v45 = vpack.c.bf16 %v995_v41, %v994_v39  ;;  %v1751_v46 = vpack.c.bf16 %v1027_v42, %v1026_v40  ;;  %v772_v49 = vadd.f32 %v2184_v17, %v771_v43  ;;  %v900_v50 = vadd.f32 %v2184_v17, %v899_v44 }
 0x136   : > { %v773_v47 = vpop.f32.mrf.mxu0  ;;  %v901_v48 = vpop.f32.mrf.mxu1 }
 0x137   : > { %1811 = vst [vmem:[%s2194_s4 + $0x20] sm:$0xff] %v1671_v45   ;;  %1827 = vst [vmem:[%s2194_s4 + $0xa0] sm:$0xff] %v1751_v46   ;;  %v996_v57 = vmax.f32 %v772_v49, 0.0  ;;  %v1028_v58 = vmax.f32 %v900_v50, 0.0 }
 0x138   : > { %v774_v51 = vpop.f32.mrf.mxu0  ;;  %v902_v52 = vpop.f32.mrf.mxu1 }
 0x139   : > { %v775_v53 = vadd.f32 %v2184_v17, %v774_v51  ;;  %v903_v54 = vadd.f32 %v2184_v17, %v902_v52 }
 0x13a   : > { %v776_v55 = vpop.f32.mrf.mxu0  ;;  %v904_v56 = vpop.f32.mrf.mxu1 }
 0x13b   : > { %v997_v59 = vmax.f32 %v775_v53, 0.0  ;;  %v1029_v60 = vmax.f32 %v903_v54, 0.0 }
 0x13c   : > { %v779_v61 = vpop.f32.mrf.mxu0  ;;  %v907_v62 = vpop.f32.mrf.mxu1 }
 0x13d   : > { %v1676_v63 = vpack.c.bf16 %v997_v59, %v996_v57  ;;  %v1756_v0 = vpack.c.bf16 %v1029_v60, %v1028_v58  ;;  %v780_v3 = vadd.f32 %v2184_v17, %v779_v61  ;;  %v908_v4 = vadd.f32 %v2184_v17, %v907_v62 }
 0x13e   : > { %v781_v1 = vpop.f32.mrf.mxu0  ;;  %v909_v2 = vpop.f32.mrf.mxu1 }
 0x13f   : > { %1812 = vst [vmem:[%s2194_s4 + $0x28] sm:$0xff] %v1676_v63   ;;  %1828 = vst [vmem:[%s2194_s4 + $0xa8] sm:$0xff] %v1756_v0   ;;  %v998_v11 = vmax.f32 %v780_v3, 0.0  ;;  %v1030_v12 = vmax.f32 %v908_v4, 0.0 }
 0x140   : > { %v782_v5 = vpop.f32.mrf.mxu0  ;;  %v910_v6 = vpop.f32.mrf.mxu1 }
 0x141   : > { %v783_v7 = vadd.f32 %v2184_v17, %v782_v5  ;;  %v911_v8 = vadd.f32 %v2184_v17, %v910_v6 }
 0x142   : > { %v784_v9 = vpop.f32.mrf.mxu0  ;;  %v912_v10 = vpop.f32.mrf.mxu1 }
 0x143   : > { %v999_v13 = vmax.f32 %v783_v7, 0.0  ;;  %v1031_v14 = vmax.f32 %v911_v8, 0.0 }
 0x144   : > { %v787_v15 = vpop.f32.mrf.mxu0  ;;  %v915_v16 = vpop.f32.mrf.mxu1 }
 0x145   : > { %v1681_v18 = vpack.c.bf16 %v999_v13, %v998_v11  ;;  %v1761_v19 = vpack.c.bf16 %v1031_v14, %v1030_v12  ;;  %v788_v22 = vadd.f32 %v2184_v17, %v787_v15  ;;  %v916_v23 = vadd.f32 %v2184_v17, %v915_v16 }
 0x146   : > { %v789_v20 = vpop.f32.mrf.mxu0  ;;  %v917_v21 = vpop.f32.mrf.mxu1 }
 0x147   : > { %1813 = vst [vmem:[%s2194_s4 + $0x30] sm:$0xff] %v1681_v18   ;;  %1829 = vst [vmem:[%s2194_s4 + $0xb0] sm:$0xff] %v1761_v19   ;;  %v1000_v30 = vmax.f32 %v788_v22, 0.0  ;;  %v1032_v31 = vmax.f32 %v916_v23, 0.0 }
 0x148   : > { %v790_v24 = vpop.f32.mrf.mxu0  ;;  %v918_v25 = vpop.f32.mrf.mxu1 }
 0x149   : > { %v791_v26 = vadd.f32 %v2184_v17, %v790_v24  ;;  %v919_v27 = vadd.f32 %v2184_v17, %v918_v25 }
 0x14a   : > { %v792_v28 = vpop.f32.mrf.mxu0  ;;  %v920_v29 = vpop.f32.mrf.mxu1 }
 0x14b   : > { %v1001_v32 = vmax.f32 %v791_v26, 0.0  ;;  %v1033_v33 = vmax.f32 %v919_v27, 0.0 }
 0x14c   : > { %v795_v34 = vpop.f32.mrf.mxu0  ;;  %v923_v35 = vpop.f32.mrf.mxu1 }
 0x14d   : > { %v1686_v36 = vpack.c.bf16 %v1001_v32, %v1000_v30  ;;  %v1766_v37 = vpack.c.bf16 %v1033_v33, %v1032_v31  ;;  %v796_v40 = vadd.f32 %v2184_v17, %v795_v34  ;;  %v924_v41 = vadd.f32 %v2184_v17, %v923_v35 }
 0x14e   : > { %v797_v38 = vpop.f32.mrf.mxu0  ;;  %v925_v39 = vpop.f32.mrf.mxu1 }
 0x14f   : > { %1814 = vst [vmem:[%s2194_s4 + $0x38] sm:$0xff] %v1686_v36   ;;  %1830 = vst [vmem:[%s2194_s4 + $0xb8] sm:$0xff] %v1766_v37   ;;  %v1002_v48 = vmax.f32 %v796_v40, 0.0  ;;  %v1034_v49 = vmax.f32 %v924_v41, 0.0 }
 0x150   : > { %v798_v42 = vpop.f32.mrf.mxu0  ;;  %v926_v43 = vpop.f32.mrf.mxu1 }
 0x151   : > { %v799_v44 = vadd.f32 %v2184_v17, %v798_v42  ;;  %v927_v45 = vadd.f32 %v2184_v17, %v926_v43 }
 0x152   : > { %v800_v46 = vpop.f32.mrf.mxu0  ;;  %v928_v47 = vpop.f32.mrf.mxu1 }
 0x153   : > { %v1003_v50 = vmax.f32 %v799_v44, 0.0  ;;  %v1035_v51 = vmax.f32 %v927_v45, 0.0 }
 0x154   : > { %v803_v52 = vpop.f32.mrf.mxu0  ;;  %v931_v53 = vpop.f32.mrf.mxu1 }
 0x155   : > { %v1691_v54 = vpack.c.bf16 %v1003_v50, %v1002_v48  ;;  %v1771_v55 = vpack.c.bf16 %v1035_v51, %v1034_v49  ;;  %v804_v58 = vadd.f32 %v2184_v17, %v803_v52  ;;  %v932_v59 = vadd.f32 %v2184_v17, %v931_v53 }
 0x156   : > { %v805_v56 = vpop.f32.mrf.mxu0  ;;  %v933_v57 = vpop.f32.mrf.mxu1 }
 0x157   : > { %1815 = vst [vmem:[%s2194_s4 + $0x40] sm:$0xff] %v1691_v54   ;;  %1831 = vst [vmem:[%s2194_s4 + $0xc0] sm:$0xff] %v1771_v55   ;;  %v1004_v2 = vmax.f32 %v804_v58, 0.0  ;;  %v1036_v3 = vmax.f32 %v932_v59, 0.0 }
 0x158   : > { %v806_v60 = vpop.f32.mrf.mxu0  ;;  %v934_v61 = vpop.f32.mrf.mxu1 }
 0x159   : > { %v807_v62 = vadd.f32 %v2184_v17, %v806_v60  ;;  %v935_v63 = vadd.f32 %v2184_v17, %v934_v61 }
 0x15a   : > { %v808_v0 = vpop.f32.mrf.mxu0  ;;  %v936_v1 = vpop.f32.mrf.mxu1 }
 0x15b   : > { %v1005_v4 = vmax.f32 %v807_v62, 0.0  ;;  %v1037_v5 = vmax.f32 %v935_v63, 0.0 }
 0x15c   : > { %v811_v6 = vpop.f32.mrf.mxu0  ;;  %v939_v7 = vpop.f32.mrf.mxu1 }
 0x15d   : > { %v1696_v8 = vpack.c.bf16 %v1005_v4, %v1004_v2  ;;  %v1776_v9 = vpack.c.bf16 %v1037_v5, %v1036_v3  ;;  %v812_v12 = vadd.f32 %v2184_v17, %v811_v6  ;;  %v940_v13 = vadd.f32 %v2184_v17, %v939_v7 }
 0x15e   : > { %v813_v10 = vpop.f32.mrf.mxu0  ;;  %v941_v11 = vpop.f32.mrf.mxu1 }
 0x15f   : > { %1816 = vst [vmem:[%s2194_s4 + $0x48] sm:$0xff] %v1696_v8   ;;  %1832 = vst [vmem:[%s2194_s4 + $0xc8] sm:$0xff] %v1776_v9   ;;  %v1006_v21 = vmax.f32 %v812_v12, 0.0  ;;  %v1038_v22 = vmax.f32 %v940_v13, 0.0 }
 0x160   : > { %v814_v14 = vpop.f32.mrf.mxu0  ;;  %v942_v15 = vpop.f32.mrf.mxu1 }
 0x161   : > { %v815_v16 = vadd.f32 %v2184_v17, %v814_v14  ;;  %v943_v18 = vadd.f32 %v2184_v17, %v942_v15 }
 0x162   : > { %v816_v19 = vpop.f32.mrf.mxu0  ;;  %v944_v20 = vpop.f32.mrf.mxu1 }
 0x163   : > { %v1007_v23 = vmax.f32 %v815_v16, 0.0  ;;  %v1039_v24 = vmax.f32 %v943_v18, 0.0 }
 0x164   : > { %v819_v25 = vpop.f32.mrf.mxu0  ;;  %v947_v26 = vpop.f32.mrf.mxu1 }
 0x165   : > { %v1701_v27 = vpack.c.bf16 %v1007_v23, %v1006_v21  ;;  %v1781_v28 = vpack.c.bf16 %v1039_v24, %v1038_v22  ;;  %v820_v31 = vadd.f32 %v2184_v17, %v819_v25  ;;  %v948_v32 = vadd.f32 %v2184_v17, %v947_v26 }
 0x166   : > { %v821_v29 = vpop.f32.mrf.mxu0  ;;  %v949_v30 = vpop.f32.mrf.mxu1 }
 0x167   : > { %1817 = vst [vmem:[%s2194_s4 + $0x50] sm:$0xff] %v1701_v27   ;;  %1833 = vst [vmem:[%s2194_s4 + $0xd0] sm:$0xff] %v1781_v28   ;;  %v1008_v39 = vmax.f32 %v820_v31, 0.0  ;;  %v1040_v40 = vmax.f32 %v948_v32, 0.0 }
 0x168   : > { %v822_v33 = vpop.f32.mrf.mxu0  ;;  %v950_v34 = vpop.f32.mrf.mxu1 }
 0x169   : > { %v823_v35 = vadd.f32 %v2184_v17, %v822_v33  ;;  %v951_v36 = vadd.f32 %v2184_v17, %v950_v34 }
 0x16a   : > { %v824_v37 = vpop.f32.mrf.mxu0  ;;  %v952_v38 = vpop.f32.mrf.mxu1 }
 0x16b   : > { %v1009_v41 = vmax.f32 %v823_v35, 0.0  ;;  %v1041_v42 = vmax.f32 %v951_v36, 0.0 }
 0x16c   : > { %v827_v43 = vpop.f32.mrf.mxu0  ;;  %v955_v44 = vpop.f32.mrf.mxu1 }
 0x16d   : > { %v1706_v45 = vpack.c.bf16 %v1009_v41, %v1008_v39  ;;  %v1786_v46 = vpack.c.bf16 %v1041_v42, %v1040_v40  ;;  %v828_v49 = vadd.f32 %v2184_v17, %v827_v43  ;;  %v956_v50 = vadd.f32 %v2184_v17, %v955_v44 }
 0x16e   : > { %v829_v47 = vpop.f32.mrf.mxu0  ;;  %v957_v48 = vpop.f32.mrf.mxu1 }
 0x16f   : > { %1818 = vst [vmem:[%s2194_s4 + $0x58] sm:$0xff] %v1706_v45   ;;  %1834 = vst [vmem:[%s2194_s4 + $0xd8] sm:$0xff] %v1786_v46   ;;  %v1010_v57 = vmax.f32 %v828_v49, 0.0  ;;  %v1042_v58 = vmax.f32 %v956_v50, 0.0 }
 0x170   : > { %v830_v51 = vpop.f32.mrf.mxu0  ;;  %v958_v52 = vpop.f32.mrf.mxu1 }
 0x171   : > { %v831_v53 = vadd.f32 %v2184_v17, %v830_v51  ;;  %v959_v54 = vadd.f32 %v2184_v17, %v958_v52 }
 0x172   : > { %v832_v55 = vpop.f32.mrf.mxu0  ;;  %v960_v56 = vpop.f32.mrf.mxu1 }
 0x173   : > { %v1011_v59 = vmax.f32 %v831_v53, 0.0  ;;  %v1043_v60 = vmax.f32 %v959_v54, 0.0 }
 0x174   : > { %v835_v61 = vpop.f32.mrf.mxu0  ;;  %v963_v62 = vpop.f32.mrf.mxu1 }
 0x175   : > { %v1711_v63 = vpack.c.bf16 %v1011_v59, %v1010_v57  ;;  %v1791_v0 = vpack.c.bf16 %v1043_v60, %v1042_v58  ;;  %v836_v3 = vadd.f32 %v2184_v17, %v835_v61  ;;  %v964_v4 = vadd.f32 %v2184_v17, %v963_v62 }
 0x176   : > { %v837_v1 = vpop.f32.mrf.mxu0  ;;  %v965_v2 = vpop.f32.mrf.mxu1 }
 0x177   : > { %1819 = vst [vmem:[%s2194_s4 + $0x60] sm:$0xff] %v1711_v63   ;;  %1835 = vst [vmem:[%s2194_s4 + $0xe0] sm:$0xff] %v1791_v0   ;;  %v1012_v11 = vmax.f32 %v836_v3, 0.0  ;;  %v1044_v12 = vmax.f32 %v964_v4, 0.0 }
 0x178   : > { %v838_v5 = vpop.f32.mrf.mxu0  ;;  %v966_v6 = vpop.f32.mrf.mxu1 }
 0x179   : > { %v839_v7 = vadd.f32 %v2184_v17, %v838_v5  ;;  %v967_v8 = vadd.f32 %v2184_v17, %v966_v6 }
 0x17a   : > { %v840_v9 = vpop.f32.mrf.mxu0  ;;  %v968_v10 = vpop.f32.mrf.mxu1 }
 0x17b   : > { %v1013_v13 = vmax.f32 %v839_v7, 0.0  ;;  %v1045_v14 = vmax.f32 %v967_v8, 0.0 }
 0x17c   : > { %v843_v15 = vpop.f32.mrf.mxu0  ;;  %v971_v16 = vpop.f32.mrf.mxu1 }
 0x17d   : > { %v1716_v18 = vpack.c.bf16 %v1013_v13, %v1012_v11  ;;  %v1796_v19 = vpack.c.bf16 %v1045_v14, %v1044_v12  ;;  %v844_v22 = vadd.f32 %v2184_v17, %v843_v15  ;;  %v972_v23 = vadd.f32 %v2184_v17, %v971_v16 }
 0x17e   : > { %v845_v20 = vpop.f32.mrf.mxu0  ;;  %v973_v21 = vpop.f32.mrf.mxu1 }
 0x17f   : > { %1820 = vst [vmem:[%s2194_s4 + $0x68] sm:$0xff] %v1716_v18   ;;  %1836 = vst [vmem:[%s2194_s4 + $0xe8] sm:$0xff] %v1796_v19   ;;  %v1014_v30 = vmax.f32 %v844_v22, 0.0  ;;  %v1046_v31 = vmax.f32 %v972_v23, 0.0 }
 0x180   : > { %v846_v24 = vpop.f32.mrf.mxu0  ;;  %v974_v25 = vpop.f32.mrf.mxu1 }
 0x181   : > { %v847_v26 = vadd.f32 %v2184_v17, %v846_v24  ;;  %v975_v27 = vadd.f32 %v2184_v17, %v974_v25 }
 0x182   : > { %v848_v28 = vpop.f32.mrf.mxu0  ;;  %v976_v29 = vpop.f32.mrf.mxu1 }
 0x183   : > { %v1015_v32 = vmax.f32 %v847_v26, 0.0  ;;  %v1047_v33 = vmax.f32 %v975_v27, 0.0 }
 0x184   : > { %v851_v34 = vpop.f32.mrf.mxu0  ;;  %v979_v35 = vpop.f32.mrf.mxu1 }
 0x185   : > { %v1721_v36 = vpack.c.bf16 %v1015_v32, %v1014_v30  ;;  %v1801_v37 = vpack.c.bf16 %v1047_v33, %v1046_v31  ;;  %v852_v40 = vadd.f32 %v2184_v17, %v851_v34  ;;  %v980_v41 = vadd.f32 %v2184_v17, %v979_v35 }
 0x186   : > { %v853_v38 = vpop.f32.mrf.mxu0  ;;  %v981_v39 = vpop.f32.mrf.mxu1 }
 0x187   : > { %1821 = vst [vmem:[%s2194_s4 + $0x70] sm:$0xff] %v1721_v36   ;;  %1837 = vst [vmem:[%s2194_s4 + $0xf0] sm:$0xff] %v1801_v37   ;;  %v1016_v48 = vmax.f32 %v852_v40, 0.0  ;;  %v1048_v49 = vmax.f32 %v980_v41, 0.0 }
 0x188   : > { %v854_v42 = vpop.f32.mrf.mxu0  ;;  %v982_v43 = vpop.f32.mrf.mxu1 }
 0x189   : > { %v855_v44 = vadd.f32 %v2184_v17, %v854_v42  ;;  %v983_v45 = vadd.f32 %v2184_v17, %v982_v43 }
 0x18a   : > { %v856_v46 = vpop.f32.mrf.mxu0  ;;  %v984_v47 = vpop.f32.mrf.mxu1 }
 0x18b   : > { %v1017_v50 = vmax.f32 %v855_v44, 0.0  ;;  %v1049_v51 = vmax.f32 %v983_v45, 0.0 }
 0x18d   : > { %v1726_v52 = vpack.c.bf16 %v1017_v50, %v1016_v48  ;;  %v1806_v53 = vpack.c.bf16 %v1049_v51, %v1048_v49 }
 0x18f   : > { %1822 = vst [vmem:[%s2194_s4 + $0x78] sm:$0xff] %v1726_v52   ;;  %1838 = vst [vmem:[%s2194_s4 + $0xf8] sm:$0xff] %v1806_v53  }
 0x190 PF: > { %s13_s12 = sadd.s32 1, %s1998_s12  }
 0x191   : > { %p10_p4 = scmp.ge.s32.totalorder %s13_s12, 4  }
 0x193   :  { %12 = sbr.rel (!%p10_p4) target bundleno = 1 (0x1), region = 62 }

// kernel: nature_cnn_forward.5
= control target key start
LH: loop header
LB: loop body
LE: loop exit
PB: predicated region body
PF: predicated region fallthrough
CT: control target
= control target key end

     0   :  { %s1644_s1 = inlined_call_operand.vmem [shape: bf16[512,128], index: 1, kind: input, shape index: {}]   ;;  %s1645_s0 = inlined_call_operand.vmem [shape: bf16[168,512], index: 0, kind: input, shape index: {}]   ;;  %s1646_s2 = inlined_call_operand.vmem [shape: f32[1,128], index: 2, kind: input, shape index: {}]   ;;  %s1647_s3 = inlined_call_operand.vmem [shape: bf16[168,128], index: 3, kind: output, shape index: {}]  }
   0x1   :  { %v1247_v0 = vld [vmem:[%s1644_s1 + $0x78] sm:$0xff]   ;;  %v1251_v4 = vld [vmem:[%s1644_s1 + $0x70] sm:$0xff]   ;;  %v1255_v8 = vld [vmem:[%s1644_s1 + $0x68] sm:$0xff]  }
   0x2   :  { %v1248_v1 = vld [vmem:[%s1644_s1 + $0xf8] sm:$0xff]   ;;  %1083 = vmatprep.subr.bf16.mxu0 %v1247_v0  ;;  %v1252_v5 = vld [vmem:[%s1644_s1 + $0xf0] sm:$0xff]   ;;  %v1256_v9 = vld [vmem:[%s1644_s1 + $0xe8] sm:$0xff]  }
   0x3   :  { %v1249_v2 = vld [vmem:[%s1644_s1 + $0x38] sm:$0xff]   ;;  %1165 = vmatprep.subr.bf16.mxu1 %v1248_v1  ;;  %v1253_v6 = vld [vmem:[%s1644_s1 + $0x30] sm:$0xff]   ;;  %v1257_v10 = vld [vmem:[%s1644_s1 + $0x28] sm:$0xff]  }
   0x4   :  { %v1250_v3 = vld [vmem:[%s1644_s1 + $0xb8] sm:$0xff]   ;;  %1084 = vmatpush3.bf16.msra.mxu0 %v1249_v2  ;;  %v1254_v7 = vld [vmem:[%s1644_s1 + $0xb0] sm:$0xff]   ;;  %v1258_v11 = vld [vmem:[%s1644_s1 + $0xa8] sm:$0xff]  }
   0x5   :  { %1166 = vmatpush3.bf16.msra.mxu1 %v1250_v3  ;;  %1085 = vmatprep.subr.bf16.mxu0 %v1251_v4  ;;  %v1259_v12 = vld [vmem:[%s1644_s1 + $0x60] sm:$0xff]   ;;  %v1263_v16 = vld [vmem:[%s1644_s1 + $0x58] sm:$0xff]   ;;  %v1267_v20 = vld [vmem:[%s1644_s1 + $0x50] sm:$0xff]  }
   0x6   :  { %1167 = vmatprep.subr.bf16.mxu1 %v1252_v5  ;;  %v1260_v13 = vld [vmem:[%s1644_s1 + $0xe0] sm:$0xff]   ;;  %v1264_v17 = vld [vmem:[%s1644_s1 + $0xd8] sm:$0xff]   ;;  %v1268_v21 = vld [vmem:[%s1644_s1 + $0xd0] sm:$0xff]  }
   0x7   :  { %v1261_v14 = vld [vmem:[%s1644_s1 + $0x20] sm:$0xff]   ;;  %v1265_v18 = vld [vmem:[%s1644_s1 + $0x18] sm:$0xff]   ;;  %v1269_v22 = vld [vmem:[%s1644_s1 + $0x10] sm:$0xff]  }
   0x8   :  { %1086 = vmatpush3.bf16.msra.mxu0 %v1253_v6  ;;  %v1262_v15 = vld [vmem:[%s1644_s1 + $0xa0] sm:$0xff]   ;;  %v1266_v19 = vld [vmem:[%s1644_s1 + $0x98] sm:$0xff]   ;;  %v1270_v23 = vld [vmem:[%s1644_s1 + $0x90] sm:$0xff]  }
   0x9   :  { %1168 = vmatpush3.bf16.msra.mxu1 %v1254_v7  ;;  %1087 = vmatprep.subr.bf16.mxu0 %v1255_v8  ;;  %v1271_v24 = vld [vmem:[%s1644_s1 + $0x48] sm:$0xff]   ;;  %v1275_v28 = vld [vmem:[%s1644_s1 + $0x40] sm:$0xff]  }
   0xa   :  { %1169 = vmatprep.subr.bf16.mxu1 %v1256_v9  ;;  %v1272_v25 = vld [vmem:[%s1644_s1 + $0xc8] sm:$0xff]   ;;  %v1276_v29 = vld [vmem:[%s1644_s1 + $0xc0] sm:$0xff]  }
   0xb   :  { %v1273_v26 = vld [vmem:[%s1644_s1 + $0x8] sm:$0xff]   ;;  %v1277_v30 = vld [vmem:[%s1644_s1] sm:$0xff]  }
   0xc   :  { %1088 = vmatpush3.bf16.msra.mxu0 %v1257_v10  ;;  %v1274_v27 = vld [vmem:[%s1644_s1 + $0x88] sm:$0xff]   ;;  %v1278_v31 = vld [vmem:[%s1644_s1 + $0x80] sm:$0xff]  }
   0xd   :  { %1170 = vmatpush3.bf16.msra.mxu1 %v1258_v11  ;;  %1089 = vmatprep.subr.bf16.mxu0 %v1259_v12  ;;  %v1279_v32 = vld [vmem:[%s1645_s0] ss:$16 sps:$4 sm:$0xff]   ;;  %v1281_v33 = vld [vmem:[%s1645_s0 + $0x4] ss:$16 sps:$4 sm:$0xff]   ;;  %v1282_v34 = vld [vmem:[%s1645_s0 + $0x8] ss:$16 sps:$4 sm:$0xff]  }
   0xe   :  { %1171 = vmatprep.subr.bf16.mxu1 %v1260_v13  ;;  %v1284_v35 = vld [vmem:[%s1645_s0 + $0xc] ss:$16 sps:$4 sm:$0xff]   ;;  %566 = vmatprep.mubr.bf16.mxu0 %v1281_v33  ;;  %v1285_v36 = vld [vmem:[%s1645_s0 + $0x24] ss:$16 sps:$4 sm:$0xff]   ;;  %v1289_v38 = vld [vmem:[%s1645_s0 + $0x20] ss:$16 sps:$4 sm:$0xff]  }
   0xf   :  { %686 = vmatprep.mubr.bf16.mxu1 %v1284_v35  ;;  %v1287_v37 = vld [vmem:[%s1645_s0 + $0x2c] ss:$16 sps:$4 sm:$0xff]   ;;  %v1290_v39 = vld [vmem:[%s1645_s0 + $0x28] ss:$16 sps:$4 sm:$0xff]   ;;  %v1291_v40 = vld [vmem:[%s1645_s0 + $0x44] ss:$16 sps:$4 sm:$0xff]  }
  0x10   :  { %1090 = vmatpush3.bf16.msra.mxu0 %v1261_v14  ;;  %v1293_v41 = vld [vmem:[%s1645_s0 + $0x4c] ss:$16 sps:$4 sm:$0xff]   ;;  %v1295_v42 = vld [vmem:[%s1645_s0 + $0x40] ss:$16 sps:$4 sm:$0xff]   ;;  %v1296_v43 = vld [vmem:[%s1645_s0 + $0x48] ss:$16 sps:$4 sm:$0xff]  }
  0x11   :  { %1172 = vmatpush3.bf16.msra.mxu1 %v1262_v15  ;;  %1091 = vmatprep.subr.bf16.mxu0 %v1263_v16  ;;  %v1297_v44 = vld [vmem:[%s1645_s0 + $0x64] ss:$16 sps:$4 sm:$0xff]   ;;  %v1299_v45 = vld [vmem:[%s1645_s0 + $0x6c] ss:$16 sps:$4 sm:$0xff]   ;;  %v1301_v46 = vld [vmem:[%s1645_s0 + $0x60] ss:$16 sps:$4 sm:$0xff]  }
  0x12   :  { %1173 = vmatprep.subr.bf16.mxu1 %v1264_v17  ;;  %v1302_v47 = vld [vmem:[%s1645_s0 + $0x68] ss:$16 sps:$4 sm:$0xff]   ;;  %v1303_v48 = vld [vmem:[%s1645_s0 + $0x84] ss:$16 sps:$4 sm:$0xff]   ;;  %v1305_v49 = vld [vmem:[%s1645_s0 + $0x8c] ss:$16 sps:$4 sm:$0xff]  }
  0x13   :  { %v1307_v50 = vld [vmem:[%s1645_s0 + $0x80] ss:$16 sps:$4 sm:$0xff]   ;;  %v1308_v51 = vld [vmem:[%s1645_s0 + $0x88] ss:$16 sps:$4 sm:$0xff]   ;;  %v1309_v52 = vld [vmem:[%s1645_s0 + $0xa4] ss:$16 sps:$4 sm:$0xff]  }
  0x14   :  { %1092 = vmatpush3.bf16.msra.mxu0 %v1265_v18  ;;  %v1311_v53 = vld [vmem:[%s1645_s0 + $0xac] ss:$16 sps:$4 sm:$0xff]   ;;  %v1313_v54 = vld [vmem:[%s1645_s0 + $0xa0] ss:$16 sps:$4 sm:$0xff]   ;;  %v1314_v55 = vld [vmem:[%s1645_s0 + $0xa8] ss:$16 sps:$4 sm:$0xff]  }
  0x15   :  { %1174 = vmatpush3.bf16.msra.mxu1 %v1266_v19  ;;  %1093 = vmatprep.subr.bf16.mxu0 %v1267_v20  ;;  %v1315_v56 = vld [vmem:[%s1645_s0 + $0xc4] ss:$16 sps:$4 sm:$0xff]   ;;  %v1317_v57 = vld [vmem:[%s1645_s0 + $0xcc] ss:$16 sps:$4 sm:$0xff]   ;;  %v1319_v58 = vld [vmem:[%s1645_s0 + $0xc0] ss:$16 sps:$4 sm:$0xff]  }
  0x16   :  { %1175 = vmatprep.subr.bf16.mxu1 %v1268_v21  ;;  %v1320_v59 = vld [vmem:[%s1645_s0 + $0xc8] ss:$16 sps:$4 sm:$0xff]   ;;  %v1321_v60 = vld [vmem:[%s1645_s0 + $0xe4] ss:$16 sps:$4 sm:$0xff]   ;;  %v1323_v61 = vld [vmem:[%s1645_s0 + $0xec] ss:$16 sps:$4 sm:$0xff]  }
  0x17   :  { %v1325_v62 = vld [vmem:[%s1645_s0 + $0xe0] ss:$16 sps:$4 sm:$0xff]   ;;  %v1326_v63 = vld [vmem:[%s1645_s0 + $0xe8] ss:$16 sps:$4 sm:$0xff]   ;;  %v1327_v0 = vld [vmem:[%s1645_s0 + $0x104] ss:$16 sps:$4 sm:$0xff]  }
  0x18   :  { %1094 = vmatpush3.bf16.msra.mxu0 %v1269_v22  ;;  %v1329_v1 = vld [vmem:[%s1645_s0 + $0x10c] ss:$16 sps:$4 sm:$0xff]   ;;  %v1331_v2 = vld [vmem:[%s1645_s0 + $0x100] ss:$16 sps:$4 sm:$0xff]   ;;  %v1332_v3 = vld [vmem:[%s1645_s0 + $0x108] ss:$16 sps:$4 sm:$0xff]  }
  0x19   :  { %1176 = vmatpush3.bf16.msra.mxu1 %v1270_v23  ;;  %1095 = vmatprep.subr.bf16.mxu0 %v1271_v24  ;;  %v1333_v4 = vld [vmem:[%s1645_s0 + $0x124] ss:$16 sps:$4 sm:$0xff]   ;;  %v1335_v5 = vld [vmem:[%s1645_s0 + $0x12c] ss:$16 sps:$4 sm:$0xff]   ;;  %v1337_v8 = vld [vmem:[%s1645_s0 + $0x120] ss:$16 sps:$4 sm:$0xff]  }
  0x1a   :  { %1177 = vmatprep.subr.bf16.mxu1 %v1272_v25  ;;  %v55_v6 = vld [vmem:[%s1645_s0 + $0x140] sm:$0xff]  ;;  %v56_v7 = vld [vmem:[%s1645_s0 + $0x148] sm:$0xff] }
  0x1b   :  { %v1338_v9 = vld [vmem:[%s1645_s0 + $0x128] ss:$16 sps:$4 sm:$0xff]   ;;  %v947_v10 = vcombine.high %v55_v6, %v55_v6  ;;  %v949_v11 = vcombine.high %v56_v7, %v56_v7  ;;  %v946_v12 = vcombine.low %v55_v6, %v55_v6  ;;  %v948_v13 = vcombine.low %v56_v7, %v56_v7  ;;  %v1588_v16 = vld [vmem:[%s1646_s2] ss:$0 sm:$0xff] }
  0x1c   :  { %1096 = vmatpush3.bf16.msra.mxu0 %v1273_v26 }
  0x1d   :  { %1178 = vmatpush3.bf16.msra.mxu1 %v1274_v27  ;;  %1097 = vmatprep.subr.bf16.mxu0 %v1275_v28 }
  0x1e   :  { %1179 = vmatprep.subr.bf16.mxu1 %v1276_v29 }
  0x20   :  { %1098 = vmatpush3.bf16.msra.mxu0 %v1277_v30 }
  0x21   :  { %1180 = vmatpush3.bf16.msra.mxu1 %v1278_v31 }
  0x23   :  { %567 = vmatmul.mubr.bf16.vlgmr.msra.gmra.mxu0 %v1279_v32 }
  0x24   :  { %687 = vmatmul.mubr.bf16.vlgmr.msra.gmra.mxu1 %v1282_v34  ;;  %574 = vmatprep.mubr.bf16.mxu0 %v1285_v36 }
  0x25   :  { %694 = vmatprep.mubr.bf16.mxu1 %v1287_v37 }
  0x2b   :  { %575 = vmatmul.mubr.bf16.gmra.mxu0 %v1289_v38 }
  0x2c   :  { %695 = vmatmul.mubr.bf16.gmra.mxu1 %v1290_v39  ;;  %582 = vmatprep.mubr.bf16.mxu0 %v1291_v40 }
  0x2d   :  { %702 = vmatprep.mubr.bf16.mxu1 %v1293_v41 }
  0x33   :  { %583 = vmatmul.mubr.bf16.gmra.mxu0 %v1295_v42 }
  0x34   :  { %703 = vmatmul.mubr.bf16.gmra.mxu1 %v1296_v43  ;;  %590 = vmatprep.mubr.bf16.mxu0 %v1297_v44 }
  0x35   :  { %710 = vmatprep.mubr.bf16.mxu1 %v1299_v45 }
  0x3b   :  { %591 = vmatmul.mubr.bf16.gmra.mxu0 %v1301_v46 }
  0x3c   :  { %711 = vmatmul.mubr.bf16.gmra.mxu1 %v1302_v47  ;;  %598 = vmatprep.mubr.bf16.mxu0 %v1303_v48 }
  0x3d   :  { %718 = vmatprep.mubr.bf16.mxu1 %v1305_v49 }
  0x43   :  { %599 = vmatmul.mubr.bf16.gmra.mxu0 %v1307_v50 }
  0x44   :  { %719 = vmatmul.mubr.bf16.gmra.mxu1 %v1308_v51  ;;  %606 = vmatprep.mubr.bf16.mxu0 %v1309_v52 }
  0x45   :  { %726 = vmatprep.mubr.bf16.mxu1 %v1311_v53 }
  0x4b   :  { %607 = vmatmul.mubr.bf16.gmra.mxu0 %v1313_v54 }
  0x4c   :  { %727 = vmatmul.mubr.bf16.gmra.mxu1 %v1314_v55  ;;  %614 = vmatprep.mubr.bf16.mxu0 %v1315_v56 }
  0x4d   :  { %734 = vmatprep.mubr.bf16.mxu1 %v1317_v57 }
  0x53   :  { %615 = vmatmul.mubr.bf16.gmra.mxu0 %v1319_v58 }
  0x54   :  { %735 = vmatmul.mubr.bf16.gmra.mxu1 %v1320_v59  ;;  %622 = vmatprep.mubr.bf16.mxu0 %v1321_v60 }
  0x55   :  { %742 = vmatprep.mubr.bf16.mxu1 %v1323_v61 }
  0x5b   :  { %623 = vmatmul.mubr.bf16.gmra.mxu0 %v1325_v62 }
  0x5c   :  { %743 = vmatmul.mubr.bf16.gmra.mxu1 %v1326_v63  ;;  %630 = vmatprep.mubr.bf16.mxu0 %v1327_v0 }
  0x5d   :  { %750 = vmatprep.mubr.bf16.mxu1 %v1329_v1 }
  0x63   :  { %631 = vmatmul.mubr.bf16.gmra.mxu0 %v1331_v2 }
  0x64   :  { %751 = vmatmul.mubr.bf16.gmra.mxu1 %v1332_v3  ;;  %638 = vmatprep.mubr.bf16.mxu0 %v1333_v4 }
  0x65   :  { %758 = vmatprep.mubr.bf16.mxu1 %v1335_v5 }
  0x6b   :  { %639 = vmatmul.mubr.bf16.gmra.mxu0 %v1337_v8 }
  0x6c   :  { %759 = vmatmul.mubr.bf16.gmra.mxu1 %v1338_v9  ;;  %646 = vmatprep.mubr.bf16.mxu0 %v947_v10 }
  0x6d   :  { %766 = vmatprep.mubr.bf16.mxu1 %v949_v11 }
  0x73   :  { %647 = vmatmul.mubr.bf16.gmra.mxu0 %v946_v12 }
  0x74   :  { %767 = vmatmul.mubr.bf16.gmra.mxu1 %v948_v13 }
  0xe3   :  { %v1099_v14 = vpop.f32.mrf.mxu0 }
  0xe4   :  { %v1181_v15 = vpop.f32.mrf.mxu1 }
  0xe5   :  { %v1100_v17 = vpop.f32.mrf.mxu0 }
  0xe6   :  { %v1101_v18 = vadd.f32 %v1100_v17, %v1099_v14  ;;  %v1182_v19 = vpop.f32.mrf.mxu1 }
  0xe7   :  { %v1102_v20 = vpop.f32.mrf.mxu0  ;;  %v1183_v24 = vadd.f32 %v1182_v19, %v1181_v15 }
  0xe8   :  { %v569_v21 = vadd.f32 %v1101_v18, %v1588_v16  ;;  %v1184_v22 = vpop.f32.mrf.mxu1 }
  0xe9   :  { %v1103_v23 = vpop.f32.mrf.mxu0 }
  0xea   :  { %v1104_v25 = vadd.f32 %v1103_v23, %v1102_v20  ;;  %v1185_v26 = vpop.f32.mrf.mxu1  ;;  %v689_v28 = vadd.f32 %v1183_v24, %v569_v21 }
  0xeb   :  { %v1105_v27 = vpop.f32.mrf.mxu0  ;;  %v1186_v30 = vadd.f32 %v1185_v26, %v1184_v22 }
  0xec   :  { %v572_v29 = vadd.f32 %v1104_v25, %v1588_v16  ;;  %v1187_v31 = vpop.f32.mrf.mxu1  ;;  %v774_v37 = vmax.f32 %v689_v28, 0.0 }
  0xed   :  { %v1106_v32 = vpop.f32.mrf.mxu0 }
  0xee   :  { %v692_v33 = vadd.f32 %v1186_v30, %v572_v29  ;;  %v1107_v34 = vadd.f32 %v1106_v32, %v1105_v27  ;;  %v1188_v35 = vpop.f32.mrf.mxu1 }
  0xef   :  { %v1108_v36 = vpop.f32.mrf.mxu0  ;;  %v1189_v43 = vadd.f32 %v1188_v35, %v1187_v31 }
  0xf0   :  { %v775_v38 = vmax.f32 %v692_v33, 0.0  ;;  %v577_v39 = vadd.f32 %v1107_v34, %v1588_v16  ;;  %v1190_v40 = vpop.f32.mrf.mxu1 }
  0xf1   :  { %v1109_v41 = vpop.f32.mrf.mxu0 }
  0xf2   :  { %v1027_v42 = vpack.c.bf16 %v775_v38, %v774_v37  ;;  %v1110_v44 = vadd.f32 %v1109_v41, %v1108_v36  ;;  %v1191_v45 = vpop.f32.mrf.mxu1  ;;  %v697_v47 = vadd.f32 %v1189_v43, %v577_v39 }
  0xf3   :  { %v1111_v46 = vpop.f32.mrf.mxu0  ;;  %v1192_v49 = vadd.f32 %v1191_v45, %v1190_v40 }
  0xf4   :  { %1028 = vst [vmem:[%s1647_s3] sm:$0xff] %v1027_v42   ;;  %v580_v48 = vadd.f32 %v1110_v44, %v1588_v16  ;;  %v1193_v50 = vpop.f32.mrf.mxu1  ;;  %v776_v56 = vmax.f32 %v697_v47, 0.0 }
  0xf5   :  { %v1112_v51 = vpop.f32.mrf.mxu0 }
  0xf6   :  { %v700_v52 = vadd.f32 %v1192_v49, %v580_v48  ;;  %v1113_v53 = vadd.f32 %v1112_v51, %v1111_v46  ;;  %v1194_v54 = vpop.f32.mrf.mxu1 }
  0xf7   :  { %v1114_v55 = vpop.f32.mrf.mxu0  ;;  %v1195_v62 = vadd.f32 %v1194_v54, %v1193_v50 }
  0xf8   :  { %v777_v57 = vmax.f32 %v700_v52, 0.0  ;;  %v585_v58 = vadd.f32 %v1113_v53, %v1588_v16  ;;  %v1196_v59 = vpop.f32.mrf.mxu1 }
  0xf9   :  { %v1115_v60 = vpop.f32.mrf.mxu0 }
  0xfa   :  { %v1032_v61 = vpack.c.bf16 %v777_v57, %v776_v56  ;;  %v1116_v63 = vadd.f32 %v1115_v60, %v1114_v55  ;;  %v1197_v0 = vpop.f32.mrf.mxu1  ;;  %v705_v2 = vadd.f32 %v1195_v62, %v585_v58 }
  0xfb   :  { %v1117_v1 = vpop.f32.mrf.mxu0  ;;  %v1198_v4 = vadd.f32 %v1197_v0, %v1196_v59 }
  0xfc   :  { %1074 = vst [vmem:[%s1647_s3 + $0x8] sm:$0xff] %v1032_v61   ;;  %v588_v3 = vadd.f32 %v1116_v63, %v1588_v16  ;;  %v1199_v5 = vpop.f32.mrf.mxu1  ;;  %v778_v11 = vmax.f32 %v705_v2, 0.0 }
  0xfd   :  { %v1118_v6 = vpop.f32.mrf.mxu0 }
  0xfe   :  { %v708_v7 = vadd.f32 %v1198_v4, %v588_v3  ;;  %v1119_v8 = vadd.f32 %v1118_v6, %v1117_v1  ;;  %v1200_v9 = vpop.f32.mrf.mxu1 }
  0xff   :  { %v1120_v10 = vpop.f32.mrf.mxu0  ;;  %v1201_v18 = vadd.f32 %v1200_v9, %v1199_v5 }
 0x100   :  { %v779_v12 = vmax.f32 %v708_v7, 0.0  ;;  %v593_v13 = vadd.f32 %v1119_v8, %v1588_v16  ;;  %v1202_v14 = vpop.f32.mrf.mxu1 }
 0x101   :  { %v1121_v15 = vpop.f32.mrf.mxu0 }
 0x102   :  { %v1037_v17 = vpack.c.bf16 %v779_v12, %v778_v11  ;;  %v1122_v19 = vadd.f32 %v1121_v15, %v1120_v10  ;;  %v1203_v20 = vpop.f32.mrf.mxu1  ;;  %v713_v22 = vadd.f32 %v1201_v18, %v593_v13 }
 0x103   :  { %v1123_v21 = vpop.f32.mrf.mxu0  ;;  %v1204_v24 = vadd.f32 %v1203_v20, %v1202_v14 }
 0x104   :  { %1075 = vst [vmem:[%s1647_s3 + $0x10] sm:$0xff] %v1037_v17   ;;  %v596_v23 = vadd.f32 %v1122_v19, %v1588_v16  ;;  %v1205_v25 = vpop.f32.mrf.mxu1  ;;  %v780_v31 = vmax.f32 %v713_v22, 0.0 }
 0x105   :  { %v1124_v26 = vpop.f32.mrf.mxu0 }
 0x106   :  { %v716_v27 = vadd.f32 %v1204_v24, %v596_v23  ;;  %v1125_v28 = vadd.f32 %v1124_v26, %v1123_v21  ;;  %v1206_v29 = vpop.f32.mrf.mxu1 }
 0x107   :  { %v1126_v30 = vpop.f32.mrf.mxu0  ;;  %v1207_v37 = vadd.f32 %v1206_v29, %v1205_v25 }
 0x108   :  { %v781_v32 = vmax.f32 %v716_v27, 0.0  ;;  %v601_v33 = vadd.f32 %v1125_v28, %v1588_v16  ;;  %v1208_v34 = vpop.f32.mrf.mxu1 }
 0x109   :  { %v1127_v35 = vpop.f32.mrf.mxu0 }
 0x10a   :  { %v1042_v36 = vpack.c.bf16 %v781_v32, %v780_v31  ;;  %v1128_v38 = vadd.f32 %v1127_v35, %v1126_v30  ;;  %v1209_v39 = vpop.f32.mrf.mxu1  ;;  %v721_v41 = vadd.f32 %v1207_v37, %v601_v33 }
 0x10b   :  { %v1129_v40 = vpop.f32.mrf.mxu0  ;;  %v1210_v43 = vadd.f32 %v1209_v39, %v1208_v34 }
 0x10c   :  { %1076 = vst [vmem:[%s1647_s3 + $0x18] sm:$0xff] %v1042_v36   ;;  %v604_v42 = vadd.f32 %v1128_v38, %v1588_v16  ;;  %v1211_v44 = vpop.f32.mrf.mxu1  ;;  %v782_v50 = vmax.f32 %v721_v41, 0.0 }
 0x10d   :  { %v1130_v45 = vpop.f32.mrf.mxu0 }
 0x10e   :  { %v724_v46 = vadd.f32 %v1210_v43, %v604_v42  ;;  %v1131_v47 = vadd.f32 %v1130_v45, %v1129_v40  ;;  %v1212_v48 = vpop.f32.mrf.mxu1 }
 0x10f   :  { %v1132_v49 = vpop.f32.mrf.mxu0  ;;  %v1213_v56 = vadd.f32 %v1212_v48, %v1211_v44 }
 0x110   :  { %v783_v51 = vmax.f32 %v724_v46, 0.0  ;;  %v609_v52 = vadd.f32 %v1131_v47, %v1588_v16  ;;  %v1214_v53 = vpop.f32.mrf.mxu1 }
 0x111   :  { %v1133_v54 = vpop.f32.mrf.mxu0 }
 0x112   :  { %v1047_v55 = vpack.c.bf16 %v783_v51, %v782_v50  ;;  %v1134_v57 = vadd.f32 %v1133_v54, %v1132_v49  ;;  %v1215_v58 = vpop.f32.mrf.mxu1  ;;  %v729_v60 = vadd.f32 %v1213_v56, %v609_v52 }
 0x113   :  { %v1135_v59 = vpop.f32.mrf.mxu0  ;;  %v1216_v62 = vadd.f32 %v1215_v58, %v1214_v53 }
 0x114   :  { %1077 = vst [vmem:[%s1647_s3 + $0x20] sm:$0xff] %v1047_v55   ;;  %v612_v61 = vadd.f32 %v1134_v57, %v1588_v16  ;;  %v1217_v63 = vpop.f32.mrf.mxu1  ;;  %v784_v5 = vmax.f32 %v729_v60, 0.0 }
 0x115   :  { %v1136_v0 = vpop.f32.mrf.mxu0 }
 0x116   :  { %v732_v1 = vadd.f32 %v1216_v62, %v612_v61  ;;  %v1137_v2 = vadd.f32 %v1136_v0, %v1135_v59  ;;  %v1218_v3 = vpop.f32.mrf.mxu1 }
 0x117   :  { %v1138_v4 = vpop.f32.mrf.mxu0  ;;  %v1219_v11 = vadd.f32 %v1218_v3, %v1217_v63 }
 0x118   :  { %v785_v6 = vmax.f32 %v732_v1, 0.0  ;;  %v617_v7 = vadd.f32 %v1137_v2, %v1588_v16  ;;  %v1220_v8 = vpop.f32.mrf.mxu1 }
 0x119   :  { %v1139_v9 = vpop.f32.mrf.mxu0 }
 0x11a   :  { %v1052_v10 = vpack.c.bf16 %v785_v6, %v784_v5  ;;  %v1140_v12 = vadd.f32 %v1139_v9, %v1138_v4  ;;  %v1221_v13 = vpop.f32.mrf.mxu1  ;;  %v737_v15 = vadd.f32 %v1219_v11, %v617_v7 }
 0x11b   :  { %v1141_v14 = vpop.f32.mrf.mxu0  ;;  %v1222_v18 = vadd.f32 %v1221_v13, %v1220_v8 }
 0x11c   :  { %1078 = vst [vmem:[%s1647_s3 + $0x28] sm:$0xff] %v1052_v10   ;;  %v620_v17 = vadd.f32 %v1140_v12, %v1588_v16  ;;  %v1223_v19 = vpop.f32.mrf.mxu1  ;;  %v786_v25 = vmax.f32 %v737_v15, 0.0 }
 0x11d   :  { %v1142_v20 = vpop.f32.mrf.mxu0 }
 0x11e   :  { %v740_v21 = vadd.f32 %v1222_v18, %v620_v17  ;;  %v1143_v22 = vadd.f32 %v1142_v20, %v1141_v14  ;;  %v1224_v23 = vpop.f32.mrf.mxu1 }
 0x11f   :  { %v1144_v24 = vpop.f32.mrf.mxu0  ;;  %v1225_v31 = vadd.f32 %v1224_v23, %v1223_v19 }
 0x120   :  { %v787_v26 = vmax.f32 %v740_v21, 0.0  ;;  %v625_v27 = vadd.f32 %v1143_v22, %v1588_v16  ;;  %v1226_v28 = vpop.f32.mrf.mxu1 }
 0x121   :  { %v1145_v29 = vpop.f32.mrf.mxu0 }
 0x122   :  { %v1057_v30 = vpack.c.bf16 %v787_v26, %v786_v25  ;;  %v1146_v32 = vadd.f32 %v1145_v29, %v1144_v24  ;;  %v1227_v33 = vpop.f32.mrf.mxu1  ;;  %v745_v35 = vadd.f32 %v1225_v31, %v625_v27 }
 0x123   :  { %v1147_v34 = vpop.f32.mrf.mxu0  ;;  %v1228_v37 = vadd.f32 %v1227_v33, %v1226_v28 }
 0x124   :  { %1079 = vst [vmem:[%s1647_s3 + $0x30] sm:$0xff] %v1057_v30   ;;  %v628_v36 = vadd.f32 %v1146_v32, %v1588_v16  ;;  %v1229_v38 = vpop.f32.mrf.mxu1  ;;  %v788_v44 = vmax.f32 %v745_v35, 0.0 }
 0x125   :  { %v1148_v39 = vpop.f32.mrf.mxu0 }
 0x126   :  { %v748_v40 = vadd.f32 %v1228_v37, %v628_v36  ;;  %v1149_v41 = vadd.f32 %v1148_v39, %v1147_v34  ;;  %v1230_v42 = vpop.f32.mrf.mxu1 }
 0x127   :  { %v1150_v43 = vpop.f32.mrf.mxu0  ;;  %v1231_v50 = vadd.f32 %v1230_v42, %v1229_v38 }
 0x128   :  { %v789_v45 = vmax.f32 %v748_v40, 0.0  ;;  %v633_v46 = vadd.f32 %v1149_v41, %v1588_v16  ;;  %v1232_v47 = vpop.f32.mrf.mxu1 }
 0x129   :  { %v1151_v48 = vpop.f32.mrf.mxu0 }
 0x12a   :  { %v1062_v49 = vpack.c.bf16 %v789_v45, %v788_v44  ;;  %v1152_v51 = vadd.f32 %v1151_v48, %v1150_v43  ;;  %v1233_v52 = vpop.f32.mrf.mxu1  ;;  %v753_v54 = vadd.f32 %v1231_v50, %v633_v46 }
 0x12b   :  { %v1153_v53 = vpop.f32.mrf.mxu0  ;;  %v1234_v56 = vadd.f32 %v1233_v52, %v1232_v47 }
 0x12c   :  { %1080 = vst [vmem:[%s1647_s3 + $0x38] sm:$0xff] %v1062_v49   ;;  %v636_v55 = vadd.f32 %v1152_v51, %v1588_v16  ;;  %v1235_v57 = vpop.f32.mrf.mxu1  ;;  %v790_v63 = vmax.f32 %v753_v54, 0.0 }
 0x12d   :  { %v1154_v58 = vpop.f32.mrf.mxu0 }
 0x12e   :  { %v756_v59 = vadd.f32 %v1234_v56, %v636_v55  ;;  %v1155_v60 = vadd.f32 %v1154_v58, %v1153_v53  ;;  %v1236_v61 = vpop.f32.mrf.mxu1 }
 0x12f   :  { %v1156_v62 = vpop.f32.mrf.mxu0  ;;  %v1237_v5 = vadd.f32 %v1236_v61, %v1235_v57 }
 0x130   :  { %v791_v0 = vmax.f32 %v756_v59, 0.0  ;;  %v641_v1 = vadd.f32 %v1155_v60, %v1588_v16  ;;  %v1238_v2 = vpop.f32.mrf.mxu1 }
 0x131   :  { %v1157_v3 = vpop.f32.mrf.mxu0 }
 0x132   :  { %v1067_v4 = vpack.c.bf16 %v791_v0, %v790_v63  ;;  %v1158_v6 = vadd.f32 %v1157_v3, %v1156_v62  ;;  %v1239_v7 = vpop.f32.mrf.mxu1  ;;  %v761_v9 = vadd.f32 %v1237_v5, %v641_v1 }
 0x133   :  { %v1159_v8 = vpop.f32.mrf.mxu0  ;;  %v1240_v11 = vadd.f32 %v1239_v7, %v1238_v2 }
 0x134   :  { %1081 = vst [vmem:[%s1647_s3 + $0x40] sm:$0xff] %v1067_v4   ;;  %v644_v10 = vadd.f32 %v1158_v6, %v1588_v16  ;;  %v1241_v12 = vpop.f32.mrf.mxu1  ;;  %v792_v19 = vmax.f32 %v761_v9, 0.0 }
 0x135   :  { %v1160_v13 = vpop.f32.mrf.mxu0 }
 0x136   :  { %v764_v14 = vadd.f32 %v1240_v11, %v644_v10  ;;  %v1161_v15 = vadd.f32 %v1160_v13, %v1159_v8  ;;  %v1242_v17 = vpop.f32.mrf.mxu1 }
 0x137   :  { %v1162_v18 = vpop.f32.mrf.mxu0  ;;  %v1243_v22 = vadd.f32 %v1242_v17, %v1241_v12 }
 0x138   :  { %v793_v20 = vmax.f32 %v764_v14, 0.0  ;;  %v649_v21 = vadd.f32 %v1161_v15, %v1588_v16  ;;  %v1244_v23 = vpop.f32.mrf.mxu1 }
 0x139   :  { %v1163_v24 = vpop.f32.mrf.mxu0 }
 0x13a   :  { %v1072_v25 = vpack.c.bf16 %v793_v20, %v792_v19  ;;  %v769_v26 = vadd.f32 %v1243_v22, %v649_v21  ;;  %v1245_v27 = vpop.f32.mrf.mxu1 }
 0x13c   :  { %1082 = vst [vmem:[%s1647_s3 + $0x48] sm:$0xff] %v1072_v25   ;;  %v794_v28 = vmax.f32 %v769_v26, 0.0 }
 0x13e   :  { %v1023_v29 = vpack.c.bf16 %v794_v28, %v794_v28 }
 0x140   :  { %900 = vst [vmem:[%s1647_s3 + $0x50] sm:$0xf] %v1023_v29 }

// kernel: nature_cnn_forward.6
= control target key start
LH: loop header
LB: loop body
LE: loop exit
PB: predicated region body
PF: predicated region fallthrough
CT: control target
= control target key end

     0   :  { %v1319_v24 = vmov 0.0   ;;  %vm1320_vm0 = vmmov 0   ;;  %s1654_s1 = inlined_call_operand.vmem [shape: bf16[640,128], index: 1, kind: input, shape index: {}]   ;;  %s1655_s0 = inlined_call_operand.vmem [shape: bf16[104,640], index: 0, kind: input, shape index: {}]   ;;  %s1656_s2 = inlined_call_operand.vmem [shape: f32[1,128], index: 2, kind: input, shape index: {}]   ;;  %s1657_s3 = inlined_call_operand.vmem [shape: bf16[104,128], index: 3, kind: output, shape index: {}]  }
   0x1   :  { %v1232_v0 = vld [vmem:[%s1654_s1 + $0x78] sm:$0xff]   ;;  %v1234_v2 = vld [vmem:[%s1654_s1 + $0x70] sm:$0xff]   ;;  %v1236_v4 = vld [vmem:[%s1654_s1 + $0x68] sm:$0xff]  }
   0x2   :  { %v1233_v1 = vld [vmem:[%s1654_s1 + $0x38] sm:$0xff]   ;;  %1039 = vmatprep.subr.bf16.mxu0 %v1232_v0  ;;  %1214 = vmatprep.subr.bf16.mxu1 %v1232_v0  ;;  %v1235_v3 = vld [vmem:[%s1654_s1 + $0x30] sm:$0xff]   ;;  %v1237_v5 = vld [vmem:[%s1654_s1 + $0x28] sm:$0xff]  }
   0x3   :  { %1040 = vmatpush3.bf16.msra.mxu0 %v1233_v1  ;;  %1222 = vmatpush3.bf16.msra.mxu1 %v1233_v1  ;;  %v1238_v6 = vld [vmem:[%s1654_s1 + $0x60] sm:$0xff]   ;;  %v1240_v8 = vld [vmem:[%s1654_s1 + $0x58] sm:$0xff]   ;;  %v1242_v10 = vld [vmem:[%s1654_s1 + $0x50] sm:$0xff]  }
   0x4   :  { %1041 = vmatprep.subr.bf16.mxu0 %v1234_v2  ;;  %1215 = vmatprep.subr.bf16.mxu1 %v1234_v2  ;;  %v1239_v7 = vld [vmem:[%s1654_s1 + $0x20] sm:$0xff]   ;;  %v1241_v9 = vld [vmem:[%s1654_s1 + $0x18] sm:$0xff]   ;;  %v1243_v13 = vld [vmem:[%s1654_s1 + $0x10] sm:$0xff]  }
   0x5   :  { %v1250_v11 = vld [vmem:[%s1655_s0 + $0x4] ss:$20 sps:$4 sm:$0xff]   ;;  %v1244_v14 = vld [vmem:[%s1654_s1 + $0x48] sm:$0xff]   ;;  %v1248_v18 = vld [vmem:[%s1655_s0] ss:$20 sps:$4 sm:$0xff]  }
   0x6   :  { %v1253_v12 = vld [vmem:[%s1655_s0 + $0xa4] ss:$20 sps:$4 sm:$0xff]   ;;  %587 = vmatprep.mubr.bf16.mxu0 %v1250_v11  ;;  %v1245_v15 = vld [vmem:[%s1654_s1 + $0x8] sm:$0xff]   ;;  %v1251_v19 = vld [vmem:[%s1655_s0 + $0xa0] ss:$20 sps:$4 sm:$0xff]  }
   0x7   :  { %1042 = vmatpush3.bf16.msra.mxu0 %v1235_v3  ;;  %1223 = vmatpush3.bf16.msra.mxu1 %v1235_v3  ;;  %v1246_v16 = vld [vmem:[%s1654_s1 + $0x40] sm:$0xff]   ;;  %v1254_v20 = vld [vmem:[%s1654_s1 + $0xf8] sm:$0xff]   ;;  %v1257_v23 = vld [vmem:[%s1654_s1 + $0xf0] sm:$0xff]  }
   0x8   :  { %1043 = vmatprep.subr.bf16.mxu0 %v1236_v4  ;;  %1216 = vmatprep.subr.bf16.mxu1 %v1236_v4  ;;  %v1247_v17 = vld [vmem:[%s1654_s1] sm:$0xff]   ;;  %v1255_v21 = vld [vmem:[%s1654_s1 + $0xb8] sm:$0xff]   ;;  %v1258_v27 = vld [vmem:[%s1654_s1 + $0xb0] sm:$0xff]  }
   0x9   :  { %619 = vmatprep.mubr.bf16.mxu1 %v1253_v12  ;;  %v1256_v22 = vld [vmem:[%s1654_s1 + $0x138] sm:$0xff]   ;;  %v1260_v25 = vld [vmem:[%s1655_s0 + $0x2c] ss:$20 sps:$4 sm:$0xff]   ;;  %v1259_v28 = vld [vmem:[%s1654_s1 + $0x130] sm:$0xff]  }
   0xa   :  { %v1264_v26 = vld [vmem:[%s1655_s0 + $0xcc] ss:$20 sps:$4 sm:$0xff]   ;;  %v1262_v29 = vld [vmem:[%s1655_s0 + $0x28] ss:$20 sps:$4 sm:$0xff]   ;;  %v51_v33 = vld [vmem:[%s1655_s0 + $0xf0] sm:$0xff] }
   0xb   :  { %1044 = vmatpush3.bf16.msra.mxu0 %v1237_v5  ;;  %1224 = vmatpush3.bf16.msra.mxu1 %v1237_v5  ;;  %v1263_v30 = vld [vmem:[%s1654_s1 + $0xe8] sm:$0xff]   ;;  %v1269_v35 = vld [vmem:[%s1654_s1 + $0xe0] sm:$0xff]   ;;  %v934_v37 = vcombine.high %v51_v33, %v51_v33  ;;  %v1275_v40 = vld [vmem:[%s1654_s1 + $0xd8] sm:$0xff]   ;;  %v933_v43 = vcombine.low %v51_v33, %v51_v33 }
   0xc   :  { %1045 = vmatprep.subr.bf16.mxu0 %v1238_v6  ;;  %1217 = vmatprep.subr.bf16.mxu1 %v1238_v6  ;;  %v1266_v31 = vld [vmem:[%s1654_s1 + $0xa8] sm:$0xff]   ;;  %v1270_v38 = vld [vmem:[%s1654_s1 + $0xa0] sm:$0xff]   ;;  %v1277_v42 = vld [vmem:[%s1654_s1 + $0x98] sm:$0xff]  }
   0xd   :  { %v1268_v32 = vld [vmem:[%s1655_s0 + $0xc8] ss:$20 sps:$4 sm:$0xff]   ;;  %v1271_v39 = vld [vmem:[%s1654_s1 + $0x120] sm:$0xff]   ;;  %v1280_v45 = vld [vmem:[%s1654_s1 + $0xd0] sm:$0xff]  }
   0xe   :  { %v1267_v34 = vld [vmem:[%s1654_s1 + $0x128] sm:$0xff]   ;;  %v1274_v41 = vld [vmem:[%s1655_s0 + $0x50] ss:$20 sps:$4 sm:$0xff]   ;;  %v1278_v44 = vld [vmem:[%s1654_s1 + $0x118] sm:$0xff]  }
   0xf   :  { %1046 = vmatpush3.bf16.msra.mxu0 %v1239_v7  ;;  %1225 = vmatpush3.bf16.msra.mxu1 %v1239_v7  ;;  %v1272_v36 = vld [vmem:[%s1655_s0 + $0x54] ss:$20 sps:$4 sm:$0xff]   ;;  %v1283_v46 = vld [vmem:[%s1655_s0 + $0x7c] ss:$20 sps:$4 sm:$0xff]   ;;  %v1294_v47 = vld [vmem:[%s1655_s0 + $0xc] ss:$20 sps:$4 sm:$0xff]  }
  0x10   :  { %1047 = vmatprep.subr.bf16.mxu0 %v1240_v8  ;;  %1218 = vmatprep.subr.bf16.mxu1 %v1240_v8  ;;  %v1281_v48 = vld [vmem:[%s1654_s1 + $0x90] sm:$0xff]   ;;  %v1286_v50 = vld [vmem:[%s1654_s1 + $0xc8] sm:$0xff]   ;;  %v1289_v54 = vld [vmem:[%s1654_s1 + $0xc0] sm:$0xff]  }
  0x11   :  { %v1282_v49 = vld [vmem:[%s1654_s1 + $0x110] sm:$0xff]   ;;  %v1285_v51 = vld [vmem:[%s1655_s0 + $0x78] ss:$20 sps:$4 sm:$0xff]   ;;  %v1290_v55 = vld [vmem:[%s1654_s1 + $0x80] sm:$0xff]  }
  0x12   :  { %v1287_v52 = vld [vmem:[%s1654_s1 + $0x88] sm:$0xff]   ;;  %v1291_v56 = vld [vmem:[%s1654_s1 + $0x100] sm:$0xff]   ;;  %v1300_v62 = vld [vmem:[%s1655_s0 + $0x5c] ss:$20 sps:$4 sm:$0xff]  }
  0x13   :  { %1048 = vmatpush3.bf16.msra.mxu0 %v1241_v9  ;;  %1226 = vmatpush3.bf16.msra.mxu1 %v1241_v9  ;;  %v1288_v53 = vld [vmem:[%s1654_s1 + $0x108] sm:$0xff]   ;;  %v1295_v58 = vld [vmem:[%s1655_s0 + $0x10] ss:$20 sps:$4 sm:$0xff]   ;;  %v1303_v0 = vld [vmem:[%s1655_s0 + $0x60] ss:$20 sps:$4 sm:$0xff]  }
  0x14   :  { %1049 = vmatprep.subr.bf16.mxu0 %v1242_v10  ;;  %1219 = vmatprep.subr.bf16.mxu1 %v1242_v10  ;;  %v1292_v57 = vld [vmem:[%s1655_s0 + $0x8] ss:$20 sps:$4 sm:$0xff]   ;;  %v1298_v60 = vld [vmem:[%s1655_s0 + $0x30] ss:$20 sps:$4 sm:$0xff]   ;;  %v1299_v61 = vld [vmem:[%s1655_s0 + $0x38] ss:$20 sps:$4 sm:$0xff]  }
  0x15   :  { %v1296_v59 = vld [vmem:[%s1655_s0 + $0x34] ss:$20 sps:$4 sm:$0xff]   ;;  %v1302_v63 = vld [vmem:[%s1655_s0 + $0x58] ss:$20 sps:$4 sm:$0xff]   ;;  %v1311_v6 = vld [vmem:[%s1655_s0 + $0xb0] ss:$20 sps:$4 sm:$0xff]  }
  0x16   :  { %v1304_v1 = vld [vmem:[%s1655_s0 + $0x84] ss:$20 sps:$4 sm:$0xff]   ;;  %v1306_v2 = vld [vmem:[%s1655_s0 + $0x80] ss:$20 sps:$4 sm:$0xff]   ;;  %v1307_v3 = vld [vmem:[%s1655_s0 + $0x88] ss:$20 sps:$4 sm:$0xff]  }
  0x17   :  { %1050 = vmatpush3.bf16.msra.mxu0 %v1243_v13  ;;  %1227 = vmatpush3.bf16.msra.mxu1 %v1243_v13  ;;  %v1308_v4 = vld [vmem:[%s1655_s0 + $0xac] ss:$20 sps:$4 sm:$0xff]   ;;  %v1310_v5 = vld [vmem:[%s1655_s0 + $0xa8] ss:$20 sps:$4 sm:$0xff]   ;;  %v1314_v9 = vld [vmem:[%s1655_s0 + $0xd0] ss:$20 sps:$4 sm:$0xff]  }
  0x18   :  { %1051 = vmatprep.subr.bf16.mxu0 %v1244_v14  ;;  %1220 = vmatprep.subr.bf16.mxu1 %v1244_v14  ;;  %v1312_v7 = vld [vmem:[%s1655_s0 + $0xd4] ss:$20 sps:$4 sm:$0xff]   ;;  %v52_v8 = vld [vmem:[%s1655_s0 + $0xf8] sm:$0xff]  ;;  %v1318_v13 = vld [vmem:[%s1655_s0 + $0x100] ss:$0 sps:$4 sm:$0xff]  }
  0x19   :  { %v1315_v10 = vld [vmem:[%s1655_s0 + $0xd8] ss:$20 sps:$4 sm:$0xff]   ;;  %v936_v11 = vcombine.high %v52_v8, %v52_v8  ;;  %v935_v12 = vcombine.low %v52_v8, %v52_v8 }
  0x1b   :  { %1052 = vmatpush3.bf16.msra.mxu0 %v1245_v15  ;;  %1228 = vmatpush3.bf16.msra.mxu1 %v1245_v15 }
  0x1c   :  { %1053 = vmatprep.subr.bf16.mxu0 %v1246_v16  ;;  %1221 = vmatprep.subr.bf16.mxu1 %v1246_v16 }
  0x1f   :  { %1054 = vmatpush3.bf16.msra.mxu0 %v1247_v17  ;;  %1229 = vmatpush3.bf16.msra.mxu1 %v1247_v17 }
  0x20   :  { %1097 = vmatprep.subr.bf16.mxu1 %v1254_v20  ;;  %1170 = vmatprep.subr.bf16.mxu0 %v1319_v24 }
  0x22   :  { %588 = vmatmul.mubr.bf16.vlgmr.msra.gmra.mxu0 %v1248_v18  ;;  %620 = vmatmul.mubr.bf16.vlgmr.msra.gmra.mxu1 %v1251_v19 }
  0x23   :  { %1098 = vmatpush3.bf16.msra.mxu1 %v1255_v21  ;;  %1171 = vmatpush3.bf16.msra.mxu0 %v1256_v22 }
  0x24   :  { %1099 = vmatprep.subr.bf16.mxu1 %v1257_v23  ;;  %1172 = vmatprep.subr.bf16.mxu0 %v1319_v24 }
  0x25   :  { %595 = vmatprep.mubr.bf16.mxu0 %v1260_v25  ;;  %627 = vmatprep.mubr.bf16.mxu1 %v1264_v26 }
  0x27   :  { %1100 = vmatpush3.bf16.msra.mxu1 %v1258_v27  ;;  %1173 = vmatpush3.bf16.msra.mxu0 %v1259_v28 }
  0x28   :  { %1101 = vmatprep.subr.bf16.mxu1 %v1263_v30  ;;  %1174 = vmatprep.subr.bf16.mxu0 %v1319_v24 }
  0x2a   :  { %596 = vmatmul.mubr.bf16.gmra.mxu0 %v1262_v29  ;;  %628 = vmatmul.mubr.bf16.gmra.mxu1 %v1268_v32 }
  0x2b   :  { %1102 = vmatpush3.bf16.msra.mxu1 %v1266_v31  ;;  %1175 = vmatpush3.bf16.msra.mxu0 %v1267_v34 }
  0x2c   :  { %1103 = vmatprep.subr.bf16.mxu1 %v1269_v35  ;;  %1176 = vmatprep.subr.bf16.mxu0 %v1319_v24 }
  0x2d   :  { %603 = vmatprep.mubr.bf16.mxu0 %v1272_v36  ;;  %635 = vmatprep.mubr.bf16.mxu1 %v934_v37 }
  0x2f   :  { %1104 = vmatpush3.bf16.msra.mxu1 %v1270_v38  ;;  %1177 = vmatpush3.bf16.msra.mxu0 %v1271_v39 }
  0x30   :  { %1105 = vmatprep.subr.bf16.mxu1 %v1275_v40  ;;  %1178 = vmatprep.subr.bf16.mxu0 %v1319_v24 }
  0x32   :  { %604 = vmatmul.mubr.bf16.gmra.mxu0 %v1274_v41  ;;  %636 = vmatmul.mubr.bf16.gmra.mxu1 %v933_v43 }
  0x33   :  { %1106 = vmatpush3.bf16.msra.mxu1 %v1277_v42  ;;  %1179 = vmatpush3.bf16.msra.mxu0 %v1278_v44 }
  0x34   :  { %1107 = vmatprep.subr.bf16.mxu1 %v1280_v45  ;;  %1180 = vmatprep.subr.bf16.mxu0 %v1319_v24 }
  0x35   :  { %611 = vmatprep.mubr.bf16.mxu0 %v1283_v46  ;;  %675 = vmatprep.mubr.bf16.mxu1 %v1294_v47  ;;  %v1607_v47 = vld [vmem:[%s1656_s2] ss:$0 sm:$0xff] }
  0x37   :  { %1108 = vmatpush3.bf16.msra.mxu1 %v1281_v48  ;;  %1181 = vmatpush3.bf16.msra.mxu0 %v1282_v49 }
  0x38   :  { %1109 = vmatprep.subr.bf16.mxu1 %v1286_v50  ;;  %1182 = vmatprep.subr.bf16.mxu0 %v1319_v24 }
  0x3a   :  { %612 = vmatmul.mubr.bf16.gmra.mxu0 %v1285_v51 }
  0x3b   :  { %1110 = vmatpush3.bf16.msra.mxu1 %v1287_v52  ;;  %1183 = vmatpush3.bf16.msra.mxu0 %v1288_v53 }
  0x3c   :  { %1111 = vmatprep.subr.bf16.mxu1 %v1289_v54  ;;  %1184 = vmatprep.subr.bf16.mxu0 %v1319_v24 }
  0x3d   :  { %1186 = vmatprep.mubr.msk.bf16.mxu0 %vm1320_vm0, %v1319_v24 }
  0x3f   :  { %1112 = vmatpush3.bf16.msra.mxu1 %v1290_v55  ;;  %1185 = vmatpush3.bf16.msra.mxu0 %v1291_v56 }
  0x42   :  { %676 = vmatmul.mubr.bf16.vlgmr.msra.gmra.mxu1 %v1292_v57  ;;  %1187 = vmatmul.mubr.bf16.vlgmr.msra.gmra.mxu0 %v1295_v58 }
  0x43   :  { %683 = vmatprep.mubr.bf16.mxu1 %v1296_v59  ;;  %1190 = vmatprep.mubr.msk.bf16.mxu0 %vm1320_vm0, %v1319_v24 }
  0x4a   :  { %684 = vmatmul.mubr.bf16.gmra.mxu1 %v1298_v60  ;;  %1191 = vmatmul.mubr.bf16.gmra.mxu0 %v1299_v61 }
  0x4b   :  { %691 = vmatprep.mubr.bf16.mxu1 %v1300_v62  ;;  %1194 = vmatprep.mubr.msk.bf16.mxu0 %vm1320_vm0, %v1319_v24 }
  0x52   :  { %692 = vmatmul.mubr.bf16.gmra.mxu1 %v1302_v63  ;;  %1195 = vmatmul.mubr.bf16.gmra.mxu0 %v1303_v0 }
  0x53   :  { %699 = vmatprep.mubr.bf16.mxu1 %v1304_v1  ;;  %1198 = vmatprep.mubr.msk.bf16.mxu0 %vm1320_vm0, %v1319_v24 }
  0x5a   :  { %700 = vmatmul.mubr.bf16.gmra.mxu1 %v1306_v2  ;;  %1199 = vmatmul.mubr.bf16.gmra.mxu0 %v1307_v3 }
  0x5b   :  { %707 = vmatprep.mubr.bf16.mxu1 %v1308_v4  ;;  %1202 = vmatprep.mubr.msk.bf16.mxu0 %vm1320_vm0, %v1319_v24 }
  0x62   :  { %708 = vmatmul.mubr.bf16.gmra.mxu1 %v1310_v5  ;;  %1203 = vmatmul.mubr.bf16.gmra.mxu0 %v1311_v6 }
  0x63   :  { %715 = vmatprep.mubr.bf16.mxu1 %v1312_v7  ;;  %1206 = vmatprep.mubr.msk.bf16.mxu0 %vm1320_vm0, %v1319_v24 }
  0x6a   :  { %716 = vmatmul.mubr.bf16.gmra.mxu1 %v1314_v9  ;;  %1207 = vmatmul.mubr.bf16.gmra.mxu0 %v1315_v10 }
  0x6b   :  { %723 = vmatprep.mubr.bf16.mxu1 %v936_v11  ;;  %1210 = vmatprep.mubr.msk.bf16.mxu0 %vm1320_vm0, %v1319_v24 }
  0x72   :  { %724 = vmatmul.mubr.bf16.gmra.mxu1 %v935_v12  ;;  %1211 = vmatmul.mubr.bf16.gmra.mxu0 %v1318_v13 }
  0xe2   :  { %v1055_v14 = vpop.f32.mrf.mxu0  ;;  %v1079_v15 = vpop.f32.mrf.mxu1 }
  0xe4   :  { %v1056_v16 = vpop.f32.mrf.mxu0  ;;  %v1080_v17 = vpop.f32.mrf.mxu1 }
  0xe5   :  { %v1582_v18 = vadd.f32 %v1080_v17, %v1079_v15  ;;  %v1057_v44 = vadd.f32 %v1056_v16, %v1055_v14 }
  0xe6   :  { %v1058_v19 = vpop.f32.mrf.mxu0  ;;  %v1584_v20 = vpop.f32.mrf.mxu1 }
  0xe7   :  { %v590_v50 = vadd.f32 %v1057_v44, %v1607_v47 }
  0xe8   :  { %v1059_v21 = vpop.f32.mrf.mxu0  ;;  %v1586_v22 = vpop.f32.mrf.mxu1 }
  0xe9   :  { %v1060_v51 = vadd.f32 %v1059_v21, %v1058_v19 }
  0xea   :  { %v1061_v23 = vpop.f32.mrf.mxu0  ;;  %v1085_v24 = vpop.f32.mrf.mxu1 }
  0xeb   :  { %v593_v58 = vadd.f32 %v1060_v51, %v1607_v47 }
  0xec   :  { %v1062_v25 = vpop.f32.mrf.mxu0  ;;  %v1086_v26 = vpop.f32.mrf.mxu1 }
  0xed   :  { %v1588_v27 = vadd.f32 %v1086_v26, %v1085_v24  ;;  %v1063_v59 = vadd.f32 %v1062_v25, %v1061_v23 }
  0xee   :  { %v1064_v28 = vpop.f32.mrf.mxu0  ;;  %v1590_v29 = vpop.f32.mrf.mxu1 }
  0xef   :  { %v598_v3 = vadd.f32 %v1063_v59, %v1607_v47 }
  0xf0   :  { %v1065_v30 = vpop.f32.mrf.mxu0  ;;  %v1592_v31 = vpop.f32.mrf.mxu1 }
  0xf1   :  { %v1066_v4 = vadd.f32 %v1065_v30, %v1064_v28 }
  0xf2   :  { %v1067_v32 = vpop.f32.mrf.mxu0  ;;  %v1594_v33 = vpop.f32.mrf.mxu1 }
  0xf3   :  { %v601_v14 = vadd.f32 %v1066_v4, %v1607_v47 }
  0xf4   :  { %v1068_v34 = vpop.f32.mrf.mxu0  ;;  %v1596_v35 = vpop.f32.mrf.mxu1 }
  0xf5   :  { %v1069_v15 = vadd.f32 %v1068_v34, %v1067_v32 }
  0xf6   :  { %v1070_v36 = vpop.f32.mrf.mxu0  ;;  %v1094_v37 = vpop.f32.mrf.mxu1 }
  0xf7   :  { %v606_v28 = vadd.f32 %v1069_v15, %v1607_v47 }
  0xf8   :  { %v1071_v38 = vpop.f32.mrf.mxu0  ;;  %v1095_v39 = vpop.f32.mrf.mxu1 }
  0xf9   :  { %v1072_v30 = vadd.f32 %v1071_v38, %v1070_v36 }
  0xfa   :  { %v1598_v40 = vpop.f32.mrf.mxu0 }
  0xfc   :  { %v1074_v41 = vpop.f32.mrf.mxu0 }
  0xfd   :  { %v1075_v51 = vadd.f32 %v1074_v41, %v1598_v40 }
  0xfe   :  { %v1600_v42 = vpop.f32.mrf.mxu0 }
 0x100   :  { %v1602_v43 = vpop.f32.mrf.mxu0 }
 0x101   :  { %v1078_v59 = vadd.f32 %v1602_v43, %v1600_v42 }
 0x102   :  { %v1113_v45 = vpop.f32.mrf.mxu1  ;;  %v765_v46 = vpop.f32.mrf.mxu0 }
 0x104   :  { %v1114_v48 = vpop.f32.mrf.mxu1  ;;  %v1188_v49 = vpop.f32.mrf.mxu0 }
 0x105   :  { %v1115_v52 = vadd.f32 %v1114_v48, %v1113_v45 }
 0x106   :  { %v1116_v53 = vpop.f32.mrf.mxu1  ;;  %v768_v54 = vpop.f32.mrf.mxu0 }
 0x107   :  { %v678_v55 = vadd.f32 %v1115_v52, %v590_v50  ;;  %v609_v50 = vadd.f32 %v1072_v30, %v1607_v47 }
 0x108   :  { %v1117_v56 = vpop.f32.mrf.mxu1  ;;  %v1189_v57 = vpop.f32.mrf.mxu0 }
 0x109   :  { %v1118_v60 = vadd.f32 %v1117_v56, %v1116_v53  ;;  %v766_v63 = vadd.f32 %v765_v46, %v678_v55 }
 0x10a   :  { %v1119_v61 = vpop.f32.mrf.mxu1  ;;  %v773_v62 = vpop.f32.mrf.mxu0 }
 0x10b   :  { %v681_v0 = vadd.f32 %v1118_v60, %v593_v58  ;;  %v819_v9 = vmax.f32 %v766_v63, 0.0  ;;  %v614_v58 = vadd.f32 %v1075_v51, %v1607_v47 }
 0x10c   :  { %v1120_v1 = vpop.f32.mrf.mxu1  ;;  %v1192_v2 = vpop.f32.mrf.mxu0 }
 0x10d   :  { %v769_v5 = vadd.f32 %v768_v54, %v681_v0  ;;  %v1121_v6 = vadd.f32 %v1120_v1, %v1119_v61 }
 0x10e   :  { %v1122_v7 = vpop.f32.mrf.mxu1  ;;  %v776_v8 = vpop.f32.mrf.mxu0 }
 0x10f   :  { %v820_v10 = vmax.f32 %v769_v5, 0.0  ;;  %v686_v11 = vadd.f32 %v1121_v6, %v598_v3  ;;  %v617_v3 = vadd.f32 %v1078_v59, %v1607_v47 }
 0x110   :  { %v1123_v12 = vpop.f32.mrf.mxu1  ;;  %v1193_v13 = vpop.f32.mrf.mxu0 }
 0x111   :  { %v1007_v16 = vpack.c.bf16 %v820_v10, %v819_v9  ;;  %v1124_v17 = vadd.f32 %v1123_v12, %v1122_v7  ;;  %v774_v23 = vadd.f32 %v773_v62, %v686_v11  ;;  %v622_v10 = vadd.f32 %v1582_v18, %v1607_v47 }
 0x112   :  { %v1125_v19 = vpop.f32.mrf.mxu1  ;;  %v781_v21 = vpop.f32.mrf.mxu0  ;;  %v1084_v11 = vadd.f32 %v1586_v22, %v1584_v20 }
 0x113   :  { %1008 = vst [vmem:[%s1657_s3] sm:$0xff] %v1007_v16   ;;  %v689_v24 = vadd.f32 %v1124_v17, %v601_v14  ;;  %v821_v32 = vmax.f32 %v774_v23, 0.0 }
 0x114   :  { %v1126_v25 = vpop.f32.mrf.mxu1  ;;  %v1196_v26 = vpop.f32.mrf.mxu0 }
 0x115   :  { %v777_v37 = vadd.f32 %v776_v8, %v689_v24  ;;  %v1127_v39 = vadd.f32 %v1126_v25, %v1125_v19  ;;  %v625_v24 = vadd.f32 %v1084_v11, %v1607_v47 }
 0x116   :  { %v1128_v44 = vpop.f32.mrf.mxu1  ;;  %v784_v45 = vpop.f32.mrf.mxu0 }
 0x117   :  { %v822_v34 = vmax.f32 %v777_v37, 0.0  ;;  %v694_v46 = vadd.f32 %v1127_v39, %v606_v28  ;;  %v630_v39 = vadd.f32 %v1588_v27, %v1607_v47 }
 0x118   :  { %v1129_v48 = vpop.f32.mrf.mxu1  ;;  %v1197_v49 = vpop.f32.mrf.mxu0 }
 0x119   :  { %v1012_v52 = vpack.c.bf16 %v822_v34, %v821_v32  ;;  %v1130_v53 = vadd.f32 %v1129_v48, %v1128_v44  ;;  %v782_v36 = vadd.f32 %v781_v21, %v694_v46  ;;  %v1090_v44 = vadd.f32 %v1592_v31, %v1590_v29 }
 0x11a   :  { %v1131_v54 = vpop.f32.mrf.mxu1  ;;  %v789_v55 = vpop.f32.mrf.mxu0 }
 0x11b   :  { %1034 = vst [vmem:[%s1657_s3 + $0x8] sm:$0xff] %v1012_v52   ;;  %v697_v38 = vadd.f32 %v1130_v53, %v609_v50  ;;  %v823_v62 = vmax.f32 %v782_v36, 0.0  ;;  %v633_v53 = vadd.f32 %v1090_v44, %v1607_v47 }
 0x11c   :  { %v1132_v56 = vpop.f32.mrf.mxu1  ;;  %v1200_v57 = vpop.f32.mrf.mxu0 }
 0x11d   :  { %v785_v60 = vadd.f32 %v784_v45, %v697_v38  ;;  %v1133_v61 = vadd.f32 %v1132_v56, %v1131_v54  ;;  %v1093_v54 = vadd.f32 %v1596_v35, %v1594_v33 }
 0x11e   :  { %v1134_v40 = vpop.f32.mrf.mxu1  ;;  %v792_v41 = vpop.f32.mrf.mxu0 }
 0x11f   :  { %v824_v63 = vmax.f32 %v785_v60, 0.0  ;;  %v702_v0 = vadd.f32 %v1133_v61, %v614_v58  ;;  %v638_v58 = vadd.f32 %v1093_v54, %v1607_v47 }
 0x120   :  { %v1135_v1 = vpop.f32.mrf.mxu1  ;;  %v1201_v2 = vpop.f32.mrf.mxu0 }
 0x121   :  { %v1017_v4 = vpack.c.bf16 %v824_v63, %v823_v62  ;;  %v1136_v5 = vadd.f32 %v1135_v1, %v1134_v40  ;;  %v790_v42 = vadd.f32 %v789_v55, %v702_v0 }
 0x122   :  { %v1137_v6 = vpop.f32.mrf.mxu1  ;;  %v797_v7 = vpop.f32.mrf.mxu0 }
 0x123   :  { %1035 = vst [vmem:[%s1657_s3 + $0x10] sm:$0xff] %v1017_v4   ;;  %v705_v43 = vadd.f32 %v1136_v5, %v617_v3  ;;  %v825_v16 = vmax.f32 %v790_v42, 0.0 }
 0x124   :  { %v1138_v8 = vpop.f32.mrf.mxu1  ;;  %v1204_v9 = vpop.f32.mrf.mxu0 }
 0x125   :  { %v793_v12 = vadd.f32 %v792_v41, %v705_v43  ;;  %v1139_v13 = vadd.f32 %v1138_v8, %v1137_v6 }
 0x126   :  { %v1140_v14 = vpop.f32.mrf.mxu1  ;;  %v800_v15 = vpop.f32.mrf.mxu0 }
 0x127   :  { %v826_v17 = vmax.f32 %v793_v12, 0.0  ;;  %v710_v19 = vadd.f32 %v1139_v13, %v622_v10 }
 0x128   :  { %v1141_v21 = vpop.f32.mrf.mxu1  ;;  %v1205_v23 = vpop.f32.mrf.mxu0 }
 0x129   :  { %v1022_v25 = vpack.c.bf16 %v826_v17, %v825_v16  ;;  %v1142_v26 = vadd.f32 %v1141_v21, %v1140_v14  ;;  %v798_v18 = vadd.f32 %v797_v7, %v710_v19 }
 0x12a   :  { %v1143_v28 = vpop.f32.mrf.mxu1  ;;  %v805_v30 = vpop.f32.mrf.mxu0 }
 0x12b   :  { %1036 = vst [vmem:[%s1657_s3 + $0x18] sm:$0xff] %v1022_v25   ;;  %v713_v20 = vadd.f32 %v1142_v26, %v625_v24  ;;  %v827_v48 = vmax.f32 %v798_v18, 0.0 }
 0x12c   :  { %v1144_v22 = vpop.f32.mrf.mxu1  ;;  %v1208_v37 = vpop.f32.mrf.mxu0 }
 0x12d   :  { %v801_v45 = vadd.f32 %v800_v15, %v713_v20  ;;  %v1145_v32 = vadd.f32 %v1144_v22, %v1143_v28 }
 0x12e   :  { %v1146_v34 = vpop.f32.mrf.mxu1  ;;  %v808_v46 = vpop.f32.mrf.mxu0 }
 0x12f   :  { %v828_v49 = vmax.f32 %v801_v45, 0.0  ;;  %v718_v50 = vadd.f32 %v1145_v32, %v630_v39 }
 0x130   :  { %v1147_v51 = vpop.f32.mrf.mxu1  ;;  %v1209_v52 = vpop.f32.mrf.mxu0 }
 0x131   :  { %v1027_v55 = vpack.c.bf16 %v828_v49, %v827_v48  ;;  %v1148_v36 = vadd.f32 %v1147_v51, %v1146_v34  ;;  %v806_v29 = vadd.f32 %v805_v30, %v718_v50 }
 0x132   :  { %v1149_v27 = vpop.f32.mrf.mxu1  ;;  %v813_v38 = vpop.f32.mrf.mxu0 }
 0x133   :  { %1037 = vst [vmem:[%s1657_s3 + $0x20] sm:$0xff] %v1027_v55   ;;  %v721_v31 = vadd.f32 %v1148_v36, %v633_v53  ;;  %v829_v41 = vmax.f32 %v806_v29, 0.0 }
 0x134   :  { %v1150_v56 = vpop.f32.mrf.mxu1  ;;  %v1212_v57 = vpop.f32.mrf.mxu0 }
 0x135   :  { %v809_v59 = vadd.f32 %v808_v46, %v721_v31  ;;  %v1151_v60 = vadd.f32 %v1150_v56, %v1149_v27 }
 0x136   :  { %v1152_v61 = vpop.f32.mrf.mxu1  ;;  %v816_v40 = vpop.f32.mrf.mxu0 }
 0x137   :  { %v830_v33 = vmax.f32 %v809_v59, 0.0  ;;  %v726_v35 = vadd.f32 %v1151_v60, %v638_v58 }
 0x138   :  { %v1153_v62 = vpop.f32.mrf.mxu1  ;;  %v1213_v63 = vpop.f32.mrf.mxu0 }
 0x139   :  { %v1032_v0 = vpack.c.bf16 %v830_v33, %v829_v41  ;;  %v814_v1 = vadd.f32 %v813_v38, %v726_v35 }
 0x13b   :  { %1038 = vst [vmem:[%s1657_s3 + $0x28] sm:$0xff] %v1032_v0   ;;  %v831_v2 = vmax.f32 %v814_v1, 0.0 }
 0x13d   :  { %v1003_v3 = vpack.c.bf16 %v831_v2, %v831_v2 }
 0x13f   :  { %897 = vst [vmem:[%s1657_s3 + $0x30] sm:$0xf] %v1003_v3 }

// kernel: nature_cnn_forward.7
= control target key start
LH: loop header
LB: loop body
LE: loop exit
PB: predicated region body
PF: predicated region fallthrough
CT: control target
= control target key end

     0   :  { %vm3178_vm0 = vmmov 0   ;;  %s3901_s1 = inlined_call_operand.vmem [shape: bf16[3200,128], index: 1, kind: input, shape index: {}]   ;;  %s3902_s0 = inlined_call_operand.vmem [shape: bf16[8,3200], index: 0, kind: input, shape index: {}]   ;;  %s3903_s2 = inlined_call_operand.vmem [shape: f32[1,128], index: 2, kind: input, shape index: {}]   ;;  %s3904_s3 = inlined_call_operand.vmem [shape: bf16[128,128], index: 3, kind: input, shape index: {}]   ;;  %s3905_s4 = inlined_call_operand.vmem [shape: f32[1,128], index: 4, kind: input, shape index: {}]   ;;  %s3906_s5 = inlined_call_operand.vmem [shape: f32[8,128], index: 5, kind: output, shape index: {}]  }
   0x1   :  { %v2940_v0 = vld [vmem:[%s3901_s1 + $0x78] sm:$0xff]   ;;  %v2944_v4 = vld [vmem:[%s3901_s1 + $0x70] sm:$0xff]   ;;  %v2948_v8 = vld [vmem:[%s3901_s1 + $0x68] sm:$0xff]  }
   0x2   :  { %v2941_v1 = vld [vmem:[%s3901_s1 + $0x38] sm:$0xff]   ;;  %2616 = vmatprep.subr.bf16.mxu0 %v2940_v0  ;;  %v2945_v5 = vld [vmem:[%s3901_s1 + $0x30] sm:$0xff]   ;;  %v2949_v9 = vld [vmem:[%s3901_s1 + $0x28] sm:$0xff]  }
   0x3   :  { %v2942_v2 = vld [vmem:[%s3901_s1 + $0xf8] sm:$0xff]   ;;  %2617 = vmatpush3.bf16.msra.mxu0 %v2941_v1  ;;  %v2946_v6 = vld [vmem:[%s3901_s1 + $0xf0] sm:$0xff]   ;;  %v2950_v10 = vld [vmem:[%s3901_s1 + $0xe8] sm:$0xff]  }
   0x4   :  { %v2943_v3 = vld [vmem:[%s3901_s1 + $0xb8] sm:$0xff]   ;;  %2638 = vmatprep.subr.bf16.mxu1 %v2942_v2  ;;  %2618 = vmatprep.subr.bf16.mxu0 %v2944_v4  ;;  %v2947_v7 = vld [vmem:[%s3901_s1 + $0xb0] sm:$0xff]   ;;  %v2951_v11 = vld [vmem:[%s3901_s1 + $0xa8] sm:$0xff]  }
   0x5   :  { %2639 = vmatpush3.bf16.msra.mxu1 %v2943_v3  ;;  %v2952_v12 = vld [vmem:[%s3901_s1 + $0x60] sm:$0xff]   ;;  %v2956_v16 = vld [vmem:[%s3901_s1 + $0x58] sm:$0xff]   ;;  %v2960_v20 = vld [vmem:[%s3901_s1 + $0x50] sm:$0xff]  }
   0x6   :  { %2640 = vmatprep.subr.bf16.mxu1 %v2946_v6  ;;  %v2953_v13 = vld [vmem:[%s3901_s1 + $0x20] sm:$0xff]   ;;  %v2957_v17 = vld [vmem:[%s3901_s1 + $0x18] sm:$0xff]   ;;  %v2961_v21 = vld [vmem:[%s3901_s1 + $0x10] sm:$0xff]  }
   0x7   :  { %2619 = vmatpush3.bf16.msra.mxu0 %v2945_v5  ;;  %v2954_v14 = vld [vmem:[%s3901_s1 + $0xe0] sm:$0xff]   ;;  %v2958_v18 = vld [vmem:[%s3901_s1 + $0xd8] sm:$0xff]   ;;  %v2962_v22 = vld [vmem:[%s3901_s1 + $0xd0] sm:$0xff]  }
   0x8   :  { %2620 = vmatprep.subr.bf16.mxu0 %v2948_v8  ;;  %v2955_v15 = vld [vmem:[%s3901_s1 + $0xa0] sm:$0xff]   ;;  %v2959_v19 = vld [vmem:[%s3901_s1 + $0x98] sm:$0xff]   ;;  %v2963_v23 = vld [vmem:[%s3901_s1 + $0x90] sm:$0xff]  }
   0x9   :  { %2641 = vmatpush3.bf16.msra.mxu1 %v2947_v7  ;;  %v2964_v24 = vld [vmem:[%s3901_s1 + $0x48] sm:$0xff]   ;;  %v2968_v28 = vld [vmem:[%s3901_s1 + $0x40] sm:$0xff]   ;;  %v2974_v35 = vld [vmem:[%s3901_s1 + $0x178] sm:$0xff]  }
   0xa   :  { %2642 = vmatprep.subr.bf16.mxu1 %v2950_v10  ;;  %v2965_v25 = vld [vmem:[%s3901_s1 + $0x8] sm:$0xff]   ;;  %v2969_v29 = vld [vmem:[%s3901_s1] sm:$0xff]   ;;  %v2977_v39 = vld [vmem:[%s3901_s1 + $0x138] sm:$0xff]  }
   0xb   :  { %2621 = vmatpush3.bf16.msra.mxu0 %v2949_v9  ;;  %v2966_v26 = vld [vmem:[%s3901_s1 + $0xc8] sm:$0xff]   ;;  %v2970_v30 = vld [vmem:[%s3901_s1 + $0xc0] sm:$0xff]   ;;  %v2978_v40 = vld [vmem:[%s3901_s1 + $0x1f8] sm:$0xff]  }
   0xc   :  { %2622 = vmatprep.subr.bf16.mxu0 %v2952_v12  ;;  %v2967_v27 = vld [vmem:[%s3901_s1 + $0x88] sm:$0xff]   ;;  %v21_v31 = vld [vmem:[%s3902_s0] sm:$0xff]  ;;  %v2979_v41 = vld [vmem:[%s3901_s1 + $0x1b8] sm:$0xff]  }
   0xd   :  { %2643 = vmatpush3.bf16.msra.mxu1 %v2951_v11  ;;  %v2382_v32 = vcombine.low %v21_v31, %v21_v31  ;;  %v2383_v33 = vcombine.high %v21_v31, %v21_v31  ;;  %v2973_v34 = vld [vmem:[%s3901_s1 + $0x80] sm:$0xff]   ;;  %v22_v36 = vld [vmem:[%s3902_s0 + $0x8] sm:$0xff]  ;;  %v2980_v42 = vld [vmem:[%s3901_s1 + $0x170] sm:$0xff]  }
   0xe   :  { %2644 = vmatprep.subr.bf16.mxu1 %v2954_v14  ;;  %v2384_v37 = vcombine.low %v22_v36, %v22_v36  ;;  %v2385_v38 = vcombine.high %v22_v36, %v22_v36  ;;  %v2981_v43 = vld [vmem:[%s3901_s1 + $0x130] sm:$0xff]   ;;  %v2984_v46 = vld [vmem:[%s3901_s1 + $0x168] sm:$0xff]   ;;  %v2988_v50 = vld [vmem:[%s3901_s1 + $0x160] sm:$0xff]  }
   0xf   :  { %2623 = vmatpush3.bf16.msra.mxu0 %v2953_v13  ;;  %1761 = vmatprep.mubr.bf16.mxu0 %v2383_v33  ;;  %v2982_v44 = vld [vmem:[%s3901_s1 + $0x1f0] sm:$0xff]   ;;  %v2985_v47 = vld [vmem:[%s3901_s1 + $0x128] sm:$0xff]   ;;  %v2989_v51 = vld [vmem:[%s3901_s1 + $0x120] sm:$0xff]  }
  0x10   :  { %2624 = vmatprep.subr.bf16.mxu0 %v2956_v16  ;;  %1801 = vmatprep.mubr.bf16.mxu1 %v2385_v38  ;;  %v2983_v45 = vld [vmem:[%s3901_s1 + $0x1b0] sm:$0xff]   ;;  %v2986_v48 = vld [vmem:[%s3901_s1 + $0x1e8] sm:$0xff]   ;;  %v2990_v52 = vld [vmem:[%s3901_s1 + $0x1e0] sm:$0xff]  }
  0x11   :  { %2645 = vmatpush3.bf16.msra.mxu1 %v2955_v15  ;;  %v2987_v49 = vld [vmem:[%s3901_s1 + $0x1a8] sm:$0xff]   ;;  %v2991_v53 = vld [vmem:[%s3901_s1 + $0x1a0] sm:$0xff]   ;;  %v2992_v54 = vld [vmem:[%s3901_s1 + $0x158] sm:$0xff]  }
  0x12   :  { %2646 = vmatprep.subr.bf16.mxu1 %v2958_v18  ;;  %v2993_v55 = vld [vmem:[%s3901_s1 + $0x118] sm:$0xff]   ;;  %v2996_v58 = vld [vmem:[%s3901_s1 + $0x150] sm:$0xff]   ;;  %v3000_v62 = vld [vmem:[%s3901_s1 + $0x148] sm:$0xff]  }
  0x13   :  { %2625 = vmatpush3.bf16.msra.mxu0 %v2957_v17  ;;  %v2994_v56 = vld [vmem:[%s3901_s1 + $0x1d8] sm:$0xff]   ;;  %v2997_v59 = vld [vmem:[%s3901_s1 + $0x110] sm:$0xff]   ;;  %v3001_v63 = vld [vmem:[%s3901_s1 + $0x108] sm:$0xff]  }
  0x14   :  { %2626 = vmatprep.subr.bf16.mxu0 %v2960_v20  ;;  %v2995_v57 = vld [vmem:[%s3901_s1 + $0x198] sm:$0xff]   ;;  %v2998_v60 = vld [vmem:[%s3901_s1 + $0x1d0] sm:$0xff]   ;;  %v3002_v0 = vld [vmem:[%s3901_s1 + $0x1c8] sm:$0xff]  }
  0x15   :  { %2647 = vmatpush3.bf16.msra.mxu1 %v2959_v19  ;;  %v2999_v61 = vld [vmem:[%s3901_s1 + $0x190] sm:$0xff]   ;;  %v3003_v1 = vld [vmem:[%s3901_s1 + $0x188] sm:$0xff]   ;;  %v3004_v2 = vld [vmem:[%s3901_s1 + $0x140] sm:$0xff]  }
  0x16   :  { %2648 = vmatprep.subr.bf16.mxu1 %v2962_v22  ;;  %v3005_v3 = vld [vmem:[%s3901_s1 + $0x100] sm:$0xff]   ;;  %v23_v5 = vld [vmem:[%s3902_s0 + $0x10] sm:$0xff]  ;;  %v3010_v9 = vld [vmem:[%s3901_s1 + $0x278] sm:$0xff]  }
  0x17   :  { %2627 = vmatpush3.bf16.msra.mxu0 %v2961_v21  ;;  %v3006_v4 = vld [vmem:[%s3901_s1 + $0x1c0] sm:$0xff]   ;;  %v2386_v6 = vcombine.low %v23_v5, %v23_v5  ;;  %v2387_v7 = vcombine.high %v23_v5, %v23_v5  ;;  %v24_v10 = vld [vmem:[%s3902_s0 + $0x18] sm:$0xff]  ;;  %v3016_v16 = vld [vmem:[%s3901_s1 + $0x270] sm:$0xff]  }
  0x18   :  { %2628 = vmatprep.subr.bf16.mxu0 %v2964_v24  ;;  %v3009_v8 = vld [vmem:[%s3901_s1 + $0x180] sm:$0xff]   ;;  %v2388_v11 = vcombine.low %v24_v10, %v24_v10  ;;  %v2389_v12 = vcombine.high %v24_v10, %v24_v10  ;;  %v3013_v13 = vld [vmem:[%s3901_s1 + $0x238] sm:$0xff]   ;;  %v3017_v17 = vld [vmem:[%s3901_s1 + $0x230] sm:$0xff]  }
  0x19   :  { %2649 = vmatpush3.bf16.msra.mxu1 %v2963_v23  ;;  %v3014_v14 = vld [vmem:[%s3901_s1 + $0x2f8] sm:$0xff]   ;;  %v3018_v18 = vld [vmem:[%s3901_s1 + $0x2f0] sm:$0xff]   ;;  %v3020_v20 = vld [vmem:[%s3901_s1 + $0x268] sm:$0xff]  }
  0x1a   :  { %2650 = vmatprep.subr.bf16.mxu1 %v2966_v26  ;;  %v3015_v15 = vld [vmem:[%s3901_s1 + $0x2b8] sm:$0xff]   ;;  %v3019_v19 = vld [vmem:[%s3901_s1 + $0x2b0] sm:$0xff]   ;;  %v3021_v21 = vld [vmem:[%s3901_s1 + $0x228] sm:$0xff]  }
  0x1b   :  { %2629 = vmatpush3.bf16.msra.mxu0 %v2965_v25  ;;  %v3022_v22 = vld [vmem:[%s3901_s1 + $0x2e8] sm:$0xff]   ;;  %v3024_v24 = vld [vmem:[%s3901_s1 + $0x260] sm:$0xff]   ;;  %v3031_v31 = vld [vmem:[%s3901_s1 + $0x298] sm:$0xff]  }
  0x1c   :  { %2630 = vmatprep.subr.bf16.mxu0 %v2968_v28  ;;  %v3023_v23 = vld [vmem:[%s3901_s1 + $0x2a8] sm:$0xff]   ;;  %v3025_v25 = vld [vmem:[%s3901_s1 + $0x220] sm:$0xff]   ;;  %v3028_v28 = vld [vmem:[%s3901_s1 + $0x258] sm:$0xff]  }
  0x1d   :  { %2651 = vmatpush3.bf16.msra.mxu1 %v2967_v27  ;;  %v3026_v26 = vld [vmem:[%s3901_s1 + $0x2e0] sm:$0xff]   ;;  %v3033_v33 = vld [vmem:[%s3901_s1 + $0x210] sm:$0xff]   ;;  %v3036_v36 = vld [vmem:[%s3901_s1 + $0x248] sm:$0xff]  }
  0x1e   :  { %2652 = vmatprep.subr.bf16.mxu1 %v2970_v30  ;;  %v3027_v27 = vld [vmem:[%s3901_s1 + $0x2a0] sm:$0xff]   ;;  %v3030_v30 = vld [vmem:[%s3901_s1 + $0x2d8] sm:$0xff]   ;;  %v3038_v38 = vld [vmem:[%s3901_s1 + $0x2c8] sm:$0xff]  }
  0x1f   :  { %2631 = vmatpush3.bf16.msra.mxu0 %v2969_v29  ;;  %v3029_v29 = vld [vmem:[%s3901_s1 + $0x218] sm:$0xff]   ;;  %v3072_v10 = vld [vmem:[%s3901_s1 + $0x348] sm:$0xff]  }
  0x20   :  { %2660 = vmatprep.subr.bf16.mxu0 %v2974_v35  ;;  %v3035_v35 = vld [vmem:[%s3901_s1 + $0x290] sm:$0xff]   ;;  %v3067_v5 = vld [vmem:[%s3901_s1 + $0x398] sm:$0xff]  }
  0x21   :  { %2653 = vmatpush3.bf16.msra.mxu1 %v2973_v34  ;;  %v3034_v34 = vld [vmem:[%s3901_s1 + $0x2d0] sm:$0xff]  }
  0x22   :  { %1762 = vmatmul.mubr.bf16.vlgmr.msra.gmra.mxu0 %v2382_v32  ;;  %2682 = vmatprep.subr.bf16.mxu1 %v2978_v40  ;;  %v3032_v32 = vld [vmem:[%s3901_s1 + $0x250] sm:$0xff]   ;;  %v3040_v40 = vld [vmem:[%s3901_s1 + $0x240] sm:$0xff]  }
  0x23   :  { %2661 = vmatpush3.bf16.msra.mxu0 %v2977_v39  ;;  %1841 = vmatprep.mubr.bf16.mxu0 %v2387_v7  ;;  %v3039_v39 = vld [vmem:[%s3901_s1 + $0x288] sm:$0xff]   ;;  %v3069_v7 = vld [vmem:[%s3901_s1 + $0x310] sm:$0xff]  }
  0x24   :  { %1802 = vmatmul.mubr.bf16.vlgmr.msra.gmra.mxu1 %v2384_v37  ;;  %2662 = vmatprep.subr.bf16.mxu0 %v2980_v42  ;;  %v3037_v37 = vld [vmem:[%s3901_s1 + $0x208] sm:$0xff]   ;;  %v3042_v42 = vld [vmem:[%s3901_s1 + $0x2c0] sm:$0xff]  }
  0x25   :  { %2683 = vmatpush3.bf16.msra.mxu1 %v2979_v41  ;;  %1881 = vmatprep.mubr.bf16.mxu1 %v2389_v12  ;;  %v3041_v41 = vld [vmem:[%s3901_s1 + $0x200] sm:$0xff]   ;;  %v3074_v12 = vld [vmem:[%s3901_s1 + $0x3c8] sm:$0xff]  }
  0x26   :  { %2684 = vmatprep.subr.bf16.mxu1 %v2982_v44 }
  0x27   :  { %2663 = vmatpush3.bf16.msra.mxu0 %v2981_v43  ;;  %v25_v43 = vld [vmem:[%s3902_s0 + $0x20] sm:$0xff] }
  0x28   :  { %2664 = vmatprep.subr.bf16.mxu0 %v2984_v46  ;;  %v2390_v44 = vcombine.low %v25_v43, %v25_v43  ;;  %v3045_v46 = vld [vmem:[%s3901_s1 + $0x280] sm:$0xff]  }
  0x29   :  { %2685 = vmatpush3.bf16.msra.mxu1 %v2983_v45  ;;  %v2391_v45 = vcombine.high %v25_v43, %v25_v43  ;;  %v3103_v43 = vld [vmem:[%s3901_s1 + $0x498] sm:$0xff]  }
  0x2a   :  { %2686 = vmatprep.subr.bf16.mxu1 %v2986_v48  ;;  %v26_v48 = vld [vmem:[%s3902_s0 + $0x28] sm:$0xff] }
  0x2b   :  { %2665 = vmatpush3.bf16.msra.mxu0 %v2985_v47  ;;  %v3046_v47 = vld [vmem:[%s3901_s1 + $0x378] sm:$0xff]  }
  0x2c   :  { %2666 = vmatprep.subr.bf16.mxu0 %v2988_v50  ;;  %v2393_v50 = vcombine.high %v26_v48, %v26_v48 }
  0x2d   :  { %2687 = vmatpush3.bf16.msra.mxu1 %v2987_v49  ;;  %v2392_v49 = vcombine.low %v26_v48, %v26_v48  ;;  %v3108_v48 = vld [vmem:[%s3901_s1 + $0x448] sm:$0xff]  }
  0x2e   :  { %2688 = vmatprep.subr.bf16.mxu1 %v2990_v52  ;;  %v3050_v52 = vld [vmem:[%s3901_s1 + $0x3f8] sm:$0xff]  }
  0x2f   :  { %2667 = vmatpush3.bf16.msra.mxu0 %v2989_v51  ;;  %v3049_v51 = vld [vmem:[%s3901_s1 + $0x338] sm:$0xff]  }
  0x30   :  { %2668 = vmatprep.subr.bf16.mxu0 %v2992_v54  ;;  %v3052_v54 = vld [vmem:[%s3901_s1 + $0x370] sm:$0xff]  }
  0x31   :  { %2689 = vmatpush3.bf16.msra.mxu1 %v2991_v53  ;;  %v3051_v53 = vld [vmem:[%s3901_s1 + $0x3b8] sm:$0xff]  }
  0x32   :  { %2690 = vmatprep.subr.bf16.mxu1 %v2994_v56  ;;  %v3054_v56 = vld [vmem:[%s3901_s1 + $0x3f0] sm:$0xff]  }
  0x33   :  { %2669 = vmatpush3.bf16.msra.mxu0 %v2993_v55  ;;  %v3053_v55 = vld [vmem:[%s3901_s1 + $0x330] sm:$0xff]  }
  0x34   :  { %2670 = vmatprep.subr.bf16.mxu0 %v2996_v58  ;;  %v3056_v58 = vld [vmem:[%s3901_s1 + $0x368] sm:$0xff]  }
  0x35   :  { %2691 = vmatpush3.bf16.msra.mxu1 %v2995_v57  ;;  %v3055_v57 = vld [vmem:[%s3901_s1 + $0x3b0] sm:$0xff]  }
  0x36   :  { %2692 = vmatprep.subr.bf16.mxu1 %v2998_v60  ;;  %v3058_v60 = vld [vmem:[%s3901_s1 + $0x3e8] sm:$0xff]  }
  0x37   :  { %2671 = vmatpush3.bf16.msra.mxu0 %v2997_v59  ;;  %v3057_v59 = vld [vmem:[%s3901_s1 + $0x328] sm:$0xff]  }
  0x38   :  { %2672 = vmatprep.subr.bf16.mxu0 %v3000_v62  ;;  %v3060_v62 = vld [vmem:[%s3901_s1 + $0x360] sm:$0xff]  }
  0x39   :  { %2693 = vmatpush3.bf16.msra.mxu1 %v2999_v61  ;;  %v3059_v61 = vld [vmem:[%s3901_s1 + $0x3a8] sm:$0xff]  }
  0x3a   :  { %2694 = vmatprep.subr.bf16.mxu1 %v3002_v0  ;;  %v3062_v0 = vld [vmem:[%s3901_s1 + $0x3e0] sm:$0xff]  }
  0x3b   :  { %2673 = vmatpush3.bf16.msra.mxu0 %v3001_v63  ;;  %v3061_v63 = vld [vmem:[%s3901_s1 + $0x320] sm:$0xff]  }
  0x3c   :  { %2674 = vmatprep.subr.bf16.mxu0 %v3004_v2  ;;  %v3064_v2 = vld [vmem:[%s3901_s1 + $0x358] sm:$0xff]  }
  0x3d   :  { %2695 = vmatpush3.bf16.msra.mxu1 %v3003_v1  ;;  %v3063_v1 = vld [vmem:[%s3901_s1 + $0x3a0] sm:$0xff]  }
  0x3e   :  { %2696 = vmatprep.subr.bf16.mxu1 %v3006_v4  ;;  %v3066_v4 = vld [vmem:[%s3901_s1 + $0x3d8] sm:$0xff]  }
  0x3f   :  { %2675 = vmatpush3.bf16.msra.mxu0 %v3005_v3  ;;  %v3065_v3 = vld [vmem:[%s3901_s1 + $0x318] sm:$0xff]  }
  0x40   :  { %2704 = vmatprep.subr.bf16.mxu0 %v3010_v9  ;;  %v3071_v9 = vld [vmem:[%s3901_s1 + $0x390] sm:$0xff]  }
  0x41   :  { %2697 = vmatpush3.bf16.msra.mxu1 %v3009_v8  ;;  %v3070_v8 = vld [vmem:[%s3901_s1 + $0x3d0] sm:$0xff]  }
  0x42   :  { %1842 = vmatmul.mubr.bf16.vlgmr.msra.gmra.mxu0 %v2386_v6  ;;  %2726 = vmatprep.subr.bf16.mxu1 %v3014_v14  ;;  %v3068_v6 = vld [vmem:[%s3901_s1 + $0x350] sm:$0xff]   ;;  %v3076_v14 = vld [vmem:[%s3901_s1 + $0x340] sm:$0xff]  }
  0x43   :  { %2705 = vmatpush3.bf16.msra.mxu0 %v3013_v13  ;;  %1921 = vmatprep.mubr.bf16.mxu0 %v2391_v45  ;;  %v3075_v13 = vld [vmem:[%s3901_s1 + $0x388] sm:$0xff]   ;;  %v3105_v45 = vld [vmem:[%s3901_s1 + $0x410] sm:$0xff]  }
  0x44   :  { %1882 = vmatmul.mubr.bf16.vlgmr.msra.gmra.mxu1 %v2388_v11  ;;  %2706 = vmatprep.subr.bf16.mxu0 %v3016_v16  ;;  %v3073_v11 = vld [vmem:[%s3901_s1 + $0x308] sm:$0xff]   ;;  %v3078_v16 = vld [vmem:[%s3901_s1 + $0x3c0] sm:$0xff]  }
  0x45   :  { %2727 = vmatpush3.bf16.msra.mxu1 %v3015_v15  ;;  %1961 = vmatprep.mubr.bf16.mxu1 %v2393_v50  ;;  %v3077_v15 = vld [vmem:[%s3901_s1 + $0x300] sm:$0xff]   ;;  %v3110_v50 = vld [vmem:[%s3901_s1 + $0x4c8] sm:$0xff]  }
  0x46   :  { %2728 = vmatprep.subr.bf16.mxu1 %v3018_v18 }
  0x47   :  { %2707 = vmatpush3.bf16.msra.mxu0 %v3017_v17  ;;  %v27_v17 = vld [vmem:[%s3902_s0 + $0x30] sm:$0xff] }
  0x48   :  { %2708 = vmatprep.subr.bf16.mxu0 %v3020_v20  ;;  %v2394_v18 = vcombine.low %v27_v17, %v27_v17  ;;  %v3081_v20 = vld [vmem:[%s3901_s1 + $0x380] sm:$0xff]  }
  0x49   :  { %2729 = vmatpush3.bf16.msra.mxu1 %v3019_v19  ;;  %v2395_v19 = vcombine.high %v27_v17, %v27_v17  ;;  %v3139_v17 = vld [vmem:[%s3901_s1 + $0x598] sm:$0xff]  }
  0x4a   :  { %2730 = vmatprep.subr.bf16.mxu1 %v3022_v22  ;;  %v28_v22 = vld [vmem:[%s3902_s0 + $0x38] sm:$0xff] }
  0x4b   :  { %2709 = vmatpush3.bf16.msra.mxu0 %v3021_v21  ;;  %v3082_v21 = vld [vmem:[%s3901_s1 + $0x478] sm:$0xff]  }
  0x4c   :  { %2710 = vmatprep.subr.bf16.mxu0 %v3024_v24  ;;  %v2397_v24 = vcombine.high %v28_v22, %v28_v22 }
  0x4d   :  { %2731 = vmatpush3.bf16.msra.mxu1 %v3023_v23  ;;  %v2396_v23 = vcombine.low %v28_v22, %v28_v22  ;;  %v3144_v22 = vld [vmem:[%s3901_s1 + $0x548] sm:$0xff]  }
  0x4e   :  { %2732 = vmatprep.subr.bf16.mxu1 %v3026_v26  ;;  %v3086_v26 = vld [vmem:[%s3901_s1 + $0x4f8] sm:$0xff]  }
  0x4f   :  { %2711 = vmatpush3.bf16.msra.mxu0 %v3025_v25  ;;  %v3085_v25 = vld [vmem:[%s3901_s1 + $0x438] sm:$0xff]  }
  0x50   :  { %2712 = vmatprep.subr.bf16.mxu0 %v3028_v28  ;;  %v3088_v28 = vld [vmem:[%s3901_s1 + $0x470] sm:$0xff]  }
  0x51   :  { %2733 = vmatpush3.bf16.msra.mxu1 %v3027_v27  ;;  %v3087_v27 = vld [vmem:[%s3901_s1 + $0x4b8] sm:$0xff]  }
  0x52   :  { %2734 = vmatprep.subr.bf16.mxu1 %v3030_v30  ;;  %v3090_v30 = vld [vmem:[%s3901_s1 + $0x4f0] sm:$0xff]  }
  0x53   :  { %2713 = vmatpush3.bf16.msra.mxu0 %v3029_v29  ;;  %v3089_v29 = vld [vmem:[%s3901_s1 + $0x430] sm:$0xff]  }
  0x54   :  { %2714 = vmatprep.subr.bf16.mxu0 %v3032_v32  ;;  %v3092_v32 = vld [vmem:[%s3901_s1 + $0x468] sm:$0xff]  }
  0x55   :  { %2735 = vmatpush3.bf16.msra.mxu1 %v3031_v31  ;;  %v3091_v31 = vld [vmem:[%s3901_s1 + $0x4b0] sm:$0xff]  }
  0x56   :  { %2736 = vmatprep.subr.bf16.mxu1 %v3034_v34  ;;  %v3094_v34 = vld [vmem:[%s3901_s1 + $0x4e8] sm:$0xff]  }
  0x57   :  { %2715 = vmatpush3.bf16.msra.mxu0 %v3033_v33  ;;  %v3093_v33 = vld [vmem:[%s3901_s1 + $0x428] sm:$0xff]  }
  0x58   :  { %2716 = vmatprep.subr.bf16.mxu0 %v3036_v36  ;;  %v3096_v36 = vld [vmem:[%s3901_s1 + $0x460] sm:$0xff]  }
  0x59   :  { %2737 = vmatpush3.bf16.msra.mxu1 %v3035_v35  ;;  %v3095_v35 = vld [vmem:[%s3901_s1 + $0x4a8] sm:$0xff]  }
  0x5a   :  { %2738 = vmatprep.subr.bf16.mxu1 %v3038_v38  ;;  %v3098_v38 = vld [vmem:[%s3901_s1 + $0x4e0] sm:$0xff]  }
  0x5b   :  { %2717 = vmatpush3.bf16.msra.mxu0 %v3037_v37  ;;  %v3097_v37 = vld [vmem:[%s3901_s1 + $0x420] sm:$0xff]  }
  0x5c   :  { %2718 = vmatprep.subr.bf16.mxu0 %v3040_v40  ;;  %v3100_v40 = vld [vmem:[%s3901_s1 + $0x458] sm:$0xff]  }
  0x5d   :  { %2739 = vmatpush3.bf16.msra.mxu1 %v3039_v39  ;;  %v3099_v39 = vld [vmem:[%s3901_s1 + $0x4a0] sm:$0xff]  }
  0x5e   :  { %2740 = vmatprep.subr.bf16.mxu1 %v3042_v42  ;;  %v3102_v42 = vld [vmem:[%s3901_s1 + $0x4d8] sm:$0xff]  }
  0x5f   :  { %2719 = vmatpush3.bf16.msra.mxu0 %v3041_v41  ;;  %v3101_v41 = vld [vmem:[%s3901_s1 + $0x418] sm:$0xff]  }
  0x60   :  { %2748 = vmatprep.subr.bf16.mxu0 %v3046_v47  ;;  %v3107_v47 = vld [vmem:[%s3901_s1 + $0x490] sm:$0xff]  }
  0x61   :  { %2741 = vmatpush3.bf16.msra.mxu1 %v3045_v46  ;;  %v3106_v46 = vld [vmem:[%s3901_s1 + $0x4d0] sm:$0xff]  }
  0x62   :  { %1922 = vmatmul.mubr.bf16.vlgmr.msra.gmra.mxu0 %v2390_v44  ;;  %2770 = vmatprep.subr.bf16.mxu1 %v3050_v52  ;;  %v3104_v44 = vld [vmem:[%s3901_s1 + $0x450] sm:$0xff]   ;;  %v3112_v52 = vld [vmem:[%s3901_s1 + $0x440] sm:$0xff]  }
  0x63   :  { %2749 = vmatpush3.bf16.msra.mxu0 %v3049_v51  ;;  %2001 = vmatprep.mubr.bf16.mxu0 %v2395_v19  ;;  %v3111_v51 = vld [vmem:[%s3901_s1 + $0x488] sm:$0xff]   ;;  %v3141_v19 = vld [vmem:[%s3901_s1 + $0x510] sm:$0xff]  }
  0x64   :  { %1962 = vmatmul.mubr.bf16.vlgmr.msra.gmra.mxu1 %v2392_v49  ;;  %2750 = vmatprep.subr.bf16.mxu0 %v3052_v54  ;;  %v3109_v49 = vld [vmem:[%s3901_s1 + $0x408] sm:$0xff]   ;;  %v3114_v54 = vld [vmem:[%s3901_s1 + $0x4c0] sm:$0xff]  }
  0x65   :  { %2771 = vmatpush3.bf16.msra.mxu1 %v3051_v53  ;;  %2041 = vmatprep.mubr.bf16.mxu1 %v2397_v24  ;;  %v3113_v53 = vld [vmem:[%s3901_s1 + $0x400] sm:$0xff]   ;;  %v3146_v24 = vld [vmem:[%s3901_s1 + $0x5c8] sm:$0xff]  }
  0x66   :  { %2772 = vmatprep.subr.bf16.mxu1 %v3054_v56 }
  0x67   :  { %2751 = vmatpush3.bf16.msra.mxu0 %v3053_v55  ;;  %v29_v55 = vld [vmem:[%s3902_s0 + $0x40] sm:$0xff] }
  0x68   :  { %2752 = vmatprep.subr.bf16.mxu0 %v3056_v58  ;;  %v2398_v56 = vcombine.low %v29_v55, %v29_v55  ;;  %v3117_v58 = vld [vmem:[%s3901_s1 + $0x480] sm:$0xff]  }
  0x69   :  { %2773 = vmatpush3.bf16.msra.mxu1 %v3055_v57  ;;  %v2399_v57 = vcombine.high %v29_v55, %v29_v55 }
  0x6a   :  { %2774 = vmatprep.subr.bf16.mxu1 %v3058_v60  ;;  %v30_v60 = vld [vmem:[%s3902_s0 + $0x48] sm:$0xff] }
  0x6b   :  { %2753 = vmatpush3.bf16.msra.mxu0 %v3057_v59  ;;  %v3118_v59 = vld [vmem:[%s3901_s1 + $0x578] sm:$0xff]  }
  0x6c   :  { %2754 = vmatprep.subr.bf16.mxu0 %v3060_v62  ;;  %v2401_v62 = vcombine.high %v30_v60, %v30_v60 }
  0x6d   :  { %2775 = vmatpush3.bf16.msra.mxu1 %v3059_v61  ;;  %v2400_v61 = vcombine.low %v30_v60, %v30_v60 }
  0x6e   :  { %2776 = vmatprep.subr.bf16.mxu1 %v3062_v0  ;;  %v3122_v0 = vld [vmem:[%s3901_s1 + $0x5f8] sm:$0xff]  }
  0x6f   :  { %2755 = vmatpush3.bf16.msra.mxu0 %v3061_v63  ;;  %v3121_v63 = vld [vmem:[%s3901_s1 + $0x538] sm:$0xff]  }
  0x70   :  { %2756 = vmatprep.subr.bf16.mxu0 %v3064_v2  ;;  %v3124_v2 = vld [vmem:[%s3901_s1 + $0x570] sm:$0xff]  }
  0x71   :  { %2777 = vmatpush3.bf16.msra.mxu1 %v3063_v1  ;;  %v3123_v1 = vld [vmem:[%s3901_s1 + $0x5b8] sm:$0xff]  }
  0x72   :  { %2778 = vmatprep.subr.bf16.mxu1 %v3066_v4  ;;  %v3126_v4 = vld [vmem:[%s3901_s1 + $0x5f0] sm:$0xff]  }
  0x73   :  { %2757 = vmatpush3.bf16.msra.mxu0 %v3065_v3  ;;  %v3125_v3 = vld [vmem:[%s3901_s1 + $0x530] sm:$0xff]  }
  0x74   :  { %2758 = vmatprep.subr.bf16.mxu0 %v3068_v6  ;;  %v3128_v6 = vld [vmem:[%s3901_s1 + $0x568] sm:$0xff]  }
  0x75   :  { %2779 = vmatpush3.bf16.msra.mxu1 %v3067_v5  ;;  %v3127_v5 = vld [vmem:[%s3901_s1 + $0x5b0] sm:$0xff]  }
  0x76   :  { %2780 = vmatprep.subr.bf16.mxu1 %v3070_v8  ;;  %v3130_v8 = vld [vmem:[%s3901_s1 + $0x5e8] sm:$0xff]  }
  0x77   :  { %2759 = vmatpush3.bf16.msra.mxu0 %v3069_v7  ;;  %v3129_v7 = vld [vmem:[%s3901_s1 + $0x528] sm:$0xff]  }
  0x78   :  { %2760 = vmatprep.subr.bf16.mxu0 %v3072_v10  ;;  %v3132_v10 = vld [vmem:[%s3901_s1 + $0x560] sm:$0xff]  }
  0x79   :  { %2781 = vmatpush3.bf16.msra.mxu1 %v3071_v9  ;;  %v3131_v9 = vld [vmem:[%s3901_s1 + $0x5a8] sm:$0xff]  }
  0x7a   :  { %2782 = vmatprep.subr.bf16.mxu1 %v3074_v12  ;;  %v3134_v12 = vld [vmem:[%s3901_s1 + $0x5e0] sm:$0xff]  }
  0x7b   :  { %2761 = vmatpush3.bf16.msra.mxu0 %v3073_v11  ;;  %v3133_v11 = vld [vmem:[%s3901_s1 + $0x520] sm:$0xff]  }
  0x7c   :  { %2762 = vmatprep.subr.bf16.mxu0 %v3076_v14  ;;  %v3136_v14 = vld [vmem:[%s3901_s1 + $0x558] sm:$0xff]  }
  0x7d   :  { %2783 = vmatpush3.bf16.msra.mxu1 %v3075_v13  ;;  %v3135_v13 = vld [vmem:[%s3901_s1 + $0x5a0] sm:$0xff]  }
  0x7e   :  { %2784 = vmatprep.subr.bf16.mxu1 %v3078_v16  ;;  %v3138_v16 = vld [vmem:[%s3901_s1 + $0x5d8] sm:$0xff]  }
  0x7f   :  { %2763 = vmatpush3.bf16.msra.mxu0 %v3077_v15  ;;  %v3137_v15 = vld [vmem:[%s3901_s1 + $0x518] sm:$0xff]  }
  0x80   :  { %2792 = vmatprep.subr.bf16.mxu0 %v3082_v21  ;;  %v3143_v21 = vld [vmem:[%s3901_s1 + $0x590] sm:$0xff]  }
  0x81   :  { %2785 = vmatpush3.bf16.msra.mxu1 %v3081_v20  ;;  %v3142_v20 = vld [vmem:[%s3901_s1 + $0x5d0] sm:$0xff]  }
  0x82   :  { %2002 = vmatmul.mubr.bf16.vlgmr.msra.gmra.mxu0 %v2394_v18  ;;  %2814 = vmatprep.subr.bf16.mxu1 %v3086_v26  ;;  %v3140_v18 = vld [vmem:[%s3901_s1 + $0x550] sm:$0xff]   ;;  %v3148_v26 = vld [vmem:[%s3901_s1 + $0x540] sm:$0xff]  }
  0x83   :  { %2793 = vmatpush3.bf16.msra.mxu0 %v3085_v25  ;;  %2081 = vmatprep.mubr.bf16.mxu0 %v2399_v57  ;;  %v3147_v25 = vld [vmem:[%s3901_s1 + $0x588] sm:$0xff]  }
  0x84   :  { %2042 = vmatmul.mubr.bf16.vlgmr.msra.gmra.mxu1 %v2396_v23  ;;  %2794 = vmatprep.subr.bf16.mxu0 %v3088_v28  ;;  %v3145_v23 = vld [vmem:[%s3901_s1 + $0x508] sm:$0xff]   ;;  %v3150_v28 = vld [vmem:[%s3901_s1 + $0x5c0] sm:$0xff]  }
  0x85   :  { %2815 = vmatpush3.bf16.msra.mxu1 %v3087_v27  ;;  %2121 = vmatprep.mubr.bf16.mxu1 %v2401_v62  ;;  %v3149_v27 = vld [vmem:[%s3901_s1 + $0x500] sm:$0xff]  }
  0x86   :  { %2816 = vmatprep.subr.bf16.mxu1 %v3090_v30 }
  0x87   :  { %2795 = vmatpush3.bf16.msra.mxu0 %v3089_v29  ;;  %v31_v29 = vld [vmem:[%s3902_s0 + $0x50] sm:$0xff] }
  0x88   :  { %2796 = vmatprep.subr.bf16.mxu0 %v3092_v32  ;;  %v2402_v30 = vcombine.low %v31_v29, %v31_v29  ;;  %v3153_v32 = vld [vmem:[%s3901_s1 + $0x580] sm:$0xff]  }
  0x89   :  { %2817 = vmatpush3.bf16.msra.mxu1 %v3091_v31  ;;  %v2403_v31 = vcombine.high %v31_v29, %v31_v29 }
  0x8a   :  { %2818 = vmatprep.subr.bf16.mxu1 %v3094_v34  ;;  %v3177_v34 = vmov 0.0  }
  0x8b   :  { %2797 = vmatpush3.bf16.msra.mxu0 %v3093_v33  ;;  %v32_v33 = vld [vmem:[%s3902_s0 + $0x58] sm:$0xff] }
  0x8c   :  { %2798 = vmatprep.subr.bf16.mxu0 %v3096_v36  ;;  %v2405_v36 = vcombine.high %v32_v33, %v32_v33 }
  0x8d   :  { %2819 = vmatpush3.bf16.msra.mxu1 %v3095_v35  ;;  %v2404_v35 = vcombine.low %v32_v33, %v32_v33 }
  0x8e   :  { %2820 = vmatprep.subr.bf16.mxu1 %v3098_v38  ;;  %v3157_v38 = vld [vmem:[%s3901_s1 + $0x630] sm:$0xff]  }
  0x8f   :  { %2799 = vmatpush3.bf16.msra.mxu0 %v3097_v37  ;;  %v3156_v37 = vld [vmem:[%s3901_s1 + $0x638] sm:$0xff]  }
  0x90   :  { %2800 = vmatprep.subr.bf16.mxu0 %v3100_v40  ;;  %v3159_v40 = vld [vmem:[%s3901_s1 + $0x620] sm:$0xff]  }
  0x91   :  { %2821 = vmatpush3.bf16.msra.mxu1 %v3099_v39  ;;  %v3158_v39 = vld [vmem:[%s3901_s1 + $0x628] sm:$0xff]  }
  0x92   :  { %2822 = vmatprep.subr.bf16.mxu1 %v3102_v42  ;;  %v3161_v42 = vld [vmem:[%s3901_s1 + $0x610] sm:$0xff]  }
  0x93   :  { %2801 = vmatpush3.bf16.msra.mxu0 %v3101_v41  ;;  %v3160_v41 = vld [vmem:[%s3901_s1 + $0x618] sm:$0xff]  }
  0x94   :  { %2802 = vmatprep.subr.bf16.mxu0 %v3104_v44  ;;  %v3163_v44 = vld [vmem:[%s3901_s1 + $0x600] sm:$0xff]  }
  0x95   :  { %2823 = vmatpush3.bf16.msra.mxu1 %v3103_v43  ;;  %v3162_v43 = vld [vmem:[%s3901_s1 + $0x608] sm:$0xff]  }
  0x96   :  { %2824 = vmatprep.subr.bf16.mxu1 %v3106_v46 }
  0x97   :  { %2803 = vmatpush3.bf16.msra.mxu0 %v3105_v45  ;;  %v3164_v45 = vld [vmem:[%s3902_s0 + $0x60] ss:$0 sps:$4 sm:$0xff]  }
  0x98   :  { %2804 = vmatprep.subr.bf16.mxu0 %v3108_v48 }
  0x99   :  { %2825 = vmatpush3.bf16.msra.mxu1 %v3107_v47  ;;  %v2381_v47 = vld [vmem:[%s3903_s2] ss:$0 sm:$0xff] }
  0x9a   :  { %2826 = vmatprep.subr.bf16.mxu1 %v3110_v50 }
  0x9b   :  { %2805 = vmatpush3.bf16.msra.mxu0 %v3109_v49 }
  0x9c   :  { %2806 = vmatprep.subr.bf16.mxu0 %v3112_v52 }
  0x9d   :  { %2827 = vmatpush3.bf16.msra.mxu1 %v3111_v51 }
  0x9e   :  { %2828 = vmatprep.subr.bf16.mxu1 %v3114_v54 }
  0x9f   :  { %2807 = vmatpush3.bf16.msra.mxu0 %v3113_v53 }
  0xa0   :  { %2836 = vmatprep.subr.bf16.mxu0 %v3118_v59 }
  0xa1   :  { %2829 = vmatpush3.bf16.msra.mxu1 %v3117_v58 }
  0xa2   :  { %2082 = vmatmul.mubr.bf16.vlgmr.msra.gmra.mxu0 %v2398_v56  ;;  %2858 = vmatprep.subr.bf16.mxu1 %v3122_v0 }
  0xa3   :  { %2837 = vmatpush3.bf16.msra.mxu0 %v3121_v63  ;;  %2161 = vmatprep.mubr.bf16.mxu0 %v2403_v31 }
  0xa4   :  { %2122 = vmatmul.mubr.bf16.vlgmr.msra.gmra.mxu1 %v2400_v61  ;;  %2838 = vmatprep.subr.bf16.mxu0 %v3124_v2 }
  0xa5   :  { %2859 = vmatpush3.bf16.msra.mxu1 %v3123_v1  ;;  %2201 = vmatprep.mubr.bf16.mxu1 %v2405_v36 }
  0xa6   :  { %2860 = vmatprep.subr.bf16.mxu1 %v3126_v4 }
  0xa7   :  { %2839 = vmatpush3.bf16.msra.mxu0 %v3125_v3 }
  0xa8   :  { %2840 = vmatprep.subr.bf16.mxu0 %v3128_v6 }
  0xa9   :  { %2861 = vmatpush3.bf16.msra.mxu1 %v3127_v5 }
  0xaa   :  { %2862 = vmatprep.subr.bf16.mxu1 %v3130_v8  ;;  %v3166_v8 = vld [vmem:[%s3904_s3 + $0x30] sm:$0xff]  }
  0xab   :  { %2841 = vmatpush3.bf16.msra.mxu0 %v3129_v7  ;;  %v3165_v7 = vld [vmem:[%s3904_s3 + $0x38] sm:$0xff]  }
  0xac   :  { %2842 = vmatprep.subr.bf16.mxu0 %v3132_v10  ;;  %v3168_v10 = vld [vmem:[%s3904_s3 + $0x20] sm:$0xff]  }
  0xad   :  { %2863 = vmatpush3.bf16.msra.mxu1 %v3131_v9  ;;  %v3167_v9 = vld [vmem:[%s3904_s3 + $0x28] sm:$0xff]  }
  0xae   :  { %2864 = vmatprep.subr.bf16.mxu1 %v3134_v12  ;;  %v3170_v12 = vld [vmem:[%s3904_s3 + $0x10] sm:$0xff]  }
  0xaf   :  { %2843 = vmatpush3.bf16.msra.mxu0 %v3133_v11  ;;  %v3169_v11 = vld [vmem:[%s3904_s3 + $0x18] sm:$0xff]  }
  0xb0   :  { %2844 = vmatprep.subr.bf16.mxu0 %v3136_v14  ;;  %v3171_v14 = vld [vmem:[%s3904_s3 + $0x8] sm:$0xff]  }
  0xb1   :  { %2865 = vmatpush3.bf16.msra.mxu1 %v3135_v13 }
  0xb2   :  { %2866 = vmatprep.subr.bf16.mxu1 %v3138_v16 }
  0xb3   :  { %2845 = vmatpush3.bf16.msra.mxu0 %v3137_v15 }
  0xb4   :  { %2846 = vmatprep.subr.bf16.mxu0 %v3140_v18 }
  0xb5   :  { %2867 = vmatpush3.bf16.msra.mxu1 %v3139_v17 }
  0xb6   :  { %2868 = vmatprep.subr.bf16.mxu1 %v3142_v20  ;;  %v3172_v20 = vld [vmem:[%s3904_s3] sm:$0xff]  }
  0xb7   :  { %2847 = vmatpush3.bf16.msra.mxu0 %v3141_v19 }
  0xb8   :  { %2848 = vmatprep.subr.bf16.mxu0 %v3144_v22 }
  0xb9   :  { %2869 = vmatpush3.bf16.msra.mxu1 %v3143_v21 }
  0xba   :  { %2870 = vmatprep.subr.bf16.mxu1 %v3146_v24 }
  0xbb   :  { %2849 = vmatpush3.bf16.msra.mxu0 %v3145_v23 }
  0xbc   :  { %2850 = vmatprep.subr.bf16.mxu0 %v3148_v26 }
  0xbd   :  { %2871 = vmatpush3.bf16.msra.mxu1 %v3147_v25 }
  0xbe   :  { %2872 = vmatprep.subr.bf16.mxu1 %v3150_v28 }
  0xbf   :  { %2851 = vmatpush3.bf16.msra.mxu0 %v3149_v27 }
  0xc0   :  { %2898 = vmatprep.subr.bf16.mxu0 %v3177_v34 }
  0xc1   :  { %2873 = vmatpush3.bf16.msra.mxu1 %v3153_v32 }
  0xc2   :  { %2162 = vmatmul.mubr.bf16.vlgmr.msra.gmra.mxu0 %v2402_v30  ;;  %2918 = vmatprep.subr.bf16.mxu1 %v3177_v34 }
  0xc3   :  { %2899 = vmatpush3.bf16.msra.mxu0 %v3156_v37  ;;  %2914 = vmatprep.mubr.msk.bf16.mxu0 %vm3178_vm0, %v3177_v34 }
  0xc4   :  { %2202 = vmatmul.mubr.bf16.vlgmr.msra.gmra.mxu1 %v2404_v35  ;;  %2900 = vmatprep.subr.bf16.mxu0 %v3177_v34 }
  0xc5   :  { %2934 = vmatprep.mubr.msk.bf16.mxu1 %vm3178_vm0, %v3177_v34  ;;  %2919 = vmatpush3.bf16.msra.mxu1 %v3165_v7 }
  0xc6   :  { %2920 = vmatprep.subr.bf16.mxu1 %v3177_v34 }
  0xc7   :  { %2901 = vmatpush3.bf16.msra.mxu0 %v3157_v38 }
  0xc8   :  { %2902 = vmatprep.subr.bf16.mxu0 %v3177_v34 }
  0xc9   :  { %2921 = vmatpush3.bf16.msra.mxu1 %v3166_v8  ;;  %v2607_v8 = vld [vmem:[%s3905_s4] ss:$0 sm:$0xff] }
  0xca   :  { %2922 = vmatprep.subr.bf16.mxu1 %v3177_v34 }
  0xcb   :  { %2903 = vmatpush3.bf16.msra.mxu0 %v3158_v39 }
  0xcc   :  { %2904 = vmatprep.subr.bf16.mxu0 %v3177_v34 }
  0xcd   :  { %2923 = vmatpush3.bf16.msra.mxu1 %v3167_v9 }
  0xce   :  { %2924 = vmatprep.subr.bf16.mxu1 %v3177_v34 }
  0xcf   :  { %2905 = vmatpush3.bf16.msra.mxu0 %v3159_v40 }
  0xd0   :  { %2906 = vmatprep.subr.bf16.mxu0 %v3177_v34 }
  0xd1   :  { %2925 = vmatpush3.bf16.msra.mxu1 %v3168_v10 }
  0xd2   :  { %2926 = vmatprep.subr.bf16.mxu1 %v3177_v34 }
  0xd3   :  { %2907 = vmatpush3.bf16.msra.mxu0 %v3160_v41 }
  0xd4   :  { %2908 = vmatprep.subr.bf16.mxu0 %v3177_v34 }
  0xd5   :  { %2927 = vmatpush3.bf16.msra.mxu1 %v3169_v11 }
  0xd6   :  { %2928 = vmatprep.subr.bf16.mxu1 %v3177_v34 }
  0xd7   :  { %2909 = vmatpush3.bf16.msra.mxu0 %v3161_v42 }
  0xd8   :  { %2910 = vmatprep.subr.bf16.mxu0 %v3177_v34 }
  0xd9   :  { %2929 = vmatpush3.bf16.msra.mxu1 %v3170_v12 }
  0xda   :  { %2930 = vmatprep.subr.bf16.mxu1 %v3177_v34 }
  0xdb   :  { %2911 = vmatpush3.bf16.msra.mxu0 %v3162_v43 }
  0xdc   :  { %2912 = vmatprep.subr.bf16.mxu0 %v3177_v34 }
  0xdd   :  { %2931 = vmatpush3.bf16.msra.mxu1 %v3171_v14 }
  0xde   :  { %2932 = vmatprep.subr.bf16.mxu1 %v3177_v34 }
  0xdf   :  { %2913 = vmatpush3.bf16.msra.mxu0 %v3163_v44 }
  0xe1   :  { %2933 = vmatpush3.bf16.msra.mxu1 %v3172_v20 }
  0xe2   :  { %v2632_v46 = vpop.f32.mrf.mxu0  ;;  %2915 = vmatmul.mubr.bf16.vlgmr.msra.gmra.mxu0 %v3164_v45 }
  0xe4   :  { %v2633_v48 = vpop.f32.mrf.mxu0  ;;  %v2654_v49 = vpop.f32.mrf.mxu1 }
  0xe5   :  { %v2634_v50 = vadd.f32 %v2633_v48, %v2632_v46 }
  0xe6   :  { %v2635_v51 = vpop.f32.mrf.mxu0  ;;  %v2655_v52 = vpop.f32.mrf.mxu1 }
  0xe7   :  { %v1764_v53 = vadd.f32 %v2634_v50, %v2381_v47  ;;  %v2656_v54 = vadd.f32 %v2655_v52, %v2654_v49 }
  0xe8   :  { %v2636_v55 = vpop.f32.mrf.mxu0  ;;  %v2657_v56 = vpop.f32.mrf.mxu1 }
  0xe9   :  { %v1804_v57 = vadd.f32 %v2656_v54, %v1764_v53 }
  0xea   :  { %v2658_v58 = vpop.f32.mrf.mxu1 }
 0x102   :  { %v2676_v59 = vpop.f32.mrf.mxu0 }
 0x104   :  { %v2677_v60 = vpop.f32.mrf.mxu0  ;;  %v2698_v62 = vpop.f32.mrf.mxu1 }
 0x105   :  { %v2678_v61 = vadd.f32 %v2677_v60, %v2676_v59 }
 0x106   :  { %v2679_v63 = vpop.f32.mrf.mxu0  ;;  %v2699_v1 = vpop.f32.mrf.mxu1 }
 0x107   :  { %v1844_v0 = vadd.f32 %v2678_v61, %v1804_v57  ;;  %v2700_v2 = vadd.f32 %v2699_v1, %v2698_v62 }
 0x108   :  { %v2680_v3 = vpop.f32.mrf.mxu0  ;;  %v2701_v4 = vpop.f32.mrf.mxu1 }
 0x109   :  { %v1884_v5 = vadd.f32 %v2700_v2, %v1844_v0 }
 0x10a   :  { %v2702_v6 = vpop.f32.mrf.mxu1 }
 0x10b   :  { %v2362_v6 = vlaneseq }
 0x10d   :  { %v2363_v7 = vand.u32 127, %v2362_v6 }
 0x10f   :  { %vm2364_vm1 = vcmp.lt.s32.totalorder %v2363_v7, 6 }
 0x122   :  { %v2720_v13 = vpop.f32.mrf.mxu0 }
 0x124   :  { %v2721_v15 = vpop.f32.mrf.mxu0  ;;  %v2742_v16 = vpop.f32.mrf.mxu1 }
 0x125   :  { %v2722_v17 = vadd.f32 %v2721_v15, %v2720_v13 }
 0x126   :  { %v2723_v18 = vpop.f32.mrf.mxu0  ;;  %v2743_v19 = vpop.f32.mrf.mxu1 }
 0x127   :  { %v1924_v21 = vadd.f32 %v2722_v17, %v1884_v5  ;;  %v2744_v22 = vadd.f32 %v2743_v19, %v2742_v16 }
 0x128   :  { %v2724_v23 = vpop.f32.mrf.mxu0  ;;  %v2745_v24 = vpop.f32.mrf.mxu1 }
 0x129   :  { %v1964_v25 = vadd.f32 %v2744_v22, %v1924_v21 }
 0x12a   :  { %v2746_v26 = vpop.f32.mrf.mxu1 }
 0x142   :  { %v2764_v27 = vpop.f32.mrf.mxu0 }
 0x144   :  { %v2765_v28 = vpop.f32.mrf.mxu0  ;;  %v2786_v29 = vpop.f32.mrf.mxu1 }
 0x145   :  { %v2766_v30 = vadd.f32 %v2765_v28, %v2764_v27 }
 0x146   :  { %v2767_v31 = vpop.f32.mrf.mxu0  ;;  %v2787_v32 = vpop.f32.mrf.mxu1 }
 0x147   :  { %v2004_v33 = vadd.f32 %v2766_v30, %v1964_v25  ;;  %v2788_v34 = vadd.f32 %v2787_v32, %v2786_v29 }
 0x148   :  { %v2768_v35 = vpop.f32.mrf.mxu0  ;;  %v2789_v36 = vpop.f32.mrf.mxu1 }
 0x149   :  { %v2044_v37 = vadd.f32 %v2788_v34, %v2004_v33 }
 0x14a   :  { %v2790_v38 = vpop.f32.mrf.mxu1 }
 0x162   :  { %v2808_v39 = vpop.f32.mrf.mxu0 }
 0x164   :  { %v2809_v40 = vpop.f32.mrf.mxu0  ;;  %v2830_v41 = vpop.f32.mrf.mxu1 }
 0x165   :  { %v2810_v55 = vadd.f32 %v2809_v40, %v2808_v39 }
 0x166   :  { %v2811_v42 = vpop.f32.mrf.mxu0  ;;  %v2831_v43 = vpop.f32.mrf.mxu1 }
 0x167   :  { %v2084_v56 = vadd.f32 %v2810_v55, %v2044_v37  ;;  %v2832_v57 = vadd.f32 %v2831_v43, %v2830_v41 }
 0x168   :  { %v2812_v44 = vpop.f32.mrf.mxu0  ;;  %v2833_v45 = vpop.f32.mrf.mxu1 }
 0x169   :  { %v2124_v59 = vadd.f32 %v2832_v57, %v2084_v56 }
 0x16a   :  { %v2834_v46 = vpop.f32.mrf.mxu1 }
 0x182   :  { %v2852_v47 = vpop.f32.mrf.mxu0 }
 0x184   :  { %v2853_v48 = vpop.f32.mrf.mxu0  ;;  %v2874_v49 = vpop.f32.mrf.mxu1 }
 0x185   :  { %v2854_v58 = vadd.f32 %v2853_v48, %v2852_v47 }
 0x186   :  { %v2855_v50 = vpop.f32.mrf.mxu0  ;;  %v2875_v51 = vpop.f32.mrf.mxu1 }
 0x187   :  { %v2164_v60 = vadd.f32 %v2854_v58, %v2124_v59  ;;  %v2876_v61 = vadd.f32 %v2875_v51, %v2874_v49 }
 0x188   :  { %v2856_v52 = vpop.f32.mrf.mxu0  ;;  %v2877_v53 = vpop.f32.mrf.mxu1 }
 0x189   :  { %v2204_v62 = vadd.f32 %v2876_v61, %v2164_v60 }
 0x18a   :  { %v2878_v54 = vpop.f32.mrf.mxu1 }
 0x1a2   :  { %v2243_v63 = vpop.f32.mrf.mxu0 }
 0x1a3   :  { %v2244_v0 = vadd.f32 %v2243_v63, %v2204_v62 }
 0x1a4   :  { %v2916_v1 = vpop.f32.mrf.mxu0 }
 0x1a5   :  { %v2249_v2 = vmax.f32 %v2244_v0, 0.0 }
 0x1a6   :  { %v2246_v3 = vpop.f32.mrf.mxu0 }
 0x1a7   :  { %v2250_v4 = vpack.c.bf16 %v2249_v2, %v2249_v2 }
 0x1a8   :  { %v2917_v5 = vpop.f32.mrf.mxu0 }
 0x1a9   :  { %2935 = vmatmul.mubr.bf16.vlgmr.msra.gmra.mxu1 %v2250_v4 }
 0x269   :  { %v2356_v9 = vpop.f32.mrf.mxu1 }
 0x26a   :  { %v2357_v10 = vadd.f32 %v2607_v8, %v2356_v9 }
 0x26b   :  { %v2936_v11 = vpop.f32.mrf.mxu1 }
 0x26c   :  { %v2365_v12 = vsel %vm2364_vm1, %v2357_v10, -1e+30 }
 0x26d   :  { %2366 = vmax.xlane.f32.xlu0 %v2365_v12  ;;  %v2359_v13 = vpop.f32.mrf.mxu1 }
 0x26f   :  { %v2937_v14 = vpop.f32.mrf.mxu1 }
 0x2f6   :  { %v2367_v15 = vpop.xlane.xlu0 %2366 }
 0x2f7   :  { %v2368_v16 = vsub.f32 %v2365_v12, %v2367_v15 }
 0x2f9   :  { %v2369_v17 = vmul.f32 1.442695, %v2368_v16 }
 0x2fb   :  { %3173 = vpow2.f32 %v2369_v17 }
 0x308   :  { %v3174_v18 = vpop.eup %3173 }
 0x309   :  { %2371 = vadd.xlane.f32.xlu0 %v3174_v18 }
 0x392   :  { %v2372_v19 = vpop.xlane.xlu0 %2371 }
 0x393   :  { %3175 = vrcp.f32 %v2372_v19 }
 0x3a0   :  { %v3176_v20 = vpop.eup %3175 }
 0x3a1   :  { %v2374_v21 = vmul.f32 %v3176_v20, %v3174_v18 }
 0x3a3   :  { %v2375_v22 = vsel %vm2364_vm1, %v2374_v21, %v2357_v10 }
 0x3a4   :  { %2376 = vst [vmem:[%s3906_s5] sm:$0xff] %v2375_v22 }

</bundles_post_ra>
